<compile_context>
chip_gen: v7x
topology: tpu7x:2x2x1
jax: 0.10.0
libtpu: 0.0.40
codegen_flags: <defaults>
</compile_context>

<pallas_src>
import math
import jax
import jax.numpy as jnp
from jax.experimental import pallas as pl
from jax.experimental.pallas import tpu as pltpu

# ---- small config consistent with MixtralConfig (head_dim kept at the real 128) ----
BATCH = 2
SEQ = 8
HEAD_DIM = 128
NUM_HEADS = 2
NUM_KV_HEADS = 1
N_REP = NUM_HEADS // NUM_KV_HEADS            # GQA groups
HIDDEN = NUM_HEADS * HEAD_DIM                # 256
FFN_DIM = 128                                # per-expert intermediate size
NUM_EXPERTS = 8
TOP_K = 2
RMS_EPS = 1e-6
ROPE_THETA = 1e6
SCALE = 1.0 / math.sqrt(HEAD_DIM)
TOKENS = BATCH * SEQ
# TODO(synk): attention_dropout skipped (Mixtral default p=0.0 / eval mode).
# TODO(synk): KV-cache decode path (scatter_update_/actual_seq_lengths_kv) and the
#             fused add+RMSNorm `past_residual` input are not implemented
#             (prefill with past_residual=None only); world_size=1 so no all_reduce.


def make_rope_tables(seq_len, head_dim, theta):
    inv_freq = 1.0 / (theta ** (jnp.arange(0, head_dim, 2, dtype=jnp.float32) / head_dim))
    t = jnp.arange(seq_len, dtype=jnp.float32)
    freqs = jnp.outer(t, inv_freq)                   # (S, hd/2)
    emb = jnp.concatenate([freqs, freqs], axis=-1)   # (S, hd)
    return jnp.cos(emb), jnp.sin(emb)


def decoder_layer_kernel(x_ref, mask_ref, ln1_ref, ln2_ref,
                         wq_ref, wk_ref, wv_ref, wo_ref,
                         cos_ref, sin_ref,
                         wg_ref, w1_ref, w3_ref, w2_ref,
                         resid_ref, out_ref,
                         q_sc, k_sc, v_sc):
    f32 = jnp.float32
    x = x_ref[...].astype(f32)                                   # (T, H) flattened tokens

    # ---- input RMSNorm (past_residual=None path: residual = raw input) ----
    var = jnp.mean(x * x, axis=-1, keepdims=True)
    hn = x * jax.lax.rsqrt(var + RMS_EPS) * ln1_ref[...]         # (T, H)

    cos = cos_ref[...]                                           # (T, hd)
    sin = sin_ref[...]                                           # (T, hd), sign-folded
    half = HEAD_DIM // 2

    # ---- Q/K/V projections written head-major into VMEM scratch ----
    for h in range(NUM_HEADS):
        qh = jnp.dot(hn, wq_ref[h], preferred_element_type=f32)  # (T, hd); scale pre-folded
        qh = qh * cos + pltpu.roll(qh, half, 1) * sin            # RoPE via XLU lane roll
        q_sc[h] = qh.reshape(BATCH, SEQ, HEAD_DIM)

    for g in range(NUM_KV_HEADS):
        kh = jnp.dot(hn, wk_ref[g], preferred_element_type=f32)
        kh = kh * cos + pltpu.roll(kh, half, 1) * sin
        vh = jnp.dot(hn, wv_ref[g], preferred_element_type=f32)
        kh = kh.reshape(BATCH, SEQ, HEAD_DIM)
        vh = vh.reshape(BATCH, SEQ, HEAD_DIM)
        for r in range(N_REP):                                   # GQA repeat_kv (free stores)
            k_sc[g * N_REP + r] = kh
            v_sc[g * N_REP + r] = vh

    q_all = q_sc[...].reshape(NUM_HEADS * BATCH, SEQ, HEAD_DIM)
    k_all = k_sc[...].reshape(NUM_HEADS * BATCH, SEQ, HEAD_DIM)
    v_all = v_sc[...].reshape(NUM_HEADS * BATCH, SEQ, HEAD_DIM)

    # ---- batched attention over (head, batch); mask add hoisted to one op ----
    s = jnp.einsum('bqd,bkd->bqk', q_all, k_all, preferred_element_type=f32)
    s = s + mask_ref[...]                                        # additive causal mask
    s = s - jnp.max(s, axis=-1, keepdims=True)
    p = jnp.exp(s)
    p = p * pl.reciprocal(jnp.sum(p, axis=-1, keepdims=True), approx=False)
    o = jnp.einsum('bqk,bkd->bqd', p, v_all, preferred_element_type=f32)

    # ---- o_proj: per-head accumulate with head-major weights (no lane concat) ----
    o = o.reshape(NUM_HEADS, TOKENS, HEAD_DIM)
    attn = jnp.dot(o[0], wo_ref[0], preferred_element_type=f32)
    for h in range(1, NUM_HEADS):
        attn = attn + jnp.dot(o[h], wo_ref[h], preferred_element_type=f32)

    # ---- residual add + post-attention RMSNorm ----
    resid = x + attn                                             # layer output #1 (residual stream)
    var2 = jnp.mean(resid * resid, axis=-1, keepdims=True)
    h2 = resid * jax.lax.rsqrt(var2 + RMS_EPS) * ln2_ref[...]    # (T, H)

    # ---- MoE router: softmax + top-2, expressed as a dense per-expert mask ----
    logits = jnp.dot(h2, wg_ref[...], preferred_element_type=f32)    # (T, E)
    logits = logits - jnp.max(logits, axis=-1, keepdims=True)
    rw = jnp.exp(logits)
    rw = rw * pl.reciprocal(jnp.sum(rw, axis=-1, keepdims=True), approx=False)

    iota = jax.lax.broadcasted_iota(jnp.int32, (TOKENS, NUM_EXPERTS), 1).astype(f32)
    top1 = jnp.max(rw, axis=-1, keepdims=True)
    idx1 = jnp.min(jnp.where(rw == top1, iota, float(NUM_EXPERTS)), axis=-1, keepdims=True)
    m1 = iota == idx1
    rw2 = jnp.where(m1, -jnp.inf, rw)
    top2 = jnp.max(rw2, axis=-1, keepdims=True)
    idx2 = jnp.min(jnp.where(rw2 == top2, iota, float(NUM_EXPERTS)), axis=-1, keepdims=True)
    m2 = iota == idx2
    inv_denom = pl.reciprocal(top1 + top2, approx=False)
    combine = m1.astype(f32) * (top1 * inv_denom) + m2.astype(f32) * (top2 * inv_denom)  # (T, E)

    # ---- experts: silu(x@w1) * (x@w3) -> @w2, weighted sum over experts ----
    moe = jnp.zeros((TOKENS, HIDDEN), f32)
    for e in range(NUM_EXPERTS):
        a1 = jnp.dot(h2, w1_ref[e], preferred_element_type=f32)       # (T, F)
        a3 = jnp.dot(h2, w3_ref[e], preferred_element_type=f32)       # (T, F)
        inter = a1 * pl.reciprocal(1.0 + jnp.exp(-a1), approx=False) * a3   # silu(a1)*a3
        oe = jnp.dot(inter, w2_ref[e], preferred_element_type=f32)    # (T, H)
        moe = moe + combine[:, e:e + 1] * oe

    resid_ref[...] = resid.astype(resid_ref.dtype)
    out_ref[...] = moe.astype(out_ref.dtype)


def mixtral_decoder_layer(x, attn_mask, ln1_w, ln2_w, wq_t, wk_t, wv_t, wo_t,
                          wg_t, w1, w3, w2):
    """Returns (residual, hidden_states) like MixtralDecoderLayer.forward."""
    B, S, H = x.shape
    T = B * S
    x_flat = x.reshape(T, H)                                     # lane-dense token slab

    # Additive mask broadcast to the kernel's flattened (head, batch) ordering
    # (hoisted out of the kernel; identical for every head).
    mask_flat = jnp.broadcast_to(attn_mask[:, 0][None], (NUM_HEADS, B, S, S)) \
                   .reshape(NUM_HEADS * B, S, S)

    # Rotary tables per flattened token; rotate_half sign folded into sin so the
    # kernel does t*cos + roll(t, hd/2)*sin_signed.
    cos, sin = make_rope_tables(S, HEAD_DIM, ROPE_THETA)          # (S, hd)
    sign = jnp.concatenate([-jnp.ones((HEAD_DIM // 2,), jnp.float32),
                            jnp.ones((HEAD_DIM // 2,), jnp.float32)])
    cos_t = jnp.tile(cos, (B, 1))                                 # (T, hd)
    sin_t = jnp.tile(sin * sign, (B, 1))                          # (T, hd)

    # Wrapper-side layout plumbing: head-major weights, attention scale folded
    # into the Q projection weight (RoPE is linear, so this is exact).
    wq_h = (wq_t * SCALE).reshape(H, NUM_HEADS, HEAD_DIM).transpose(1, 0, 2)   # (nh, H, hd)
    wk_h = wk_t.reshape(H, NUM_KV_HEADS, HEAD_DIM).transpose(1, 0, 2)          # (nkv, H, hd)
    wv_h = wv_t.reshape(H, NUM_KV_HEADS, HEAD_DIM).transpose(1, 0, 2)
    wo_h = wo_t.reshape(NUM_HEADS, HEAD_DIM, H)                                # (nh, hd, H)

    # No grid: single kernel invocation; by default every operand is brought
    # whole into VMEM (total ~4 MiB at these sizes), outputs are (T, H)=(16,256)
    # lane-dense slabs.
    resid_flat, moe_flat = pl.pallas_call(
        decoder_layer_kernel,
        out_shape=(jax.ShapeDtypeStruct((T, H), x.dtype),
                   jax.ShapeDtypeStruct((T, H), x.dtype)),
        scratch_shapes=[
            pltpu.VMEM((NUM_HEADS, B, S, HEAD_DIM), jnp.float32),   # q, head-major
            pltpu.VMEM((NUM_HEADS, B, S, HEAD_DIM), jnp.float32),   # k (GQA-expanded)
            pltpu.VMEM((NUM_HEADS, B, S, HEAD_DIM), jnp.float32),   # v (GQA-expanded)
        ],
        compiler_params=pltpu.CompilerParams(vmem_limit_bytes=48 * 1024 * 1024),
    )(x_flat, mask_flat, ln1_w.reshape(1, H), ln2_w.reshape(1, H),
      wq_h, wk_h, wv_h, wo_h, cos_t, sin_t, wg_t, w1, w3, w2)

    return resid_flat.reshape(B, S, H), moe_flat.reshape(B, S, H)


def reference_decoder_layer(x, attn_mask, ln1_w, ln2_w, wq_t, wk_t, wv_t, wo_t,
                            wg_t, w1, w3, w2):
    """Pure-JAX reference mirroring the PyTorch MixtralDecoderLayer semantics."""
    B, S, H = x.shape
    cos, sin = make_rope_tables(S, HEAD_DIM, ROPE_THETA)

    def rms(h, w):
        hf = h.astype(jnp.float32)
        var = jnp.mean(hf * hf, axis=-1, keepdims=True)
        return hf * jax.lax.rsqrt(var + RMS_EPS) * w

    residual = x
    hn = rms(x, ln1_w)

    q = (hn @ wq_t).reshape(B, S, NUM_HEADS, HEAD_DIM).transpose(0, 2, 1, 3)
    k = (hn @ wk_t).reshape(B, S, NUM_KV_HEADS, HEAD_DIM).transpose(0, 2, 1, 3)
    v = (hn @ wv_t).reshape(B, S, NUM_KV_HEADS, HEAD_DIM).transpose(0, 2, 1, 3)

    def rope(t):
        half = HEAD_DIM // 2
        rot = jnp.concatenate([-t[..., half:], t[..., :half]], axis=-1)
        return t * cos[None, None] + rot * sin[None, None]

    q, k = rope(q), rope(k)
    k = jnp.repeat(k, N_REP, axis=1)
    v = jnp.repeat(v, N_REP, axis=1)

    s = jnp.einsum('bhqd,bhkd->bhqk', q, k) * SCALE + attn_mask
    p = jax.nn.softmax(s.astype(jnp.float32), axis=-1)
    o = jnp.einsum('bhqk,bhkd->bhqd', p, v).transpose(0, 2, 1, 3).reshape(B, S, H)
    attn_out = o @ wo_t

    residual = residual + attn_out
    h2 = rms(residual, ln2_w).reshape(B * S, H)

    logits = h2 @ wg_t
    rw = jax.nn.softmax(logits.astype(jnp.float32), axis=-1)
    topw, topi = jax.lax.top_k(rw, TOP_K)
    topw = topw / jnp.sum(topw, axis=-1, keepdims=True)

    moe = jnp.zeros_like(h2)
    for e in range(NUM_EXPERTS):
        inter = jax.nn.silu(h2 @ w1[e]) * (h2 @ w3[e])
        oe = inter @ w2[e]
        we = jnp.sum(jnp.where(topi == e, topw, 0.0), axis=-1, keepdims=True)
        moe = moe + we * oe

    return residual, moe.reshape(B, S, H)


if __name__ == "__main__":
    key = jax.random.PRNGKey(0)
    ks = jax.random.split(key, 11)

    x = jax.random.normal(ks[0], (BATCH, SEQ, HIDDEN), dtype=jnp.float32)
    ln1_w = 1.0 + 0.1 * jax.random.normal(ks[1], (HIDDEN,), dtype=jnp.float32)
    ln2_w = 1.0 + 0.1 * jax.random.normal(ks[2], (HIDDEN,), dtype=jnp.float32)

    # nn.Linear weights are (out, in); we store transposes (in, out).  The fused
    # c_attn of the module is represented as its q/k/v column blocks.
    wq_t = 0.02 * jax.random.normal(ks[3], (HIDDEN, NUM_HEADS * HEAD_DIM), dtype=jnp.float32)
    wk_t = 0.02 * jax.random.normal(ks[4], (HIDDEN, NUM_KV_HEADS * HEAD_DIM), dtype=jnp.float32)
    wv_t = 0.02 * jax.random.normal(ks[5], (HIDDEN, NUM_KV_HEADS * HEAD_DIM), dtype=jnp.float32)
    wo_t = 0.02 * jax.random.normal(ks[6], (NUM_HEADS * HEAD_DIM, HIDDEN), dtype=jnp.float32)

    wg_t = 0.02 * jax.random.normal(ks[7], (HIDDEN, NUM_EXPERTS), dtype=jnp.float32)
    w1 = 0.02 * jax.random.normal(ks[8], (NUM_EXPERTS, HIDDEN, FFN_DIM), dtype=jnp.float32)
    w3 = 0.02 * jax.random.normal(ks[9], (NUM_EXPERTS, HIDDEN, FFN_DIM), dtype=jnp.float32)
    w2 = 0.02 * jax.random.normal(ks[10], (NUM_EXPERTS, FFN_DIM, HIDDEN), dtype=jnp.float32)

    # Additive causal mask (bsz, 1, q_len, kv_len), HF-style.
    neg = jnp.finfo(jnp.float32).min
    causal = jnp.where(jnp.arange(SEQ)[:, None] >= jnp.arange(SEQ)[None, :], 0.0, neg)
    attn_mask = jnp.broadcast_to(causal, (BATCH, 1, SEQ, SEQ)).astype(jnp.float32)

    resid, hidden = mixtral_decoder_layer(x, attn_mask, ln1_w, ln2_w,
                                          wq_t, wk_t, wv_t, wo_t, wg_t, w1, w3, w2)
    resid = jax.block_until_ready(resid)
    hidden = jax.block_until_ready(hidden)

    ref_resid, ref_hidden = reference_decoder_layer(x, attn_mask, ln1_w, ln2_w,
                                                    wq_t, wk_t, wv_t, wo_t, wg_t, w1, w3, w2)

    assert resid.shape == (BATCH, SEQ, HIDDEN) and hidden.shape == (BATCH, SEQ, HIDDEN)
    assert jnp.allclose(resid, ref_resid, rtol=1e-3, atol=1e-3), "residual mismatch vs reference"
    assert jnp.allclose(hidden, ref_hidden, rtol=1e-3, atol=1e-3), "MoE output mismatch vs reference"

    print("KERNEL_OK")
</pallas_src>

<mosaic_0001>
module attributes {stable_mosaic.version = 11 : i64} {
  func.func @decoder_layer_kernel(%arg0: memref<16x256xf32, #tpu.memory_space<vmem>>, %arg1: memref<4x8x8xf32, #tpu.memory_space<vmem>>, %arg2: memref<1x256xf32, #tpu.memory_space<vmem>>, %arg3: memref<1x256xf32, #tpu.memory_space<vmem>>, %arg4: memref<2x256x128xf32, #tpu.memory_space<vmem>>, %arg5: memref<1x256x128xf32, #tpu.memory_space<vmem>>, %arg6: memref<1x256x128xf32, #tpu.memory_space<vmem>>, %arg7: memref<2x128x256xf32, #tpu.memory_space<vmem>>, %arg8: memref<16x128xf32, #tpu.memory_space<vmem>>, %arg9: memref<16x128xf32, #tpu.memory_space<vmem>>, %arg10: memref<256x8xf32, #tpu.memory_space<vmem>>, %arg11: memref<8x256x128xf32, #tpu.memory_space<vmem>>, %arg12: memref<8x256x128xf32, #tpu.memory_space<vmem>>, %arg13: memref<8x128x256xf32, #tpu.memory_space<vmem>>, %arg14: memref<16x256xf32, #tpu.memory_space<vmem>>, %arg15: memref<16x256xf32, #tpu.memory_space<vmem>>, %arg16: memref<2x2x8x128xf32, #tpu.memory_space<vmem>>, %arg17: memref<2x2x8x128xf32, #tpu.memory_space<vmem>>, %arg18: memref<2x2x8x128xf32, #tpu.memory_space<vmem>>) attributes {dimension_semantics = [], scalar_prefetch = 0 : i64, scratch_operands = 3 : i64, tpu.core_type = #tpu.core_type<tc>} {
    %c0 = arith.constant 0 : index
    %c0_0 = arith.constant 0 : index
    %0 = vector.load %arg0[%c0, %c0_0] : memref<16x256xf32, #tpu.memory_space<vmem>>, vector<16x256xf32>
    %1 = arith.mulf %0, %0 : vector<16x256xf32>
    %cst = arith.constant dense<0.000000e+00> : vector<16xf32>
    %2 = vector.multi_reduction <add>, %1, %cst [1] : vector<16x256xf32> to vector<16xf32>
    %3 = vector.shape_cast %2 : vector<16xf32> to vector<16x1xf32>
    %cst_1 = arith.constant 2.560000e+02 : f32
    %4 = vector.broadcast %cst_1 : f32 to vector<16x1xf32>
    %5 = arith.divf %3, %4 : vector<16x1xf32>
    %cst_2 = arith.constant 9.99999997E-7 : f32
    %6 = vector.broadcast %cst_2 : f32 to vector<16x1xf32>
    %7 = arith.addf %5, %6 : vector<16x1xf32>
    %8 = math.rsqrt %7 : vector<16x1xf32>
    %9 = vector.broadcast %8 : vector<16x1xf32> to vector<16x256xf32>
    %10 = arith.mulf %0, %9 : vector<16x256xf32>
    %c0_3 = arith.constant 0 : index
    %c0_4 = arith.constant 0 : index
    %11 = vector.load %arg2[%c0_3, %c0_4] : memref<1x256xf32, #tpu.memory_space<vmem>>, vector<1x256xf32>
    %12 = vector.broadcast %11 : vector<1x256xf32> to vector<16x256xf32>
    %13 = arith.mulf %10, %12 : vector<16x256xf32>
    %c0_5 = arith.constant 0 : index
    %c0_6 = arith.constant 0 : index
    %14 = vector.load %arg8[%c0_5, %c0_6] : memref<16x128xf32, #tpu.memory_space<vmem>>, vector<16x128xf32>
    %c0_7 = arith.constant 0 : index
    %c0_8 = arith.constant 0 : index
    %15 = vector.load %arg9[%c0_7, %c0_8] : memref<16x128xf32, #tpu.memory_space<vmem>>, vector<16x128xf32>
    %c0_9 = arith.constant 0 : index
    %c0_10 = arith.constant 0 : index
    %c0_11 = arith.constant 0 : index
    %16 = vector.load %arg4[%c0_9, %c0_10, %c0_11] : memref<2x256x128xf32, #tpu.memory_space<vmem>>, vector<1x256x128xf32>
    %17 = vector.shape_cast %16 : vector<1x256x128xf32> to vector<256x128xf32>
    %cst_12 = arith.constant dense<0.000000e+00> : vector<16x128xf32>
    %18 = tpu.matmul %13, %17, %cst_12 {dimension_numbers = #tpu.dot_dimension_numbers<[1], [0], [0], [1], [0, 0, 1, 1], [], []>} : vector<16x256xf32>, vector<256x128xf32>, vector<16x128xf32> -> vector<16x128xf32>
    %19 = arith.mulf %18, %14 : vector<16x128xf32>
    %c64_i32 = arith.constant 64 : i32
    %20 = tpu.dynamic_rotate %18 by %c64_i32 dim 1 : vector<16x128xf32>, i32 -> vector<16x128xf32>
    %21 = arith.mulf %20, %15 : vector<16x128xf32>
    %22 = arith.addf %19, %21 : vector<16x128xf32>
    %23 = vector.shape_cast %22 : vector<16x128xf32> to vector<2x8x128xf32>
    %c0_13 = arith.constant 0 : index
    %c0_14 = arith.constant 0 : index
    %c0_15 = arith.constant 0 : index
    %c0_16 = arith.constant 0 : index
    %24 = vector.load %arg16[%c0_13, %c0_14, %c0_15, %c0_16] : memref<2x2x8x128xf32, #tpu.memory_space<vmem>>, vector<1x2x8x128xf32>
    %25 = vector.shape_cast %24 : vector<1x2x8x128xf32> to vector<2x8x128xf32>
    %26 = vector.shape_cast %23 : vector<2x8x128xf32> to vector<1x2x8x128xf32>
    tpu.vector_store %arg16[%c0_13, %c0_14, %c0_15, %c0_16], %26 {strides = array<i32>} : memref<2x2x8x128xf32, #tpu.memory_space<vmem>>, vector<1x2x8x128xf32>,
    %c1 = arith.constant 1 : index
    %c0_17 = arith.constant 0 : index
    %c0_18 = arith.constant 0 : index
    %27 = vector.load %arg4[%c1, %c0_17, %c0_18] : memref<2x256x128xf32, #tpu.memory_space<vmem>>, vector<1x256x128xf32>
    %28 = vector.shape_cast %27 : vector<1x256x128xf32> to vector<256x128xf32>
    %cst_19 = arith.constant dense<0.000000e+00> : vector<16x128xf32>
    %29 = tpu.matmul %13, %28, %cst_19 {dimension_numbers = #tpu.dot_dimension_numbers<[1], [0], [0], [1], [0, 0, 1, 1], [], []>} : vector<16x256xf32>, vector<256x128xf32>, vector<16x128xf32> -> vector<16x128xf32>
    %30 = arith.mulf %29, %14 : vector<16x128xf32>
    %c64_i32_20 = arith.constant 64 : i32
    %31 = tpu.dynamic_rotate %29 by %c64_i32_20 dim 1 : vector<16x128xf32>, i32 -> vector<16x128xf32>
    %32 = arith.mulf %31, %15 : vector<16x128xf32>
    %33 = arith.addf %30, %32 : vector<16x128xf32>
    %34 = vector.shape_cast %33 : vector<16x128xf32> to vector<2x8x128xf32>
    %c1_21 = arith.constant 1 : index
    %c0_22 = arith.constant 0 : index
    %c0_23 = arith.constant 0 : index
    %c0_24 = arith.constant 0 : index
    %35 = vector.load %arg16[%c1_21, %c0_22, %c0_23, %c0_24] : memref<2x2x8x128xf32, #tpu.memory_space<vmem>>, vector<1x2x8x128xf32>
    %36 = vector.shape_cast %35 : vector<1x2x8x128xf32> to vector<2x8x128xf32>
    %37 = vector.shape_cast %34 : vector<2x8x128xf32> to vector<1x2x8x128xf32>
    tpu.vector_store %arg16[%c1_21, %c0_22, %c0_23, %c0_24], %37 {strides = array<i32>} : memref<2x2x8x128xf32, #tpu.memory_space<vmem>>, vector<1x2x8x128xf32>,
    %c0_25 = arith.constant 0 : index
    %c0_26 = arith.constant 0 : index
    %c0_27 = arith.constant 0 : index
    %38 = vector.load %arg5[%c0_25, %c0_26, %c0_27] : memref<1x256x128xf32, #tpu.memory_space<vmem>>, vector<1x256x128xf32>
    %39 = vector.shape_cast %38 : vector<1x256x128xf32> to vector<256x128xf32>
    %cst_28 = arith.constant dense<0.000000e+00> : vector<16x128xf32>
    %40 = tpu.matmul %13, %39, %cst_28 {dimension_numbers = #tpu.dot_dimension_numbers<[1], [0], [0], [1], [0, 0, 1, 1], [], []>} : vector<16x256xf32>, vector<256x128xf32>, vector<16x128xf32> -> vector<16x128xf32>
    %41 = arith.mulf %40, %14 : vector<16x128xf32>
    %c64_i32_29 = arith.constant 64 : i32
    %42 = tpu.dynamic_rotate %40 by %c64_i32_29 dim 1 : vector<16x128xf32>, i32 -> vector<16x128xf32>
    %43 = arith.mulf %42, %15 : vector<16x128xf32>
    %44 = arith.addf %41, %43 : vector<16x128xf32>
    %c0_30 = arith.constant 0 : index
    %c0_31 = arith.constant 0 : index
    %c0_32 = arith.constant 0 : index
    %45 = vector.load %arg6[%c0_30, %c0_31, %c0_32] : memref<1x256x128xf32, #tpu.memory_space<vmem>>, vector<1x256x128xf32>
    %46 = vector.shape_cast %45 : vector<1x256x128xf32> to vector<256x128xf32>
    %cst_33 = arith.constant dense<0.000000e+00> : vector<16x128xf32>
    %47 = tpu.matmul %13, %46, %cst_33 {dimension_numbers = #tpu.dot_dimension_numbers<[1], [0], [0], [1], [0, 0, 1, 1], [], []>} : vector<16x256xf32>, vector<256x128xf32>, vector<16x128xf32> -> vector<16x128xf32>
    %48 = vector.shape_cast %44 : vector<16x128xf32> to vector<2x8x128xf32>
    %49 = vector.shape_cast %47 : vector<16x128xf32> to vector<2x8x128xf32>
    %c0_34 = arith.constant 0 : index
    %c0_35 = arith.constant 0 : index
    %c0_36 = arith.constant 0 : index
    %c0_37 = arith.constant 0 : index
    %50 = vector.load %arg17[%c0_34, %c0_35, %c0_36, %c0_37] : memref<2x2x8x128xf32, #tpu.memory_space<vmem>>, vector<1x2x8x128xf32>
    %51 = vector.shape_cast %50 : vector<1x2x8x128xf32> to vector<2x8x128xf32>
    %52 = vector.shape_cast %48 : vector<2x8x128xf32> to vector<1x2x8x128xf32>
    tpu.vector_store %arg17[%c0_34, %c0_35, %c0_36, %c0_37], %52 {strides = array<i32>} : memref<2x2x8x128xf32, #tpu.memory_space<vmem>>, vector<1x2x8x128xf32>,
    %c0_38 = arith.constant 0 : index
    %c0_39 = arith.constant 0 : index
    %c0_40 = arith.constant 0 : index
    %c0_41 = arith.constant 0 : index
    %53 = vector.load %arg18[%c0_38, %c0_39, %c0_40, %c0_41] : memref<2x2x8x128xf32, #tpu.memory_space<vmem>>, vector<1x2x8x128xf32>
    %54 = vector.shape_cast %53 : vector<1x2x8x128xf32> to vector<2x8x128xf32>
    %55 = vector.shape_cast %49 : vector<2x8x128xf32> to vector<1x2x8x128xf32>
    tpu.vector_store %arg18[%c0_38, %c0_39, %c0_40, %c0_41], %55 {strides = array<i32>} : memref<2x2x8x128xf32, #tpu.memory_space<vmem>>, vector<1x2x8x128xf32>,
    %c1_42 = arith.constant 1 : index
    %c0_43 = arith.constant 0 : index
    %c0_44 = arith.constant 0 : index
    %c0_45 = arith.constant 0 : index
    %56 = vector.load %arg17[%c1_42, %c0_43, %c0_44, %c0_45] : memref<2x2x8x128xf32, #tpu.memory_space<vmem>>, vector<1x2x8x128xf32>
    %57 = vector.shape_cast %56 : vector<1x2x8x128xf32> to vector<2x8x128xf32>
    %58 = vector.shape_cast %48 : vector<2x8x128xf32> to vector<1x2x8x128xf32>
    tpu.vector_store %arg17[%c1_42, %c0_43, %c0_44, %c0_45], %58 {strides = array<i32>} : memref<2x2x8x128xf32, #tpu.memory_space<vmem>>, vector<1x2x8x128xf32>,
    %c1_46 = arith.constant 1 : index
    %c0_47 = arith.constant 0 : index
    %c0_48 = arith.constant 0 : index
    %c0_49 = arith.constant 0 : index
    %59 = vector.load %arg18[%c1_46, %c0_47, %c0_48, %c0_49] : memref<2x2x8x128xf32, #tpu.memory_space<vmem>>, vector<1x2x8x128xf32>
    %60 = vector.shape_cast %59 : vector<1x2x8x128xf32> to vector<2x8x128xf32>
    %61 = vector.shape_cast %49 : vector<2x8x128xf32> to vector<1x2x8x128xf32>
    tpu.vector_store %arg18[%c1_46, %c0_47, %c0_48, %c0_49], %61 {strides = array<i32>} : memref<2x2x8x128xf32, #tpu.memory_space<vmem>>, vector<1x2x8x128xf32>,
    %c0_50 = arith.constant 0 : index
    %c0_51 = arith.constant 0 : index
    %c0_52 = arith.constant 0 : index
    %c0_53 = arith.constant 0 : index
    %62 = vector.load %arg16[%c0_50, %c0_51, %c0_52, %c0_53] : memref<2x2x8x128xf32, #tpu.memory_space<vmem>>, vector<2x2x8x128xf32>
    %63 = vector.shape_cast %62 : vector<2x2x8x128xf32> to vector<4x8x128xf32>
    %c0_54 = arith.constant 0 : index
    %c0_55 = arith.constant 0 : index
    %c0_56 = arith.constant 0 : index
    %c0_57 = arith.constant 0 : index
    %64 = vector.load %arg17[%c0_54, %c0_55, %c0_56, %c0_57] : memref<2x2x8x128xf32, #tpu.memory_space<vmem>>, vector<2x2x8x128xf32>
    %65 = vector.shape_cast %64 : vector<2x2x8x128xf32> to vector<4x8x128xf32>
    %c0_58 = arith.constant 0 : index
    %c0_59 = arith.constant 0 : index
    %c0_60 = arith.constant 0 : index
    %c0_61 = arith.constant 0 : index
    %66 = vector.load %arg18[%c0_58, %c0_59, %c0_60, %c0_61] : memref<2x2x8x128xf32, #tpu.memory_space<vmem>>, vector<2x2x8x128xf32>
    %67 = vector.shape_cast %66 : vector<2x2x8x128xf32> to vector<4x8x128xf32>
    "tpu.trace_start"() <{level = 10 : i32, message = "bqd,bkd->bqk"}> : () -> ()
    %cst_62 = arith.constant dense<0.000000e+00> : vector<4x8x8xf32>
    %68 = tpu.matmul %63, %65, %cst_62 {dimension_numbers = #tpu.dot_dimension_numbers<[2], [2], [1], [1], [0, 0, 0, 1, 1, 1], [0], [0]>} : vector<4x8x128xf32>, vector<4x8x128xf32>, vector<4x8x8xf32> -> vector<4x8x8xf32>
    "tpu.trace_stop"() : () -> ()
    %c0_63 = arith.constant 0 : index
    %c0_64 = arith.constant 0 : index
    %c0_65 = arith.constant 0 : index
    %69 = vector.load %arg1[%c0_63, %c0_64, %c0_65] : memref<4x8x8xf32, #tpu.memory_space<vmem>>, vector<4x8x8xf32>
    %70 = arith.addf %68, %69 : vector<4x8x8xf32>
    %cst_66 = arith.constant dense<0xFF800000> : vector<4x8xf32>
    %71 = vector.multi_reduction <maximumf>, %70, %cst_66 [2] : vector<4x8x8xf32> to vector<4x8xf32>
    %72 = vector.shape_cast %71 : vector<4x8xf32> to vector<4x8x1xf32>
    %73 = vector.broadcast %72 : vector<4x8x1xf32> to vector<4x8x8xf32>
    %74 = arith.subf %70, %73 : vector<4x8x8xf32>
    %75 = math.exp %74 : vector<4x8x8xf32>
    %cst_67 = arith.constant dense<0.000000e+00> : vector<4x8xf32>
    %76 = vector.multi_reduction <add>, %75, %cst_67 [2] : vector<4x8x8xf32> to vector<4x8xf32>
    %77 = vector.shape_cast %76 : vector<4x8xf32> to vector<4x8x1xf32>
    %78 = tpu.reciprocal %77 : vector<4x8x1xf32> -> vector<4x8x1xf32>
    %79 = vector.broadcast %78 : vector<4x8x1xf32> to vector<4x8x8xf32>
    %80 = arith.mulf %75, %79 : vector<4x8x8xf32>
    "tpu.trace_start"() <{level = 10 : i32, message = "bqk,bkd->bqd"}> : () -> ()
    %cst_68 = arith.constant dense<0.000000e+00> : vector<4x8x128xf32>
    %81 = tpu.matmul %80, %67, %cst_68 {dimension_numbers = #tpu.dot_dimension_numbers<[2], [1], [1], [2], [0, 0, 0, 1, 1, 2], [0], [0]>} : vector<4x8x8xf32>, vector<4x8x128xf32>, vector<4x8x128xf32> -> vector<4x8x128xf32>
    "tpu.trace_stop"() : () -> ()
    %82 = vector.shape_cast %81 : vector<4x8x128xf32> to vector<2x16x128xf32>
    %83 = vector.extract_strided_slice %82 {offsets = [0, 0, 0], sizes = [1, 16, 128], strides = [1, 1, 1]} : vector<2x16x128xf32> to vector<1x16x128xf32>
    %84 = vector.shape_cast %83 : vector<1x16x128xf32> to vector<16x128xf32>
    %c0_69 = arith.constant 0 : index
    %c0_70 = arith.constant 0 : index
    %c0_71 = arith.constant 0 : index
    %85 = vector.load %arg7[%c0_69, %c0_70, %c0_71] : memref<2x128x256xf32, #tpu.memory_space<vmem>>, vector<1x128x256xf32>
    %86 = vector.shape_cast %85 : vector<1x128x256xf32> to vector<128x256xf32>
    %cst_72 = arith.constant dense<0.000000e+00> : vector<16x256xf32>
    %87 = tpu.matmul %84, %86, %cst_72 {dimension_numbers = #tpu.dot_dimension_numbers<[1], [0], [0], [1], [0, 0, 1, 1], [], []>} : vector<16x128xf32>, vector<128x256xf32>, vector<16x256xf32> -> vector<16x256xf32>
    %88 = vector.extract_strided_slice %82 {offsets = [1, 0, 0], sizes = [1, 16, 128], strides = [1, 1, 1]} : vector<2x16x128xf32> to vector<1x16x128xf32>
    %89 = vector.shape_cast %88 : vector<1x16x128xf32> to vector<16x128xf32>
    %c1_73 = arith.constant 1 : index
    %c0_74 = arith.constant 0 : index
    %c0_75 = arith.constant 0 : index
    %90 = vector.load %arg7[%c1_73, %c0_74, %c0_75] : memref<2x128x256xf32, #tpu.memory_space<vmem>>, vector<1x128x256xf32>
    %91 = vector.shape_cast %90 : vector<1x128x256xf32> to vector<128x256xf32>
    %cst_76 = arith.constant dense<0.000000e+00> : vector<16x256xf32>
    %92 = tpu.matmul %89, %91, %cst_76 {dimension_numbers = #tpu.dot_dimension_numbers<[1], [0], [0], [1], [0, 0, 1, 1], [], []>} : vector<16x128xf32>, vector<128x256xf32>, vector<16x256xf32> -> vector<16x256xf32>
    %93 = arith.addf %87, %92 : vector<16x256xf32>
    %94 = arith.addf %0, %93 : vector<16x256xf32>
    %95 = arith.mulf %94, %94 : vector<16x256xf32>
    %cst_77 = arith.constant dense<0.000000e+00> : vector<16xf32>
    %96 = vector.multi_reduction <add>, %95, %cst_77 [1] : vector<16x256xf32> to vector<16xf32>
    %97 = vector.shape_cast %96 : vector<16xf32> to vector<16x1xf32>
    %cst_78 = arith.constant 2.560000e+02 : f32
    %98 = vector.broadcast %cst_78 : f32 to vector<16x1xf32>
    %99 = arith.divf %97, %98 : vector<16x1xf32>
    %cst_79 = arith.constant 9.99999997E-7 : f32
    %100 = vector.broadcast %cst_79 : f32 to vector<16x1xf32>
    %101 = arith.addf %99, %100 : vector<16x1xf32>
    %102 = math.rsqrt %101 : vector<16x1xf32>
    %103 = vector.broadcast %102 : vector<16x1xf32> to vector<16x256xf32>
    %104 = arith.mulf %94, %103 : vector<16x256xf32>
    %c0_80 = arith.constant 0 : index
    %c0_81 = arith.constant 0 : index
    %105 = vector.load %arg3[%c0_80, %c0_81] : memref<1x256xf32, #tpu.memory_space<vmem>>, vector<1x256xf32>
    %106 = vector.broadcast %105 : vector<1x256xf32> to vector<16x256xf32>
    %107 = arith.mulf %104, %106 : vector<16x256xf32>
    %c0_82 = arith.constant 0 : index
    %c0_83 = arith.constant 0 : index
    %108 = vector.load %arg10[%c0_82, %c0_83] : memref<256x8xf32, #tpu.memory_space<vmem>>, vector<256x8xf32>
    %cst_84 = arith.constant dense<0.000000e+00> : vector<16x8xf32>
    %109 = tpu.matmul %107, %108, %cst_84 {dimension_numbers = #tpu.dot_dimension_numbers<[1], [0], [0], [1], [0, 0, 1, 1], [], []>} : vector<16x256xf32>, vector<256x8xf32>, vector<16x8xf32> -> vector<16x8xf32>
    %cst_85 = arith.constant dense<0xFF800000> : vector<16xf32>
    %110 = vector.multi_reduction <maximumf>, %109, %cst_85 [1] : vector<16x8xf32> to vector<16xf32>
    %111 = vector.shape_cast %110 : vector<16xf32> to vector<16x1xf32>
    %112 = vector.broadcast %111 : vector<16x1xf32> to vector<16x8xf32>
    %113 = arith.subf %109, %112 : vector<16x8xf32>
    %114 = math.exp %113 : vector<16x8xf32>
    %cst_86 = arith.constant dense<0.000000e+00> : vector<16xf32>
    %115 = vector.multi_reduction <add>, %114, %cst_86 [1] : vector<16x8xf32> to vector<16xf32>
    %116 = vector.shape_cast %115 : vector<16xf32> to vector<16x1xf32>
    %117 = tpu.reciprocal %116 : vector<16x1xf32> -> vector<16x1xf32>
    %118 = vector.broadcast %117 : vector<16x1xf32> to vector<16x8xf32>
    %119 = arith.mulf %114, %118 : vector<16x8xf32>
    %120 = tpu.iota {dimensions = array<i32: 1>} : vector<16x8xi32>
    %121 = arith.sitofp %120 : vector<16x8xi32> to vector<16x8xf32>
    %cst_87 = arith.constant dense<0xFF800000> : vector<16xf32>
    %122 = vector.multi_reduction <maximumf>, %119, %cst_87 [1] : vector<16x8xf32> to vector<16xf32>
    %123 = vector.shape_cast %122 : vector<16xf32> to vector<16x1xf32>
    %124 = vector.broadcast %123 : vector<16x1xf32> to vector<16x8xf32>
    %125 = arith.cmpf oeq, %119, %124 : vector<16x8xf32>
    %cst_88 = arith.constant 8.000000e+00 : f32
    %126 = vector.broadcast %cst_88 : f32 to vector<16x8xf32>
    %127 = arith.select %125, %121, %126 : vector<16x8xi1>, vector<16x8xf32>
    %cst_89 = arith.constant dense<0x7F800000> : vector<16xf32>
    %128 = vector.multi_reduction <minimumf>, %127, %cst_89 [1] : vector<16x8xf32> to vector<16xf32>
    %129 = vector.shape_cast %128 : vector<16xf32> to vector<16x1xf32>
    %130 = vector.broadcast %129 : vector<16x1xf32> to vector<16x8xf32>
    %131 = arith.cmpf oeq, %121, %130 : vector<16x8xf32>
    %cst_90 = arith.constant 0xFF800000 : f32
    %132 = vector.broadcast %cst_90 : f32 to vector<16x8xf32>
    %133 = arith.select %131, %132, %119 : vector<16x8xi1>, vector<16x8xf32>
    %cst_91 = arith.constant dense<0xFF800000> : vector<16xf32>
    %134 = vector.multi_reduction <maximumf>, %133, %cst_91 [1] : vector<16x8xf32> to vector<16xf32>
    %135 = vector.shape_cast %134 : vector<16xf32> to vector<16x1xf32>
    %136 = vector.broadcast %135 : vector<16x1xf32> to vector<16x8xf32>
    %137 = arith.cmpf oeq, %133, %136 : vector<16x8xf32>
    %cst_92 = arith.constant 8.000000e+00 : f32
    %138 = vector.broadcast %cst_92 : f32 to vector<16x8xf32>
    %139 = arith.select %137, %121, %138 : vector<16x8xi1>, vector<16x8xf32>
    %cst_93 = arith.constant dense<0x7F800000> : vector<16xf32>
    %140 = vector.multi_reduction <minimumf>, %139, %cst_93 [1] : vector<16x8xf32> to vector<16xf32>
    %141 = vector.shape_cast %140 : vector<16xf32> to vector<16x1xf32>
    %142 = vector.broadcast %141 : vector<16x1xf32> to vector<16x8xf32>
    %143 = arith.cmpf oeq, %121, %142 : vector<16x8xf32>
    %144 = arith.addf %123, %135 : vector<16x1xf32>
    %145 = tpu.reciprocal %144 : vector<16x1xf32> -> vector<16x1xf32>
    %146 = arith.extui %131 : vector<16x8xi1> to vector<16x8xi32>
    %147 = arith.sitofp %146 : vector<16x8xi32> to vector<16x8xf32>
    %148 = arith.mulf %123, %145 : vector<16x1xf32>
    %149 = vector.broadcast %148 : vector<16x1xf32> to vector<16x8xf32>
    %150 = arith.mulf %147, %149 : vector<16x8xf32>
    %151 = arith.extui %143 : vector<16x8xi1> to vector<16x8xi32>
    %152 = arith.sitofp %151 : vector<16x8xi32> to vector<16x8xf32>
    %153 = arith.mulf %135, %145 : vector<16x1xf32>
    %154 = vector.broadcast %153 : vector<16x1xf32> to vector<16x8xf32>
    %155 = arith.mulf %152, %154 : vector<16x8xf32>
    %156 = arith.addf %150, %155 : vector<16x8xf32>
    %cst_94 = arith.constant 0.000000e+00 : f32
    %157 = vector.broadcast %cst_94 : f32 to vector<16x256xf32>
    %c0_95 = arith.constant 0 : index
    %c0_96 = arith.constant 0 : index
    %c0_97 = arith.constant 0 : index
    %158 = vector.load %arg11[%c0_95, %c0_96, %c0_97] : memref<8x256x128xf32, #tpu.memory_space<vmem>>, vector<1x256x128xf32>
    %159 = vector.shape_cast %158 : vector<1x256x128xf32> to vector<256x128xf32>
    %cst_98 = arith.constant dense<0.000000e+00> : vector<16x128xf32>
    %160 = tpu.matmul %107, %159, %cst_98 {dimension_numbers = #tpu.dot_dimension_numbers<[1], [0], [0], [1], [0, 0, 1, 1], [], []>} : vector<16x256xf32>, vector<256x128xf32>, vector<16x128xf32> -> vector<16x128xf32>
    %c0_99 = arith.constant 0 : index
    %c0_100 = arith.constant 0 : index
    %c0_101 = arith.constant 0 : index
    %161 = vector.load %arg12[%c0_99, %c0_100, %c0_101] : memref<8x256x128xf32, #tpu.memory_space<vmem>>, vector<1x256x128xf32>
    %162 = vector.shape_cast %161 : vector<1x256x128xf32> to vector<256x128xf32>
    %cst_102 = arith.constant dense<0.000000e+00> : vector<16x128xf32>
    %163 = tpu.matmul %107, %162, %cst_102 {dimension_numbers = #tpu.dot_dimension_numbers<[1], [0], [0], [1], [0, 0, 1, 1], [], []>} : vector<16x256xf32>, vector<256x128xf32>, vector<16x128xf32> -> vector<16x128xf32>
    %cst_103 = arith.constant 0.000000e+00 : f32
    %164 = vector.broadcast %cst_103 : f32 to vector<16x128xf32>
    %165 = arith.subf %164, %160 : vector<16x128xf32>
    %166 = math.exp %165 : vector<16x128xf32>
    %cst_104 = arith.constant 1.000000e+00 : f32
    %167 = vector.broadcast %cst_104 : f32 to vector<16x128xf32>
    %168 = arith.addf %167, %166 : vector<16x128xf32>
    %169 = tpu.reciprocal %168 : vector<16x128xf32> -> vector<16x128xf32>
    %170 = arith.mulf %160, %169 : vector<16x128xf32>
    %171 = arith.mulf %170, %163 : vector<16x128xf32>
    %c0_105 = arith.constant 0 : index
    %c0_106 = arith.constant 0 : index
    %c0_107 = arith.constant 0 : index
    %172 = vector.load %arg13[%c0_105, %c0_106, %c0_107] : memref<8x128x256xf32, #tpu.memory_space<vmem>>, vector<1x128x256xf32>
    %173 = vector.shape_cast %172 : vector<1x128x256xf32> to vector<128x256xf32>
    %cst_108 = arith.constant dense<0.000000e+00> : vector<16x256xf32>
    %174 = tpu.matmul %171, %173, %cst_108 {dimension_numbers = #tpu.dot_dimension_numbers<[1], [0], [0], [1], [0, 0, 1, 1], [], []>} : vector<16x128xf32>, vector<128x256xf32>, vector<16x256xf32> -> vector<16x256xf32>
    %175 = vector.extract_strided_slice %156 {offsets = [0, 0], sizes = [16, 1], strides = [1, 1]} : vector<16x8xf32> to vector<16x1xf32>
    %176 = vector.broadcast %175 : vector<16x1xf32> to vector<16x256xf32>
    %177 = arith.mulf %176, %174 : vector<16x256xf32>
    %178 = arith.addf %157, %177 : vector<16x256xf32>
    %c1_109 = arith.constant 1 : index
    %c0_110 = arith.constant 0 : index
    %c0_111 = arith.constant 0 : index
    %179 = vector.load %arg11[%c1_109, %c0_110, %c0_111] : memref<8x256x128xf32, #tpu.memory_space<vmem>>, vector<1x256x128xf32>
    %180 = vector.shape_cast %179 : vector<1x256x128xf32> to vector<256x128xf32>
    %cst_112 = arith.constant dense<0.000000e+00> : vector<16x128xf32>
    %181 = tpu.matmul %107, %180, %cst_112 {dimension_numbers = #tpu.dot_dimension_numbers<[1], [0], [0], [1], [0, 0, 1, 1], [], []>} : vector<16x256xf32>, vector<256x128xf32>, vector<16x128xf32> -> vector<16x128xf32>
    %c1_113 = arith.constant 1 : index
    %c0_114 = arith.constant 0 : index
    %c0_115 = arith.constant 0 : index
    %182 = vector.load %arg12[%c1_113, %c0_114, %c0_115] : memref<8x256x128xf32, #tpu.memory_space<vmem>>, vector<1x256x128xf32>
    %183 = vector.shape_cast %182 : vector<1x256x128xf32> to vector<256x128xf32>
    %cst_116 = arith.constant dense<0.000000e+00> : vector<16x128xf32>
    %184 = tpu.matmul %107, %183, %cst_116 {dimension_numbers = #tpu.dot_dimension_numbers<[1], [0], [0], [1], [0, 0, 1, 1], [], []>} : vector<16x256xf32>, vector<256x128xf32>, vector<16x128xf32> -> vector<16x128xf32>
    %cst_117 = arith.constant 0.000000e+00 : f32
    %185 = vector.broadcast %cst_117 : f32 to vector<16x128xf32>
    %186 = arith.subf %185, %181 : vector<16x128xf32>
    %187 = math.exp %186 : vector<16x128xf32>
    %cst_118 = arith.constant 1.000000e+00 : f32
    %188 = vector.broadcast %cst_118 : f32 to vector<16x128xf32>
    %189 = arith.addf %188, %187 : vector<16x128xf32>
    %190 = tpu.reciprocal %189 : vector<16x128xf32> -> vector<16x128xf32>
    %191 = arith.mulf %181, %190 : vector<16x128xf32>
    %192 = arith.mulf %191, %184 : vector<16x128xf32>
    %c1_119 = arith.constant 1 : index
    %c0_120 = arith.constant 0 : index
    %c0_121 = arith.constant 0 : index
    %193 = vector.load %arg13[%c1_119, %c0_120, %c0_121] : memref<8x128x256xf32, #tpu.memory_space<vmem>>, vector<1x128x256xf32>
    %194 = vector.shape_cast %193 : vector<1x128x256xf32> to vector<128x256xf32>
    %cst_122 = arith.constant dense<0.000000e+00> : vector<16x256xf32>
    %195 = tpu.matmul %192, %194, %cst_122 {dimension_numbers = #tpu.dot_dimension_numbers<[1], [0], [0], [1], [0, 0, 1, 1], [], []>} : vector<16x128xf32>, vector<128x256xf32>, vector<16x256xf32> -> vector<16x256xf32>
    %196 = vector.extract_strided_slice %156 {offsets = [0, 1], sizes = [16, 1], strides = [1, 1]} : vector<16x8xf32> to vector<16x1xf32>
    %197 = vector.broadcast %196 : vector<16x1xf32> to vector<16x256xf32>
    %198 = arith.mulf %197, %195 : vector<16x256xf32>
    %199 = arith.addf %178, %198 : vector<16x256xf32>
    %c2 = arith.constant 2 : index
    %c0_123 = arith.constant 0 : index
    %c0_124 = arith.constant 0 : index
    %200 = vector.load %arg11[%c2, %c0_123, %c0_124] : memref<8x256x128xf32, #tpu.memory_space<vmem>>, vector<1x256x128xf32>
    %201 = vector.shape_cast %200 : vector<1x256x128xf32> to vector<256x128xf32>
    %cst_125 = arith.constant dense<0.000000e+00> : vector<16x128xf32>
    %202 = tpu.matmul %107, %201, %cst_125 {dimension_numbers = #tpu.dot_dimension_numbers<[1], [0], [0], [1], [0, 0, 1, 1], [], []>} : vector<16x256xf32>, vector<256x128xf32>, vector<16x128xf32> -> vector<16x128xf32>
    %c2_126 = arith.constant 2 : index
    %c0_127 = arith.constant 0 : index
    %c0_128 = arith.constant 0 : index
    %203 = vector.load %arg12[%c2_126, %c0_127, %c0_128] : memref<8x256x128xf32, #tpu.memory_space<vmem>>, vector<1x256x128xf32>
    %204 = vector.shape_cast %203 : vector<1x256x128xf32> to vector<256x128xf32>
    %cst_129 = arith.constant dense<0.000000e+00> : vector<16x128xf32>
    %205 = tpu.matmul %107, %204, %cst_129 {dimension_numbers = #tpu.dot_dimension_numbers<[1], [0], [0], [1], [0, 0, 1, 1], [], []>} : vector<16x256xf32>, vector<256x128xf32>, vector<16x128xf32> -> vector<16x128xf32>
    %cst_130 = arith.constant 0.000000e+00 : f32
    %206 = vector.broadcast %cst_130 : f32 to vector<16x128xf32>
    %207 = arith.subf %206, %202 : vector<16x128xf32>
    %208 = math.exp %207 : vector<16x128xf32>
    %cst_131 = arith.constant 1.000000e+00 : f32
    %209 = vector.broadcast %cst_131 : f32 to vector<16x128xf32>
    %210 = arith.addf %209, %208 : vector<16x128xf32>
    %211 = tpu.reciprocal %210 : vector<16x128xf32> -> vector<16x128xf32>
    %212 = arith.mulf %202, %211 : vector<16x128xf32>
    %213 = arith.mulf %212, %205 : vector<16x128xf32>
    %c2_132 = arith.constant 2 : index
    %c0_133 = arith.constant 0 : index
    %c0_134 = arith.constant 0 : index
    %214 = vector.load %arg13[%c2_132, %c0_133, %c0_134] : memref<8x128x256xf32, #tpu.memory_space<vmem>>, vector<1x128x256xf32>
    %215 = vector.shape_cast %214 : vector<1x128x256xf32> to vector<128x256xf32>
    %cst_135 = arith.constant dense<0.000000e+00> : vector<16x256xf32>
    %216 = tpu.matmul %213, %215, %cst_135 {dimension_numbers = #tpu.dot_dimension_numbers<[1], [0], [0], [1], [0, 0, 1, 1], [], []>} : vector<16x128xf32>, vector<128x256xf32>, vector<16x256xf32> -> vector<16x256xf32>
    %217 = vector.extract_strided_slice %156 {offsets = [0, 2], sizes = [16, 1], strides = [1, 1]} : vector<16x8xf32> to vector<16x1xf32>
    %218 = vector.broadcast %217 : vector<16x1xf32> to vector<16x256xf32>
    %219 = arith.mulf %218, %216 : vector<16x256xf32>
    %220 = arith.addf %199, %219 : vector<16x256xf32>
    %c3 = arith.constant 3 : index
    %c0_136 = arith.constant 0 : index
    %c0_137 = arith.constant 0 : index
    %221 = vector.load %arg11[%c3, %c0_136, %c0_137] : memref<8x256x128xf32, #tpu.memory_space<vmem>>, vector<1x256x128xf32>
    %222 = vector.shape_cast %221 : vector<1x256x128xf32> to vector<256x128xf32>
    %cst_138 = arith.constant dense<0.000000e+00> : vector<16x128xf32>
    %223 = tpu.matmul %107, %222, %cst_138 {dimension_numbers = #tpu.dot_dimension_numbers<[1], [0], [0], [1], [0, 0, 1, 1], [], []>} : vector<16x256xf32>, vector<256x128xf32>, vector<16x128xf32> -> vector<16x128xf32>
    %c3_139 = arith.constant 3 : index
    %c0_140 = arith.constant 0 : index
    %c0_141 = arith.constant 0 : index
    %224 = vector.load %arg12[%c3_139, %c0_140, %c0_141] : memref<8x256x128xf32, #tpu.memory_space<vmem>>, vector<1x256x128xf32>
    %225 = vector.shape_cast %224 : vector<1x256x128xf32> to vector<256x128xf32>
    %cst_142 = arith.constant dense<0.000000e+00> : vector<16x128xf32>
    %226 = tpu.matmul %107, %225, %cst_142 {dimension_numbers = #tpu.dot_dimension_numbers<[1], [0], [0], [1], [0, 0, 1, 1], [], []>} : vector<16x256xf32>, vector<256x128xf32>, vector<16x128xf32> -> vector<16x128xf32>
    %cst_143 = arith.constant 0.000000e+00 : f32
    %227 = vector.broadcast %cst_143 : f32 to vector<16x128xf32>
    %228 = arith.subf %227, %223 : vector<16x128xf32>
    %229 = math.exp %228 : vector<16x128xf32>
    %cst_144 = arith.constant 1.000000e+00 : f32
    %230 = vector.broadcast %cst_144 : f32 to vector<16x128xf32>
    %231 = arith.addf %230, %229 : vector<16x128xf32>
    %232 = tpu.reciprocal %231 : vector<16x128xf32> -> vector<16x128xf32>
    %233 = arith.mulf %223, %232 : vector<16x128xf32>
    %234 = arith.mulf %233, %226 : vector<16x128xf32>
    %c3_145 = arith.constant 3 : index
    %c0_146 = arith.constant 0 : index
    %c0_147 = arith.constant 0 : index
    %235 = vector.load %arg13[%c3_145, %c0_146, %c0_147] : memref<8x128x256xf32, #tpu.memory_space<vmem>>, vector<1x128x256xf32>
    %236 = vector.shape_cast %235 : vector<1x128x256xf32> to vector<128x256xf32>
    %cst_148 = arith.constant dense<0.000000e+00> : vector<16x256xf32>
    %237 = tpu.matmul %234, %236, %cst_148 {dimension_numbers = #tpu.dot_dimension_numbers<[1], [0], [0], [1], [0, 0, 1, 1], [], []>} : vector<16x128xf32>, vector<128x256xf32>, vector<16x256xf32> -> vector<16x256xf32>
    %238 = vector.extract_strided_slice %156 {offsets = [0, 3], sizes = [16, 1], strides = [1, 1]} : vector<16x8xf32> to vector<16x1xf32>
    %239 = vector.broadcast %238 : vector<16x1xf32> to vector<16x256xf32>
    %240 = arith.mulf %239, %237 : vector<16x256xf32>
    %241 = arith.addf %220, %240 : vector<16x256xf32>
    %c4 = arith.constant 4 : index
    %c0_149 = arith.constant 0 : index
    %c0_150 = arith.constant 0 : index
    %242 = vector.load %arg11[%c4, %c0_149, %c0_150] : memref<8x256x128xf32, #tpu.memory_space<vmem>>, vector<1x256x128xf32>
    %243 = vector.shape_cast %242 : vector<1x256x128xf32> to vector<256x128xf32>
    %cst_151 = arith.constant dense<0.000000e+00> : vector<16x128xf32>
    %244 = tpu.matmul %107, %243, %cst_151 {dimension_numbers = #tpu.dot_dimension_numbers<[1], [0], [0], [1], [0, 0, 1, 1], [], []>} : vector<16x256xf32>, vector<256x128xf32>, vector<16x128xf32> -> vector<16x128xf32>
    %c4_152 = arith.constant 4 : index
    %c0_153 = arith.constant 0 : index
    %c0_154 = arith.constant 0 : index
    %245 = vector.load %arg12[%c4_152, %c0_153, %c0_154] : memref<8x256x128xf32, #tpu.memory_space<vmem>>, vector<1x256x128xf32>
    %246 = vector.shape_cast %245 : vector<1x256x128xf32> to vector<256x128xf32>
    %cst_155 = arith.constant dense<0.000000e+00> : vector<16x128xf32>
    %247 = tpu.matmul %107, %246, %cst_155 {dimension_numbers = #tpu.dot_dimension_numbers<[1], [0], [0], [1], [0, 0, 1, 1], [], []>} : vector<16x256xf32>, vector<256x128xf32>, vector<16x128xf32> -> vector<16x128xf32>
    %cst_156 = arith.constant 0.000000e+00 : f32
    %248 = vector.broadcast %cst_156 : f32 to vector<16x128xf32>
    %249 = arith.subf %248, %244 : vector<16x128xf32>
    %250 = math.exp %249 : vector<16x128xf32>
    %cst_157 = arith.constant 1.000000e+00 : f32
    %251 = vector.broadcast %cst_157 : f32 to vector<16x128xf32>
    %252 = arith.addf %251, %250 : vector<16x128xf32>
    %253 = tpu.reciprocal %252 : vector<16x128xf32> -> vector<16x128xf32>
    %254 = arith.mulf %244, %253 : vector<16x128xf32>
    %255 = arith.mulf %254, %247 : vector<16x128xf32>
    %c4_158 = arith.constant 4 : index
    %c0_159 = arith.constant 0 : index
    %c0_160 = arith.constant 0 : index
    %256 = vector.load %arg13[%c4_158, %c0_159, %c0_160] : memref<8x128x256xf32, #tpu.memory_space<vmem>>, vector<1x128x256xf32>
    %257 = vector.shape_cast %256 : vector<1x128x256xf32> to vector<128x256xf32>
    %cst_161 = arith.constant dense<0.000000e+00> : vector<16x256xf32>
    %258 = tpu.matmul %255, %257, %cst_161 {dimension_numbers = #tpu.dot_dimension_numbers<[1], [0], [0], [1], [0, 0, 1, 1], [], []>} : vector<16x128xf32>, vector<128x256xf32>, vector<16x256xf32> -> vector<16x256xf32>
    %259 = vector.extract_strided_slice %156 {offsets = [0, 4], sizes = [16, 1], strides = [1, 1]} : vector<16x8xf32> to vector<16x1xf32>
    %260 = vector.broadcast %259 : vector<16x1xf32> to vector<16x256xf32>
    %261 = arith.mulf %260, %258 : vector<16x256xf32>
    %262 = arith.addf %241, %261 : vector<16x256xf32>
    %c5 = arith.constant 5 : index
    %c0_162 = arith.constant 0 : index
    %c0_163 = arith.constant 0 : index
    %263 = vector.load %arg11[%c5, %c0_162, %c0_163] : memref<8x256x128xf32, #tpu.memory_space<vmem>>, vector<1x256x128xf32>
    %264 = vector.shape_cast %263 : vector<1x256x128xf32> to vector<256x128xf32>
    %cst_164 = arith.constant dense<0.000000e+00> : vector<16x128xf32>
    %265 = tpu.matmul %107, %264, %cst_164 {dimension_numbers = #tpu.dot_dimension_numbers<[1], [0], [0], [1], [0, 0, 1, 1], [], []>} : vector<16x256xf32>, vector<256x128xf32>, vector<16x128xf32> -> vector<16x128xf32>
    %c5_165 = arith.constant 5 : index
    %c0_166 = arith.constant 0 : index
    %c0_167 = arith.constant 0 : index
    %266 = vector.load %arg12[%c5_165, %c0_166, %c0_167] : memref<8x256x128xf32, #tpu.memory_space<vmem>>, vector<1x256x128xf32>
    %267 = vector.shape_cast %266 : vector<1x256x128xf32> to vector<256x128xf32>
    %cst_168 = arith.constant dense<0.000000e+00> : vector<16x128xf32>
    %268 = tpu.matmul %107, %267, %cst_168 {dimension_numbers = #tpu.dot_dimension_numbers<[1], [0], [0], [1], [0, 0, 1, 1], [], []>} : vector<16x256xf32>, vector<256x128xf32>, vector<16x128xf32> -> vector<16x128xf32>
    %cst_169 = arith.constant 0.000000e+00 : f32
    %269 = vector.broadcast %cst_169 : f32 to vector<16x128xf32>
    %270 = arith.subf %269, %265 : vector<16x128xf32>
    %271 = math.exp %270 : vector<16x128xf32>
    %cst_170 = arith.constant 1.000000e+00 : f32
    %272 = vector.broadcast %cst_170 : f32 to vector<16x128xf32>
    %273 = arith.addf %272, %271 : vector<16x128xf32>
    %274 = tpu.reciprocal %273 : vector<16x128xf32> -> vector<16x128xf32>
    %275 = arith.mulf %265, %274 : vector<16x128xf32>
    %276 = arith.mulf %275, %268 : vector<16x128xf32>
    %c5_171 = arith.constant 5 : index
    %c0_172 = arith.constant 0 : index
    %c0_173 = arith.constant 0 : index
    %277 = vector.load %arg13[%c5_171, %c0_172, %c0_173] : memref<8x128x256xf32, #tpu.memory_space<vmem>>, vector<1x128x256xf32>
    %278 = vector.shape_cast %277 : vector<1x128x256xf32> to vector<128x256xf32>
    %cst_174 = arith.constant dense<0.000000e+00> : vector<16x256xf32>
    %279 = tpu.matmul %276, %278, %cst_174 {dimension_numbers = #tpu.dot_dimension_numbers<[1], [0], [0], [1], [0, 0, 1, 1], [], []>} : vector<16x128xf32>, vector<128x256xf32>, vector<16x256xf32> -> vector<16x256xf32>
    %280 = vector.extract_strided_slice %156 {offsets = [0, 5], sizes = [16, 1], strides = [1, 1]} : vector<16x8xf32> to vector<16x1xf32>
    %281 = vector.broadcast %280 : vector<16x1xf32> to vector<16x256xf32>
    %282 = arith.mulf %281, %279 : vector<16x256xf32>
    %283 = arith.addf %262, %282 : vector<16x256xf32>
    %c6 = arith.constant 6 : index
    %c0_175 = arith.constant 0 : index
    %c0_176 = arith.constant 0 : index
    %284 = vector.load %arg11[%c6, %c0_175, %c0_176] : memref<8x256x128xf32, #tpu.memory_space<vmem>>, vector<1x256x128xf32>
    %285 = vector.shape_cast %284 : vector<1x256x128xf32> to vector<256x128xf32>
    %cst_177 = arith.constant dense<0.000000e+00> : vector<16x128xf32>
    %286 = tpu.matmul %107, %285, %cst_177 {dimension_numbers = #tpu.dot_dimension_numbers<[1], [0], [0], [1], [0, 0, 1, 1], [], []>} : vector<16x256xf32>, vector<256x128xf32>, vector<16x128xf32> -> vector<16x128xf32>
    %c6_178 = arith.constant 6 : index
    %c0_179 = arith.constant 0 : index
    %c0_180 = arith.constant 0 : index
    %287 = vector.load %arg12[%c6_178, %c0_179, %c0_180] : memref<8x256x128xf32, #tpu.memory_space<vmem>>, vector<1x256x128xf32>
    %288 = vector.shape_cast %287 : vector<1x256x128xf32> to vector<256x128xf32>
    %cst_181 = arith.constant dense<0.000000e+00> : vector<16x128xf32>
    %289 = tpu.matmul %107, %288, %cst_181 {dimension_numbers = #tpu.dot_dimension_numbers<[1], [0], [0], [1], [0, 0, 1, 1], [], []>} : vector<16x256xf32>, vector<256x128xf32>, vector<16x128xf32> -> vector<16x128xf32>
    %cst_182 = arith.constant 0.000000e+00 : f32
    %290 = vector.broadcast %cst_182 : f32 to vector<16x128xf32>
    %291 = arith.subf %290, %286 : vector<16x128xf32>
    %292 = math.exp %291 : vector<16x128xf32>
    %cst_183 = arith.constant 1.000000e+00 : f32
    %293 = vector.broadcast %cst_183 : f32 to vector<16x128xf32>
    %294 = arith.addf %293, %292 : vector<16x128xf32>
    %295 = tpu.reciprocal %294 : vector<16x128xf32> -> vector<16x128xf32>
    %296 = arith.mulf %286, %295 : vector<16x128xf32>
    %297 = arith.mulf %296, %289 : vector<16x128xf32>
    %c6_184 = arith.constant 6 : index
    %c0_185 = arith.constant 0 : index
    %c0_186 = arith.constant 0 : index
    %298 = vector.load %arg13[%c6_184, %c0_185, %c0_186] : memref<8x128x256xf32, #tpu.memory_space<vmem>>, vector<1x128x256xf32>
    %299 = vector.shape_cast %298 : vector<1x128x256xf32> to vector<128x256xf32>
    %cst_187 = arith.constant dense<0.000000e+00> : vector<16x256xf32>
    %300 = tpu.matmul %297, %299, %cst_187 {dimension_numbers = #tpu.dot_dimension_numbers<[1], [0], [0], [1], [0, 0, 1, 1], [], []>} : vector<16x128xf32>, vector<128x256xf32>, vector<16x256xf32> -> vector<16x256xf32>
    %301 = vector.extract_strided_slice %156 {offsets = [0, 6], sizes = [16, 1], strides = [1, 1]} : vector<16x8xf32> to vector<16x1xf32>
    %302 = vector.broadcast %301 : vector<16x1xf32> to vector<16x256xf32>
    %303 = arith.mulf %302, %300 : vector<16x256xf32>
    %304 = arith.addf %283, %303 : vector<16x256xf32>
    %c7 = arith.constant 7 : index
    %c0_188 = arith.constant 0 : index
    %c0_189 = arith.constant 0 : index
    %305 = vector.load %arg11[%c7, %c0_188, %c0_189] : memref<8x256x128xf32, #tpu.memory_space<vmem>>, vector<1x256x128xf32>
    %306 = vector.shape_cast %305 : vector<1x256x128xf32> to vector<256x128xf32>
    %cst_190 = arith.constant dense<0.000000e+00> : vector<16x128xf32>
    %307 = tpu.matmul %107, %306, %cst_190 {dimension_numbers = #tpu.dot_dimension_numbers<[1], [0], [0], [1], [0, 0, 1, 1], [], []>} : vector<16x256xf32>, vector<256x128xf32>, vector<16x128xf32> -> vector<16x128xf32>
    %c7_191 = arith.constant 7 : index
    %c0_192 = arith.constant 0 : index
    %c0_193 = arith.constant 0 : index
    %308 = vector.load %arg12[%c7_191, %c0_192, %c0_193] : memref<8x256x128xf32, #tpu.memory_space<vmem>>, vector<1x256x128xf32>
    %309 = vector.shape_cast %308 : vector<1x256x128xf32> to vector<256x128xf32>
    %cst_194 = arith.constant dense<0.000000e+00> : vector<16x128xf32>
    %310 = tpu.matmul %107, %309, %cst_194 {dimension_numbers = #tpu.dot_dimension_numbers<[1], [0], [0], [1], [0, 0, 1, 1], [], []>} : vector<16x256xf32>, vector<256x128xf32>, vector<16x128xf32> -> vector<16x128xf32>
    %cst_195 = arith.constant 0.000000e+00 : f32
    %311 = vector.broadcast %cst_195 : f32 to vector<16x128xf32>
    %312 = arith.subf %311, %307 : vector<16x128xf32>
    %313 = math.exp %312 : vector<16x128xf32>
    %cst_196 = arith.constant 1.000000e+00 : f32
    %314 = vector.broadcast %cst_196 : f32 to vector<16x128xf32>
    %315 = arith.addf %314, %313 : vector<16x128xf32>
    %316 = tpu.reciprocal %315 : vector<16x128xf32> -> vector<16x128xf32>
    %317 = arith.mulf %307, %316 : vector<16x128xf32>
    %318 = arith.mulf %317, %310 : vector<16x128xf32>
    %c7_197 = arith.constant 7 : index
    %c0_198 = arith.constant 0 : index
    %c0_199 = arith.constant 0 : index
    %319 = vector.load %arg13[%c7_197, %c0_198, %c0_199] : memref<8x128x256xf32, #tpu.memory_space<vmem>>, vector<1x128x256xf32>
    %320 = vector.shape_cast %319 : vector<1x128x256xf32> to vector<128x256xf32>
    %cst_200 = arith.constant dense<0.000000e+00> : vector<16x256xf32>
    %321 = tpu.matmul %318, %320, %cst_200 {dimension_numbers = #tpu.dot_dimension_numbers<[1], [0], [0], [1], [0, 0, 1, 1], [], []>} : vector<16x128xf32>, vector<128x256xf32>, vector<16x256xf32> -> vector<16x256xf32>
    %322 = vector.extract_strided_slice %156 {offsets = [0, 7], sizes = [16, 1], strides = [1, 1]} : vector<16x8xf32> to vector<16x1xf32>
    %323 = vector.broadcast %322 : vector<16x1xf32> to vector<16x256xf32>
    %324 = arith.mulf %323, %321 : vector<16x256xf32>
    %325 = arith.addf %304, %324 : vector<16x256xf32>
    %c0_201 = arith.constant 0 : index
    %c0_202 = arith.constant 0 : index
    %326 = vector.load %arg14[%c0_201, %c0_202] : memref<16x256xf32, #tpu.memory_space<vmem>>, vector<16x256xf32>
    tpu.vector_store %arg14[%c0_201, %c0_202], %94 {strides = array<i32>} : memref<16x256xf32, #tpu.memory_space<vmem>>, vector<16x256xf32>,
    %c0_203 = arith.constant 0 : index
    %c0_204 = arith.constant 0 : index
    %327 = vector.load %arg15[%c0_203, %c0_204] : memref<16x256xf32, #tpu.memory_space<vmem>>, vector<16x256xf32>
    tpu.vector_store %arg15[%c0_203, %c0_204], %325 {strides = array<i32>} : memref<16x256xf32, #tpu.memory_space<vmem>>, vector<16x256xf32>,
    return
  }
}

</mosaic_0001>

<bundles_post_ra>
// kernel: tpu_custom_call.1
= control target key start
LH: loop header
LB: loop body
LE: loop exit
PB: predicated region body
PF: predicated region fallthrough
CT: control target
= control target key end

     0   :  { %21 = vsyncpa [#allocation6], 0  ;;  %s7925_s0 = inlined_call_operand.vmem [shape: f32[16,256], index: 0, kind: input, shape index: {}]   ;;  %s7926_s1 = inlined_call_operand.hbm [shape: f32[4,8,8], index: 1, kind: input, shape index: {}]   ;;  %s7927_s2 = inlined_call_operand.vmem [shape: f32[1,256], index: 2, kind: input, shape index: {}]   ;;  %s7928_s3 = inlined_call_operand.hbm [shape: f32[1,256], index: 3, kind: input, shape index: {}]   ;;  %s7929_s4 = inlined_call_operand.hbm [shape: f32[2,256,128], index: 4, kind: input, shape index: {}]   ;;  %s7930_s5 = inlined_call_operand.vmem [shape: f32[1,256,128], index: 5, kind: input, shape index: {}]   ;;  %s7931_s6 = inlined_call_operand.hbm [shape: f32[1,256,128], index: 6, kind: input, shape index: {}]   ;;  %s7932_s7 = inlined_call_operand.hbm [shape: f32[2,128,256], index: 7, kind: input, shape index: {}]   ;;  %s7933_s8 = inlined_call_operand.hbm [shape: f32[16,128], index: 8, kind: input, shape index: {}]   ;;  %s7934_s9 = inlined_call_operand.vmem [shape: f32[16,128], index: 9, kind: input, shape index: {}]   ;;  %s7935_s10 = inlined_call_operand.vmem [shape: f32[256,8], index: 10, kind: input, shape index: {}]   ;;  %s7936_s11 = inlined_call_operand.hbm [shape: f32[8,256,128], index: 11, kind: input, shape index: {}]   ;;  %s7937_s12 = inlined_call_operand.hbm [shape: f32[8,256,128], index: 12, kind: input, shape index: {}]   ;;  %s7938_s13 = inlined_call_operand.hbm [shape: f32[8,128,256], index: 13, kind: input, shape index: {}]   ;;  %s7939_s14 = inlined_call_operand.hbm [shape: f32[16,256], index: 14, kind: output, shape index: {0}]   ;;  %s7940_s15 = inlined_call_operand.hbm [shape: f32[16,256], index: 15, kind: output, shape index: {1}]  }
   0x1   :  { %22 = vsyncpa [#allocation9], 0 }
   0x2   :  { %23 = vsyncpa [#allocation12], 0 }
   0x3   :  { %24 = vsyncpa [#allocation15], 0 }
   0x4   :  { %25 = vsyncpa [#allocation18], 0 }
   0x5   :  { %26 = vsyncpa [#allocation7], 0 }
   0x6   :  { %27 = vsyncpa [#allocation22], 0  ;;  %s6926_s18 = smov [#allocation8]   ;;  %s6670_s22 = scalar_lea.hbm %s7928_s3, 32 }
   0x7   :  { %s50_s19 = sshll.u32 %s6926_s18, 4  ;;  %p6671_p0 = scmp.ne.s32.totalorder %s7928_s3, %s6670_s22  ;;  %s51_s19 = int_to_ptr.vmem [resolvable:$true] %s50_s19 }
   0x8   :  { %p6674_p1 = scmp.lt.u32.totalorder %s6670_s22, %s7928_s3 }
   0xa   :  { %p6676_p2 = pnand %p6674_p1, %p6671_p0 }
   0xc   :  { %6679 = shalt.err (!%p6676_p2)
}
   0xd   :  { %s6680_s27 = scalar_lea.vmem %s51_s19, 32  ;;  %p6685_p4 = scmp.lt.s32.totalorder %s51_s19, %s51_s19 }
   0xe   :  { %p6681_p3 = scmp.ne.s32.totalorder %s51_s19, %s6680_s27  ;;  %p6686_p5 = scmp.lt.s32.totalorder %s6680_s27, %s6680_s27 }
  0x10   :  { %p6687_p6 = por %p6686_p5, %p6685_p4 }
  0x12   :  { %p6688_p7 = pnand %p6687_p6, %p6681_p3 }
  0x14   :  { %6691 = shalt.err (!%p6688_p7)
}
  0x15   :  { %53 = dma.hbm_to_vmem [thread:$0]  %s7928_s3, 32, %s51_s19, [#allocation9]  }
  0x16   :  { %s6927_s30 = smov [#allocation11]   ;;  %s6928_s17 = smov [#allocation14]  }
  0x17   :  { %s73_s16 = sshll.u32 %s6927_s30, 4  ;;  %s97_s18 = sshll.u32 %s6928_s17, 4  ;;  %s74_s16 = int_to_ptr.vmem [resolvable:$true] %s73_s16  ;;  %s98_s18 = int_to_ptr.vmem [resolvable:$true] %s97_s18 }
  0x18   :  { %s6692_s22 = scalar_lea.hbm %s7931_s6, 4096 }
  0x19   :  { %p6693_p8 = scmp.ne.s32.totalorder %s7931_s6, %s6692_s22  ;;  %p6696_p9 = scmp.lt.u32.totalorder %s6692_s22, %s7931_s6 }
  0x1b   :  { %p6698_p10 = pnand %p6696_p9, %p6693_p8 }
  0x1d   :  { %6701 = shalt.err (!%p6698_p10)
}
  0x1e   :  { %s6702_s3 = scalar_lea.vmem %s74_s16, 4096  ;;  %p6707_p12 = scmp.lt.s32.totalorder %s74_s16, %s74_s16 }
  0x1f   :  { %p6703_p11 = scmp.ne.s32.totalorder %s74_s16, %s6702_s3  ;;  %p6708_p13 = scmp.lt.s32.totalorder %s6702_s3, %s6702_s3 }
  0x21   :  { %p6709_p0 = por %p6708_p13, %p6707_p12 }
  0x23   :  { %p6710_p1 = pnand %p6709_p0, %p6703_p11 }
  0x25   :  { %6713 = shalt.err (!%p6710_p1)
}
  0x26   :  { %s6929_s19 = smov 128   ;;  %s6930_s27 = smov 8  }
  0x27   :  { %79 = dma.hbm_to_vmem [thread:$0]  %s7931_s6, 4096, %s74_s16, [#allocation12], %s6929_s19, %s6929_s19, %s6930_s27  }
  0x28   :  { %s6714_s20 = scalar_lea.hbm %s7933_s8, 256 }
  0x29   :  { %p6715_p2 = scmp.ne.s32.totalorder %s7933_s8, %s6714_s20  ;;  %p6718_p3 = scmp.lt.u32.totalorder %s6714_s20, %s7933_s8 }
  0x2b   :  { %p6720_p4 = pnand %p6718_p3, %p6715_p2 }
  0x2d   :  { %6723 = shalt.err (!%p6720_p4)
}
  0x2e   :  { %s6724_s25 = scalar_lea.vmem %s98_s18, 256  ;;  %p6729_p6 = scmp.lt.s32.totalorder %s98_s18, %s98_s18 }
  0x2f   :  { %p6725_p5 = scmp.ne.s32.totalorder %s98_s18, %s6724_s25  ;;  %p6730_p7 = scmp.lt.s32.totalorder %s6724_s25, %s6724_s25 }
  0x31   :  { %p6731_p8 = por %p6730_p7, %p6729_p6 }
  0x33   :  { %p6732_p9 = pnand %p6731_p8, %p6725_p5 }
  0x35   :  { %6735 = shalt.err (!%p6732_p9)
}
  0x36   :  { %103 = dma.hbm_to_vmem [thread:$0]  %s7933_s8, 256, %s98_s18, [#allocation15], %s6929_s19, %s6929_s19, %s6930_s27  }
  0x37   :  { %s6931_s26 = smov [#allocation17]   ;;  %s6932_s28 = smov [#allocation5]  }
  0x38   :  { %s125_s3 = sshll.u32 %s6931_s26, 4  ;;  %s35_s29 = sshll.u32 %s6932_s28, 4  ;;  %s126_s3 = int_to_ptr.vmem [resolvable:$true] %s125_s3  ;;  %s36_s29 = int_to_ptr.vmem [resolvable:$true] %s35_s29 }
  0x39   :  { %s6736_s20 = scalar_lea.hbm %s7937_s12, 32768 }
  0x3a   :  { %p6737_p10 = scmp.ne.s32.totalorder %s7937_s12, %s6736_s20  ;;  %p6740_p11 = scmp.lt.u32.totalorder %s6736_s20, %s7937_s12 }
  0x3c   :  { %p6742_p12 = pnand %p6740_p11, %p6737_p10 }
  0x3e   :  { %6745 = shalt.err (!%p6742_p12)
}
  0x3f   :  { %s6746_s8 = scalar_lea.vmem %s126_s3, 32768  ;;  %p6751_p0 = scmp.lt.s32.totalorder %s126_s3, %s126_s3 }
  0x40   :  { %p6747_p13 = scmp.ne.s32.totalorder %s126_s3, %s6746_s8  ;;  %p6752_p1 = scmp.lt.s32.totalorder %s6746_s8, %s6746_s8 }
  0x42   :  { %p6753_p2 = por %p6752_p1, %p6751_p0 }
  0x44   :  { %p6754_p3 = pnand %p6753_p2, %p6747_p13 }
  0x46   :  { %6757 = shalt.err (!%p6754_p3)
}
  0x47   :  { %131 = dma.hbm_to_vmem [thread:$0]  %s7937_s12, 32768, %s126_s3, [#allocation18], %s6929_s19, %s6929_s19, %s6930_s27  }
  0x48   :  { %s6758_s26 = scalar_lea.hbm %s7926_s1, 512 }
  0x49   :  { %p6759_p4 = scmp.ne.s32.totalorder %s7926_s1, %s6758_s26  ;;  %p6762_p5 = scmp.lt.u32.totalorder %s6758_s26, %s7926_s1 }
  0x4b   :  { %p6764_p6 = pnand %p6762_p5, %p6759_p4 }
  0x4d   :  { %6767 = shalt.err (!%p6764_p6)
}
  0x4e   :  { %s6768_s21 = scalar_lea.vmem %s36_s29, 512  ;;  %p6773_p8 = scmp.lt.s32.totalorder %s36_s29, %s36_s29 }
  0x4f   :  { %p6769_p7 = scmp.ne.s32.totalorder %s36_s29, %s6768_s21  ;;  %p6774_p9 = scmp.lt.s32.totalorder %s6768_s21, %s6768_s21 }
  0x51   :  { %p6775_p10 = por %p6774_p9, %p6773_p8 }
  0x53   :  { %p6776_p11 = pnand %p6775_p10, %p6769_p7 }
  0x55   :  { %6779 = shalt.err (!%p6776_p11)
}
  0x56   :  { %41 = dma.hbm_to_vmem [thread:$0]  %s7926_s1, 512, %s36_s29, [#allocation6], %s6929_s19, %s6929_s19, %s6930_s27  }
  0x57   :  { %s6933_s22 = smov [#allocation10]   ;;  %s6934_s24 = smov [#allocation13]  }
  0x58   :  { %s59_s23 = sshll.u32 %s6933_s22, 4  ;;  %s85_s8 = sshll.u32 %s6934_s24, 4  ;;  %s60_s23 = int_to_ptr.vmem [resolvable:$true] %s59_s23  ;;  %s86_s8 = int_to_ptr.vmem [resolvable:$true] %s85_s8 }
  0x59   :  { %s6780_s6 = scalar_lea.hbm %s7929_s4, 8192 }
  0x5a   :  { %p6781_p12 = scmp.ne.s32.totalorder %s7929_s4, %s6780_s6  ;;  %p6784_p13 = scmp.lt.u32.totalorder %s6780_s6, %s7929_s4 }
  0x5c   :  { %p6786_p0 = pnand %p6784_p13, %p6781_p12 }
  0x5e   :  { %6789 = shalt.err (!%p6786_p0)
}
  0x5f   :  { %s6790_s1 = scalar_lea.vmem %s60_s23, 8192  ;;  %p6795_p2 = scmp.lt.s32.totalorder %s60_s23, %s60_s23 }
  0x60   :  { %p6791_p1 = scmp.ne.s32.totalorder %s60_s23, %s6790_s1  ;;  %p6796_p3 = scmp.lt.s32.totalorder %s6790_s1, %s6790_s1 }
  0x62   :  { %p6797_p4 = por %p6796_p3, %p6795_p2 }
  0x64   :  { %p6798_p5 = pnand %p6797_p4, %p6791_p1 }
  0x66   :  { %6801 = shalt.err (!%p6798_p5)
}
  0x67   :  { %65 = dma.hbm_to_vmem [thread:$0]  %s7929_s4, 8192, %s60_s23, [#allocation9], %s6929_s19, %s6929_s19, %s6930_s27  }
  0x68   :  { %s6802_s12 = scalar_lea.hbm %s7932_s7, 8192 }
  0x69   :  { %p6803_p6 = scmp.ne.s32.totalorder %s7932_s7, %s6802_s12  ;;  %p6806_p7 = scmp.lt.u32.totalorder %s6802_s12, %s7932_s7 }
  0x6b   :  { %p6808_p8 = pnand %p6806_p7, %p6803_p6 }
  0x6d   :  { %6811 = shalt.err (!%p6808_p8)
}
  0x6e   :  { %s6812_s25 = scalar_lea.vmem %s86_s8, 8192  ;;  %p6817_p10 = scmp.lt.s32.totalorder %s86_s8, %s86_s8 }
  0x6f   :  { %p6813_p9 = scmp.ne.s32.totalorder %s86_s8, %s6812_s25  ;;  %p6818_p11 = scmp.lt.s32.totalorder %s6812_s25, %s6812_s25 }
  0x71   :  { %p6819_p12 = por %p6818_p11, %p6817_p10 }
  0x73   :  { %p6820_p13 = pnand %p6819_p12, %p6813_p9 }
  0x75   :  { %6823 = shalt.err (!%p6820_p13)
}
  0x76   :  { %s6935_s4 = smov 256   ;;  %s6936_s23 = smov 16  }
  0x77   :  { %91 = dma.hbm_to_vmem [thread:$0]  %s7932_s7, 8192, %s86_s8, [#allocation12], %s6935_s4, %s6935_s4, %s6936_s23  }
  0x78   :  { %s6937_s26 = smov [#allocation16]   ;;  %s6938_s30 = smov [#allocation19]  }
  0x79   :  { %s113_s28 = sshll.u32 %s6937_s26, 4  ;;  %s137_s1 = sshll.u32 %s6938_s30, 4  ;;  %s114_s28 = int_to_ptr.vmem [resolvable:$true] %s113_s28  ;;  %s138_s1 = int_to_ptr.vmem [resolvable:$true] %s137_s1 }
  0x7a   :  { %s6824_s20 = scalar_lea.hbm %s7936_s11, 32768 }
  0x7b   :  { %p6825_p0 = scmp.ne.s32.totalorder %s7936_s11, %s6824_s20  ;;  %p6828_p1 = scmp.lt.u32.totalorder %s6824_s20, %s7936_s11 }
  0x7d   :  { %p6830_p2 = pnand %p6828_p1, %p6825_p0 }
  0x7f   :  { %6833 = shalt.err (!%p6830_p2)
}
  0x80   :  { %s6834_s7 = scalar_lea.vmem %s114_s28, 32768  ;;  %p6839_p4 = scmp.lt.s32.totalorder %s114_s28, %s114_s28 }
  0x81   :  { %p6835_p3 = scmp.ne.s32.totalorder %s114_s28, %s6834_s7  ;;  %p6840_p5 = scmp.lt.s32.totalorder %s6834_s7, %s6834_s7 }
  0x83   :  { %p6841_p6 = por %p6840_p5, %p6839_p4 }
  0x85   :  { %p6842_p7 = pnand %p6841_p6, %p6835_p3 }
  0x87   :  { %6845 = shalt.err (!%p6842_p7)
}
  0x88   :  { %119 = dma.hbm_to_vmem [thread:$0]  %s7936_s11, 32768, %s114_s28, [#allocation15], %s6929_s19, %s6929_s19, %s6930_s27  }
  0x89   :  { %s6846_s6 = scalar_lea.hbm %s7938_s13, 32768 }
  0x8a   :  { %p6847_p8 = scmp.ne.s32.totalorder %s7938_s13, %s6846_s6  ;;  %p6850_p9 = scmp.lt.u32.totalorder %s6846_s6, %s7938_s13 }
  0x8c   :  { %p6852_p10 = pnand %p6850_p9, %p6847_p8 }
  0x8e   :  { %6855 = shalt.err (!%p6852_p10)
}
  0x8f   :  { %s6856_s17 = scalar_lea.vmem %s138_s1, 32768  ;;  %p6861_p12 = scmp.lt.s32.totalorder %s138_s1, %s138_s1 }
  0x90   :  { %p6857_p11 = scmp.ne.s32.totalorder %s138_s1, %s6856_s17  ;;  %p6862_p13 = scmp.lt.s32.totalorder %s6856_s17, %s6856_s17 }
  0x92   :  { %p6863_p0 = por %p6862_p13, %p6861_p12 }
  0x94   :  { %p6864_p1 = pnand %p6863_p0, %p6857_p11 }
  0x96   :  { %6867 = shalt.err (!%p6864_p1)
}
  0x97   :  { %143 = dma.hbm_to_vmem [thread:$0]  %s7938_s13, 32768, %s138_s1, [#allocation18], %s6935_s4, %s6935_s4, %s6936_s23  }
  0x98   :  { %6912 = dma.done.wait [#allocation6], 512  }
  0x99   :  { %6913 = vsyncadd [#allocation6], 4294966784 }
  0x9a   :  { %6914 = dma.done.wait [#allocation9], 8224  }
  0x9b   :  { %6915 = vsyncadd [#allocation9], 4294959072 }
  0x9c   :  { %6916 = dma.done.wait [#allocation12], 12288  }
  0x9d   :  { %6917 = vsyncadd [#allocation12], 4294955008 }
  0x9e   :  { %6918 = dma.done.wait [#allocation15], 33024  }
  0x9f   :  { %6919 = vsyncadd [#allocation15], 4294934272 }
  0xa0   :  { %6920 = dma.done.wait [#allocation18], 65536  }
  0xa1   :  { %6921 = vsyncadd [#allocation18], 4294901760  ;;  %v7167_v0 = vld [vmem:[%s7925_s0] sm:$0xff]  ;;  %v7172_v1 = vld [vmem:[%s7925_s0 + $0x8] sm:$0xff]  ;;  %vm6940_vm0 = vmmov 0   ;;  %vm986_vm1 = vcmask 64512  }
  0xa2   :  { %v7177_v2 = vld [vmem:[%s7925_s0 + $0x10] sm:$0xff]  ;;  %v175_v3 = vmul.f32 %v7167_v0, %v7167_v0  ;;  %v176_v4 = vmul.f32 %v7172_v1, %v7172_v1  ;;  %v7186_v5 = vld [vmem:[%s7925_s0 + $0x18] sm:$0xff]  ;;  %v232_v7 = vld [vmem:[#allocation10 + $0x80] sm:$0xff] }
  0xa3   :  { %v177_v6 = vmul.f32 %v7177_v2, %v7177_v2  ;;  %v233_v8 = vld [vmem:[#allocation10 + $0x88] sm:$0xff]  ;;  %v178_v9 = vmul.f32 %v7186_v5, %v7186_v5  ;;  %v352_v11 = vld [vmem:[#allocation10 + $0x180] sm:$0xff]  ;;  %v234_v21 = vld [vmem:[#allocation10 + $0x90] sm:$0xff] }
  0xa4   :  { %v5528_v10 = vpack.c.bf16 %v233_v8, %v232_v7  ;;  %v353_v12 = vld [vmem:[#allocation10 + $0x188] sm:$0xff]  ;;  %v216_v13 = vld [vmem:[#allocation10] sm:$0xff]  ;;  %v179_v14 = vadd.f32 %v176_v4, %v175_v3  ;;  %v235_v22 = vld [vmem:[#allocation10 + $0x98] sm:$0xff] }
  0xa5   :  { %v5560_v15 = vpack.c.bf16 %v353_v12, %v352_v11  ;;  %v217_v16 = vld [vmem:[#allocation10 + $0x8] sm:$0xff]  ;;  %v336_v17 = vld [vmem:[#allocation10 + $0x100] sm:$0xff]  ;;  %v354_v23 = vld [vmem:[#allocation10 + $0x190] sm:$0xff]  ;;  %v182_v24 = vadd.f32 %v178_v9, %v177_v6  ;;  %v5532_v25 = vpack.c.bf16 %v235_v22, %v234_v21 }
  0xa6   :  { %v337_v18 = vld [vmem:[#allocation10 + $0x108] sm:$0xff]  ;;  %5529 = vmatprep.subr.bf16.mxu0 %v5528_v10  ;;  %v5530_v19 = vpack.c.bf16 %v217_v16, %v216_v13  ;;  %180 = vadd.xlane.f32.xlu0 %v179_v14  ;;  %v355_v26 = vld [vmem:[#allocation10 + $0x198] sm:$0xff]  ;;  %v218_v27 = vld [vmem:[#allocation10 + $0x10] sm:$0xff] }
  0xa7   :  { %v5562_v20 = vpack.c.bf16 %v337_v18, %v336_v17  ;;  %5561 = vmatprep.subr.bf16.mxu1 %v5560_v15  ;;  %v219_v28 = vld [vmem:[#allocation10 + $0x18] sm:$0xff]  ;;  %v5564_v29 = vpack.c.bf16 %v355_v26, %v354_v23  ;;  %v338_v31 = vld [vmem:[#allocation10 + $0x110] sm:$0xff]  ;;  %v236_v33 = vld [vmem:[#allocation10 + $0xa0] sm:$0xff] }
  0xa8   :  { %5531 = vmatpush3.bf16.msra.mxu0 %v5530_v19  ;;  %v5534_v30 = vpack.c.bf16 %v219_v28, %v218_v27  ;;  %v339_v32 = vld [vmem:[#allocation10 + $0x118] sm:$0xff]  ;;  %v237_v35 = vld [vmem:[#allocation10 + $0xa8] sm:$0xff]  ;;  %v356_v36 = vld [vmem:[#allocation10 + $0x1a0] sm:$0xff] }
  0xa9   :  { %5563 = vmatpush3.bf16.msra.mxu1 %v5562_v20  ;;  %5533 = vmatprep.subr.bf16.mxu0 %v5532_v25  ;;  %v5566_v34 = vpack.c.bf16 %v339_v32, %v338_v31  ;;  %v357_v37 = vld [vmem:[#allocation10 + $0x1a8] sm:$0xff]  ;;  %v5536_v38 = vpack.c.bf16 %v237_v35, %v236_v33  ;;  %v220_v40 = vld [vmem:[#allocation10 + $0x20] sm:$0xff]  ;;  %v238_v44 = vld [vmem:[#allocation10 + $0xb0] sm:$0xff] }
  0xaa   :  { %5565 = vmatprep.subr.bf16.mxu1 %v5564_v29  ;;  %v5568_v39 = vpack.c.bf16 %v357_v37, %v356_v36  ;;  %v221_v41 = vld [vmem:[#allocation10 + $0x28] sm:$0xff]  ;;  %v340_v42 = vld [vmem:[#allocation10 + $0x120] sm:$0xff]  ;;  %183 = vadd.xlane.f32.xlu0 %v182_v24  ;;  %v239_v45 = vld [vmem:[#allocation10 + $0xb8] sm:$0xff] }
  0xab   :  { %v341_v43 = vld [vmem:[#allocation10 + $0x128] sm:$0xff]  ;;  %v5538_v46 = vpack.c.bf16 %v221_v41, %v220_v40  ;;  %v358_v48 = vld [vmem:[#allocation10 + $0x1b0] sm:$0xff]  ;;  %v359_v49 = vld [vmem:[#allocation10 + $0x1b8] sm:$0xff]  ;;  %v5540_v50 = vpack.c.bf16 %v239_v45, %v238_v44 }
  0xac   :  { %5535 = vmatpush3.bf16.msra.mxu0 %v5534_v30  ;;  %v5570_v47 = vpack.c.bf16 %v341_v43, %v340_v42  ;;  %v5572_v51 = vpack.c.bf16 %v359_v49, %v358_v48  ;;  %v222_v52 = vld [vmem:[#allocation10 + $0x30] sm:$0xff]  ;;  %v223_v53 = vld [vmem:[#allocation10 + $0x38] sm:$0xff]  ;;  %v240_v58 = vld [vmem:[#allocation10 + $0xc0] sm:$0xff] }
  0xad   :  { %5567 = vmatpush3.bf16.msra.mxu1 %v5566_v34  ;;  %5537 = vmatprep.subr.bf16.mxu0 %v5536_v38  ;;  %v342_v54 = vld [vmem:[#allocation10 + $0x130] sm:$0xff]  ;;  %v5542_v55 = vpack.c.bf16 %v223_v53, %v222_v52  ;;  %v343_v56 = vld [vmem:[#allocation10 + $0x138] sm:$0xff]  ;;  %v241_v59 = vld [vmem:[#allocation10 + $0xc8] sm:$0xff] }
  0xae   :  { %5569 = vmatprep.subr.bf16.mxu1 %v5568_v39  ;;  %v5574_v57 = vpack.c.bf16 %v343_v56, %v342_v54  ;;  %v360_v60 = vld [vmem:[#allocation10 + $0x1c0] sm:$0xff]  ;;  %v5544_v61 = vpack.c.bf16 %v241_v59, %v240_v58  ;;  %v361_v62 = vld [vmem:[#allocation10 + $0x1c8] sm:$0xff]  ;;  %v242_v10 = vld [vmem:[#allocation10 + $0xd0] sm:$0xff]  ;;  %v198_v54 = vlaneseq }
  0xaf   :  { %v224_v63 = vld [vmem:[#allocation10 + $0x40] sm:$0xff]  ;;  %v225_v3 = vld [vmem:[#allocation10 + $0x48] sm:$0xff]  ;;  %v5576_v4 = vpack.c.bf16 %v361_v62, %v360_v60  ;;  %v243_v11 = vld [vmem:[#allocation10 + $0xd8] sm:$0xff] }
  0xb0   :  { %5539 = vmatpush3.bf16.msra.mxu0 %v5538_v46  ;;  %v5546_v6 = vpack.c.bf16 %v225_v3, %v224_v63  ;;  %v344_v7 = vld [vmem:[#allocation10 + $0x140] sm:$0xff]  ;;  %v345_v8 = vld [vmem:[#allocation10 + $0x148] sm:$0xff]  ;;  %v362_v12 = vld [vmem:[#allocation10 + $0x1d0] sm:$0xff]  ;;  %v5548_v13 = vpack.c.bf16 %v243_v11, %v242_v10  ;;  %v7199_v58 = vshrl.u32 %v198_v54, 7 }
  0xb1   :  { %5571 = vmatpush3.bf16.msra.mxu1 %v5570_v47  ;;  %5541 = vmatprep.subr.bf16.mxu0 %v5540_v50  ;;  %v5578_v9 = vpack.c.bf16 %v345_v8, %v344_v7  ;;  %v363_v14 = vld [vmem:[#allocation10 + $0x1d8] sm:$0xff]  ;;  %v226_v15 = vld [vmem:[#allocation10 + $0x50] sm:$0xff]  ;;  %v244_v22 = vld [vmem:[#allocation10 + $0xe0] sm:$0xff] }
  0xb2   :  { %5573 = vmatprep.subr.bf16.mxu1 %v5572_v51  ;;  %v227_v16 = vld [vmem:[#allocation10 + $0x58] sm:$0xff]  ;;  %v5580_v17 = vpack.c.bf16 %v363_v14, %v362_v12  ;;  %v346_v19 = vld [vmem:[#allocation10 + $0x150] sm:$0xff]  ;;  %v245_v23 = vld [vmem:[#allocation10 + $0xe8] sm:$0xff]  ;;  %v204_v60 = vsub.s32 1, %v7199_v58 }
  0xb3   :  { %v5550_v18 = vpack.c.bf16 %v227_v16, %v226_v15  ;;  %v347_v20 = vld [vmem:[#allocation10 + $0x158] sm:$0xff]  ;;  %v364_v24 = vld [vmem:[#allocation10 + $0x1e0] sm:$0xff]  ;;  %v5552_v25 = vpack.c.bf16 %v245_v23, %v244_v22  ;;  %v365_v26 = vld [vmem:[#allocation10 + $0x1e8] sm:$0xff] }
  0xb4   :  { %5543 = vmatpush3.bf16.msra.mxu0 %v5542_v55  ;;  %v5582_v21 = vpack.c.bf16 %v347_v20, %v346_v19  ;;  %v228_v27 = vld [vmem:[#allocation10 + $0x60] sm:$0xff]  ;;  %v229_v28 = vld [vmem:[#allocation10 + $0x68] sm:$0xff]  ;;  %v5584_v29 = vpack.c.bf16 %v365_v26, %v364_v24  ;;  %v246_v33 = vld [vmem:[#allocation10 + $0xf0] sm:$0xff] }
  0xb5   :  { %5575 = vmatpush3.bf16.msra.mxu1 %v5574_v57  ;;  %5545 = vmatprep.subr.bf16.mxu0 %v5544_v61  ;;  %v5554_v30 = vpack.c.bf16 %v229_v28, %v228_v27  ;;  %v348_v31 = vld [vmem:[#allocation10 + $0x160] sm:$0xff]  ;;  %v349_v32 = vld [vmem:[#allocation10 + $0x168] sm:$0xff]  ;;  %v247_v35 = vld [vmem:[#allocation10 + $0xf8] sm:$0xff]  ;;  %v200_v61 = vsub.s32 0, %v7199_v58 }
  0xb6   :  { %5577 = vmatprep.subr.bf16.mxu1 %v5576_v4  ;;  %v5586_v34 = vpack.c.bf16 %v349_v32, %v348_v31  ;;  %v366_v36 = vld [vmem:[#allocation10 + $0x1f0] sm:$0xff]  ;;  %v367_v37 = vld [vmem:[#allocation10 + $0x1f8] sm:$0xff]  ;;  %v5556_v38 = vpack.c.bf16 %v247_v35, %v246_v33  ;;  %v473_v47 = vld [vmem:[%s7930_s5 + $0x88] sm:$0xff] }
  0xb7   :  { %v5588_v39 = vpack.c.bf16 %v367_v37, %v366_v36  ;;  %v230_v40 = vld [vmem:[#allocation10 + $0x70] sm:$0xff]  ;;  %v231_v41 = vld [vmem:[#allocation10 + $0x78] sm:$0xff]  ;;  %v589_v48 = vld [vmem:[#allocation11 + $0x80] sm:$0xff] }
  0xb8   :  { %5547 = vmatpush3.bf16.msra.mxu0 %v5546_v6  ;;  %v350_v42 = vld [vmem:[#allocation10 + $0x170] sm:$0xff]  ;;  %v5558_v43 = vpack.c.bf16 %v231_v41, %v230_v40  ;;  %v351_v44 = vld [vmem:[#allocation10 + $0x178] sm:$0xff]  ;;  %v590_v50 = vld [vmem:[#allocation11 + $0x88] sm:$0xff] }
  0xb9   :  { %5579 = vmatpush3.bf16.msra.mxu1 %v5578_v9  ;;  %5549 = vmatprep.subr.bf16.mxu0 %v5548_v13  ;;  %v5590_v45 = vpack.c.bf16 %v351_v44, %v350_v42  ;;  %v472_v46 = vld [vmem:[%s7930_s5 + $0x80] sm:$0xff]  ;;  %v5624_v51 = vpack.c.bf16 %v590_v50, %v589_v48  ;;  %v457_v6 = vld [vmem:[%s7930_s5 + $0x8] sm:$0xff]  ;;  %v474_v10 = vld [vmem:[%s7930_s5 + $0x90] sm:$0xff] }
  0xba   :  { %5581 = vmatprep.subr.bf16.mxu1 %v5580_v17  ;;  %v5592_v49 = vpack.c.bf16 %v473_v47, %v472_v46  ;;  %v196_v62 = vld [vmem:[%s7927_s2] sm:$0x3]  ;;  %v573_v8 = vld [vmem:[#allocation11] sm:$0xff]  ;;  %v574_v9 = vld [vmem:[#allocation11 + $0x8] sm:$0xff] }
  0xbb   :  { %v205_v63 = vrot.slane %v196_v62, %v204_v60  ;;  %v201_v3 = vrot.slane %v196_v62, %v200_v61  ;;  %v456_v4 = vld [vmem:[%s7930_s5] sm:$0xff]  ;;  %v475_v13 = vld [vmem:[%s7930_s5 + $0x98] sm:$0xff]  ;;  %v5626_v19 = vpack.c.bf16 %v574_v9, %v573_v8  ;;  %v458_v20 = vld [vmem:[%s7930_s5 + $0x10] sm:$0xff] }
  0xbc   :  { %5551 = vmatpush3.bf16.msra.mxu0 %v5550_v18  ;;  %v591_v14 = vld [vmem:[#allocation11 + $0x90] sm:$0xff]  ;;  %v592_v15 = vld [vmem:[#allocation11 + $0x98] sm:$0xff]  ;;  %v5594_v18 = vpack.c.bf16 %v457_v6, %v456_v4  ;;  %v594_v31 = vld [vmem:[#allocation11 + $0xa8] sm:$0xff] }
  0xbd   :  { %5583 = vmatpush3.bf16.msra.mxu1 %v5582_v21  ;;  %5553 = vmatprep.subr.bf16.mxu0 %v5552_v25  ;;  %v5596_v21 = vpack.c.bf16 %v475_v13, %v474_v10  ;;  %v5628_v22 = vpack.c.bf16 %v592_v15, %v591_v14  ;;  %v575_v23 = vld [vmem:[#allocation11 + $0x10] sm:$0xff]  ;;  %v576_v24 = vld [vmem:[#allocation11 + $0x18] sm:$0xff]  ;;  %v577_v35 = vld [vmem:[#allocation11 + $0x20] sm:$0xff] }
  0xbe   :  { %5585 = vmatprep.subr.bf16.mxu1 %v5584_v29  ;;  %v476_v27 = vld [vmem:[%s7930_s5 + $0xa0] sm:$0xff]  ;;  %v477_v29 = vld [vmem:[%s7930_s5 + $0xa8] sm:$0xff]  ;;  %v5630_v32 = vpack.c.bf16 %v576_v24, %v575_v23  ;;  %v478_v37 = vld [vmem:[%s7930_s5 + $0xb0] sm:$0xff] }
  0xbf   :  { %v460_v33 = vld [vmem:[%s7930_s5 + $0x20] sm:$0xff]  ;;  %v578_v36 = vld [vmem:[#allocation11 + $0x28] sm:$0xff]  ;;  %v479_v40 = vld [vmem:[%s7930_s5 + $0xb8] sm:$0xff] }
  0xc0   :  { %5555 = vmatpush3.bf16.msra.mxu0 %v5554_v30  ;;  %v593_v30 = vld [vmem:[#allocation11 + $0xa0] sm:$0xff]  ;;  %v595_v41 = vld [vmem:[#allocation11 + $0xb0] sm:$0xff]  ;;  %v596_v42 = vld [vmem:[#allocation11 + $0xb8] sm:$0xff]  ;;  %v5634_v44 = vpack.c.bf16 %v578_v36, %v577_v35  ;;  %v5604_v47 = vpack.c.bf16 %v479_v40, %v478_v37 }
  0xc1   :  { %5587 = vmatpush3.bf16.msra.mxu1 %v5586_v34  ;;  %5557 = vmatprep.subr.bf16.mxu0 %v5556_v38  ;;  %v461_v34 = vld [vmem:[%s7930_s5 + $0x28] sm:$0xff]  ;;  %v5600_v38 = vpack.c.bf16 %v477_v29, %v476_v27  ;;  %v463_v46 = vld [vmem:[%s7930_s5 + $0x38] sm:$0xff]  ;;  %v5636_v48 = vpack.c.bf16 %v596_v42, %v595_v41  ;;  %v466_v13 = vld [vmem:[%s7930_s5 + $0x50] sm:$0xff] }
  0xc2   :  { %5589 = vmatprep.subr.bf16.mxu1 %v5588_v39  ;;  %v5632_v39 = vpack.c.bf16 %v594_v31, %v593_v30  ;;  %v580_v50 = vld [vmem:[#allocation11 + $0x38] sm:$0xff]  ;;  %v465_v62 = vld [vmem:[%s7930_s5 + $0x48] sm:$0xff]  ;;  %v599_v9 = vld [vmem:[#allocation11 + $0xd0] sm:$0xff] }
  0xc3   :  { %v581_v4 = vld [vmem:[#allocation11 + $0x40] sm:$0xff]  ;;  %v582_v6 = vld [vmem:[#allocation11 + $0x48] sm:$0xff]  ;;  %v483_v8 = vld [vmem:[%s7930_s5 + $0xd8] sm:$0xff] }
  0xc4   :  { %5559 = vmatpush3.bf16.msra.mxu0 %v5558_v43  ;;  %v5602_v43 = vpack.c.bf16 %v461_v34, %v460_v33  ;;  %v600_v10 = vld [vmem:[#allocation11 + $0xd8] sm:$0xff]  ;;  %v586_v29 = vld [vmem:[#allocation11 + $0x68] sm:$0xff]  ;;  %v587_v40 = vld [vmem:[#allocation11 + $0x70] sm:$0xff] }
  0xc5   :  { %5591 = vmatpush3.bf16.msra.mxu1 %v5590_v45  ;;  %5593 = vmatprep.subr.bf16.mxu0 %v5592_v49  ;;  %v462_v45 = vld [vmem:[%s7930_s5 + $0x30] sm:$0xff]  ;;  %v467_v14 = vld [vmem:[%s7930_s5 + $0x58] sm:$0xff]  ;;  %v468_v24 = vld [vmem:[%s7930_s5 + $0x60] sm:$0xff] }
  0xc6   :  { %5625 = vmatprep.subr.bf16.mxu1 %v5624_v51  ;;  %v579_v49 = vld [vmem:[#allocation11 + $0x30] sm:$0xff]  ;;  %v480_v51 = vld [vmem:[%s7930_s5 + $0xc0] sm:$0xff] }
  0xc7   :  { %v486_v30 = vld [vmem:[%s7930_s5 + $0xf0] sm:$0xff]  ;;  %v487_v31 = vld [vmem:[%s7930_s5 + $0xf8] sm:$0xff] }
  0xc8   :  { %v604_v33 = vld [vmem:[#allocation11 + $0xf8] sm:$0xff]  ;;  %v470_v36 = vld [vmem:[%s7930_s5 + $0x70] sm:$0xff]  ;;  %v5620_v37 = vpack.c.bf16 %v487_v31, %v486_v30 }
  0xc9   :  { %v588_v41 = vld [vmem:[#allocation11 + $0x78] sm:$0xff] }
 0x133   :  { %v181_v52 = vpop.xlane.xlu0 %180 }
 0x134   :  { %v186_v53 = vmul.f32 0.00390625, %v181_v52  ;;  %v481_v52 = vld [vmem:[%s7930_s5 + $0xc8] sm:$0xff] }
 0x136   :  { %v188_v55 = vadd.f32 1e-06, %v186_v53  ;;  %v597_v53 = vld [vmem:[#allocation11 + $0xc0] sm:$0xff] }
 0x137   :  { %v184_v56 = vpop.xlane.xlu0 %183 }
 0x138   :  { %6566 = vrsqrt.f32 %v188_v55  ;;  %v187_v57 = vmul.f32 0.00390625, %v184_v56  ;;  %v598_v55 = vld [vmem:[#allocation11 + $0xc8] sm:$0xff]  ;;  %v5606_v56 = vpack.c.bf16 %v463_v46, %v462_v45 }
 0x13a   :  { %v189_v59 = vadd.f32 1e-06, %v187_v57  ;;  %v5638_v57 = vpack.c.bf16 %v580_v50, %v579_v49 }
 0x13c   :  { %6568 = vrsqrt.f32 %v189_v59  ;;  %v464_v59 = vld [vmem:[%s7930_s5 + $0x40] sm:$0xff] }
 0x142   :  { %v6567_v7 = vpop.eup %6566 }
 0x143   :  { %v193_v11 = vmul.f32 %v6567_v7, %v7172_v1  ;;  %v192_v12 = vmul.f32 %v6567_v7, %v7167_v0  ;;  %v459_v1 = vld [vmem:[%s7930_s5 + $0x18] sm:$0xff]  ;;  %v482_v7 = vld [vmem:[%s7930_s5 + $0xd0] sm:$0xff] }
 0x144   :  { %v5598_v28 = vpack.c.bf16 %v459_v1, %v458_v20  ;;  %v5612_v15 = vpack.c.bf16 %v483_v8, %v482_v7  ;;  %v484_v20 = vld [vmem:[%s7930_s5 + $0xe0] sm:$0xff]  ;;  %v485_v1 = vld [vmem:[%s7930_s5 + $0xe8] sm:$0xff] }
 0x145   :  { %v209_v16 = vmul.f32 %v205_v63, %v193_v11  ;;  %v7224_v17 = vmul.f32 %v201_v3, %v192_v12  ;;  %v5610_v11 = vpack.c.bf16 %v465_v62, %v464_v59  ;;  %v5642_v12 = vpack.c.bf16 %v582_v6, %v581_v4 }
 0x146   :  { %v6569_v0 = vpop.eup %6568 }
 0x147   :  { %312 = vmatprep.mubr.f32.mxu0 %v209_v16  ;;  %432 = vmatprep.mubr.f32.mxu1 %v209_v16  ;;  %v195_v25 = vmul.f32 %v6569_v0, %v7186_v5  ;;  %v194_v26 = vmul.f32 %v6569_v0, %v7177_v2  ;;  %v601_v0 = vld [vmem:[#allocation11 + $0xe0] sm:$0xff] }
 0x148   :  { %313 = vmatmul.mubr.f32.vlgmr.msra.gmra.mrb[0].mxu0 %v7224_v17  ;;  %433 = vmatmul.mubr.f32.vlgmr.msra.gmra.mrb[0].mxu1 %v7224_v17 }
 0x149   :  { %5595 = vmatpush3.bf16.msra.mxu0 %v5594_v18  ;;  %5627 = vmatpush3.bf16.msra.mxu1 %v5626_v19  ;;  %v7242_v5 = vmul.f32 %v205_v63, %v195_v25  ;;  %v7244_v2 = vmul.f32 %v201_v3, %v194_v26  ;;  %v5608_v63 = vpack.c.bf16 %v481_v52, %v480_v51  ;;  %v583_v18 = vld [vmem:[#allocation11 + $0x50] sm:$0xff]  ;;  %v584_v19 = vld [vmem:[#allocation11 + $0x58] sm:$0xff]  ;;  %v469_v25 = vld [vmem:[%s7930_s5 + $0x68] sm:$0xff] }
 0x14a   :  { %5597 = vmatprep.subr.bf16.mxu0 %v5596_v21  ;;  %5629 = vmatprep.subr.bf16.mxu1 %v5628_v22  ;;  %v5640_v3 = vpack.c.bf16 %v598_v55, %v597_v53  ;;  %v602_v21 = vld [vmem:[#allocation11 + $0xe8] sm:$0xff]  ;;  %v5614_v22 = vpack.c.bf16 %v467_v14, %v466_v13  ;;  %v5646_v23 = vpack.c.bf16 %v584_v19, %v583_v18 }
 0x14b   :  { %317 = vmatprep.mubr.f32.mxu0 %v7242_v5  ;;  %437 = vmatprep.mubr.f32.mxu1 %v7242_v5  ;;  %v5616_v26 = vpack.c.bf16 %v485_v1, %v484_v20  ;;  %v5648_v27 = vpack.c.bf16 %v602_v21, %v601_v0  ;;  %v5618_v34 = vpack.c.bf16 %v469_v25, %v468_v24  ;;  %v213_v18 = vld [vmem:[#allocation14 + $0x8] sm:$0xff] }
 0x14c   :  { %318 = vmatmul.mubr.f32.gmra.mrb[2].mxu0 %v7244_v2  ;;  %438 = vmatmul.mubr.f32.gmra.mrb[2].mxu1 %v7244_v2 }
 0x14d   :  { %5599 = vmatpush3.bf16.msra.mxu0 %v5598_v28  ;;  %5631 = vmatpush3.bf16.msra.mxu1 %v5630_v32  ;;  %v585_v28 = vld [vmem:[#allocation11 + $0x60] sm:$0xff]  ;;  %v603_v32 = vld [vmem:[#allocation11 + $0xf0] sm:$0xff] }
 0x14e   :  { %552 = vmatprep.mubr.f32.mxu0 %v209_v16  ;;  %669 = vmatprep.mubr.f32.mxu1 %v209_v16  ;;  %v5644_v16 = vpack.c.bf16 %v600_v10, %v599_v9  ;;  %v5650_v35 = vpack.c.bf16 %v586_v29, %v585_v28  ;;  %v214_v10 = vld [vmem:[%s7934_s9] sm:$0xff] }
 0x14f   :  { %5601 = vmatprep.subr.bf16.mxu0 %v5600_v38  ;;  %5633 = vmatprep.subr.bf16.mxu1 %v5632_v39  ;;  %v5652_v38 = vpack.c.bf16 %v604_v33, %v603_v32  ;;  %v471_v39 = vld [vmem:[%s7930_s5 + $0x78] sm:$0xff]  ;;  %s6941_s5 = smov 64  }
 0x150   :  { %v5622_v42 = vpack.c.bf16 %v471_v39, %v470_v36 }
 0x151   :  { %5603 = vmatpush3.bf16.msra.mxu0 %v5602_v43  ;;  %5635 = vmatpush3.bf16.msra.mxu1 %v5634_v44  ;;  %v5654_v43 = vpack.c.bf16 %v588_v41, %v587_v40  ;;  %v703_v41 = vld [vmem:[#allocation5 + $0x8] sm:$0xff] }
 0x152   :  { %5605 = vmatprep.subr.bf16.mxu0 %v5604_v47  ;;  %5637 = vmatprep.subr.bf16.mxu1 %v5636_v48 }
 0x155   :  { %5607 = vmatpush3.bf16.msra.mxu0 %v5606_v56  ;;  %5639 = vmatpush3.bf16.msra.mxu1 %v5638_v57  ;;  %v6939_v56 = vmov 0.0  }
 0x156   :  { %5609 = vmatprep.subr.bf16.mxu0 %v5608_v63  ;;  %5641 = vmatprep.subr.bf16.mxu1 %v5640_v3 }
 0x159   :  { %5611 = vmatpush3.bf16.msra.mxu0 %v5610_v11  ;;  %5643 = vmatpush3.bf16.msra.mxu1 %v5642_v12  ;;  %v212_v11 = vld [vmem:[#allocation14] sm:$0xff] }
 0x15a   :  { %5613 = vmatprep.subr.bf16.mxu0 %v5612_v15  ;;  %5645 = vmatprep.subr.bf16.mxu1 %v5644_v16  ;;  %v215_v15 = vld [vmem:[%s7934_s9 + $0x8] sm:$0xff] }
 0x15d   :  { %5615 = vmatpush3.bf16.msra.mxu0 %v5614_v22  ;;  %5647 = vmatpush3.bf16.msra.mxu1 %v5646_v23 }
 0x15e   :  { %5617 = vmatprep.subr.bf16.mxu0 %v5616_v26  ;;  %5649 = vmatprep.subr.bf16.mxu1 %v5648_v27 }
 0x161   :  { %5619 = vmatpush3.bf16.msra.mxu0 %v5618_v34  ;;  %5651 = vmatpush3.bf16.msra.mxu1 %v5650_v35 }
 0x162   :  { %5621 = vmatprep.subr.bf16.mxu0 %v5620_v37  ;;  %5653 = vmatprep.subr.bf16.mxu1 %v5652_v38  ;;  %v702_v37 = vld [vmem:[#allocation5] sm:$0xff] }
 0x165   :  { %5623 = vmatpush3.bf16.msra.mxu0 %v5622_v42  ;;  %5655 = vmatpush3.bf16.msra.mxu1 %v5654_v43 }
 0x166   :  { %5488 = vmatprep.subr.mxu1 %v6939_v56 }
 0x168   :  { %553 = vmatmul.mubr.f32.vlgmr.msra.gmra.mrb[4].mxu0 %v7224_v17  ;;  %670 = vmatmul.mubr.f32.vlgmr.msra.gmra.mrb[4].mxu1 %v7224_v17 }
 0x169   :  { %557 = vmatprep.mubr.f32.mxu0 %v7242_v5  ;;  %674 = vmatprep.mubr.f32.mxu1 %v7242_v5 }
 0x16c   :  { %558 = vmatmul.mubr.f32.gmra.mrb[6].mxu0 %v7244_v2  ;;  %675 = vmatmul.mubr.f32.gmra.mrb[6].mxu1 %v7244_v2 }
 0x16d   :  { %1452 = vmatprep.mubr.f32.mxu0 %v6939_v56  ;;  %5490 = vmatprep.mubr.msk.f32.mxu1 %vm6940_vm0, %v6939_v56 }
 0x21b   :  { %v4706_v44 = vpop.f32.mrb[0].mxu0  ;;  %v4744_v45 = vpop.f32.mrb[0].mxu1 }
 0x21c   :  { %v4707_v46 = vpop.f32.mrb[1].mxu0  ;;  %v4745_v47 = vpop.f32.mrb[1].mxu1 }
 0x21d   :  { %v4708_v48 = vadd.f32 %v4707_v46, %v4706_v44  ;;  %v4746_v49 = vadd.f32 %v4745_v47, %v4744_v45  ;;  %v704_v46 = vld [vmem:[#allocation5 + $0x10] sm:$0xff] }
 0x21f   :  { %v4709_v50 = vpop.f32.mrb[2].mxu0  ;;  %v4747_v51 = vpop.f32.mrb[2].mxu1  ;;  %v323_v1 = vmul.f32 %v4708_v48, %v212_v11  ;;  %v443_v30 = vmul.f32 %v4746_v49, %v212_v11 }
 0x220   :  { %v4710_v52 = vpop.f32.mrb[3].mxu0  ;;  %v4748_v53 = vpop.f32.mrb[3].mxu1 }
 0x221   :  { %v4711_v55 = vadd.f32 %v4710_v52, %v4709_v50  ;;  %v4749_v17 = vadd.f32 %v4748_v53, %v4747_v51  ;;  %v705_v51 = vld [vmem:[#allocation5 + $0x18] sm:$0xff] }
 0x223   :  { %v324_v26 = vmul.f32 %v4711_v55, %v213_v18  ;;  %v444_v34 = vmul.f32 %v4749_v17, %v213_v18 }
 0x23b   :  { %v4782_v5 = vpop.f32.mrb[4].mxu0  ;;  %v4820_v2 = vpop.f32.mrb[4].mxu1 }
 0x23c   :  { %v4783_v57 = vpop.f32.mrb[5].mxu0  ;;  %v4821_v59 = vpop.f32.mrb[5].mxu1 }
 0x23d   :  { %v4784_v62 = vadd.f32 %v4783_v57, %v4782_v5  ;;  %v7326_v63 = vadd.f32 %v4821_v59, %v4820_v2 }
 0x23f   :  { %v4785_v3 = vpop.f32.mrb[6].mxu0  ;;  %v4823_v4 = vpop.f32.mrb[6].mxu1  ;;  %565 = vrot.lane.b32.xlu1 %v4784_v62, %s6941_s5  ;;  %v563_v13 = vmul.f32 %v4784_v62, %v212_v11 }
 0x240   :  { %v4786_v6 = vpop.f32.mrb[7].mxu0  ;;  %v4824_v7 = vpop.f32.mrb[7].mxu1 }
 0x241   :  { %v4787_v8 = vadd.f32 %v4786_v6, %v4785_v3  ;;  %v7328_v9 = vadd.f32 %v4824_v7, %v4823_v4 }
 0x243   :  { %567 = vrot.lane.b32.xlu0 %v4787_v8, %s6941_s5  ;;  %325 = vrot.lane.b32.xlu1 %v4708_v48, %s6941_s5  ;;  %v564_v0 = vmul.f32 %v4787_v8, %v213_v18 }
 0x247   :  { %327 = vrot.lane.b32.xlu1 %v4711_v55, %s6941_s5 }
 0x24b   :  { %445 = vrot.lane.b32.xlu1 %v4746_v49, %s6941_s5 }
 0x24f   :  { %447 = vrot.lane.b32.xlu1 %v4749_v17, %s6941_s5 }
 0x2b1   :  { %v566_v12 = vpop.permute.xlu1 %565 }
 0x2b2   :  { %v569_v14 = vmul.f32 %v566_v12, %v214_v10 }
 0x2b4   :  { %v571_v16 = vadd.f32 %v569_v14, %v563_v13 }
 0x2b5   :  { %v568_v19 = vpop.permute.xlu0 %567  ;;  %v326_v20 = vpop.permute.xlu1 %325 }
 0x2b6   :  { %v570_v21 = vmul.f32 %v568_v19, %v215_v15  ;;  %v329_v22 = vmul.f32 %v326_v20, %v214_v10  ;;  %5489 = vmatpush3.xpose.msra.mxu1 %v571_v16 }
 0x2b7   :  { %5493 = vmatprep.subr.mxu1 %v6939_v56 }
 0x2b8   :  { %v572_v23 = vadd.f32 %v570_v21, %v564_v0  ;;  %v331_v24 = vadd.f32 %v329_v22, %v323_v1  ;;  %v1357_v0 = vld [vmem:[#allocation13 + $0x108] sm:$0xff]  ;;  %v1359_v21 = vld [vmem:[#allocation13 + $0x118] sm:$0xff]  ;;  %v1356_v22 = vld [vmem:[#allocation13 + $0x100] sm:$0xff] }
 0x2b9   :  { %v328_v25 = vpop.permute.xlu1 %327 }
 0x2ba   :  { %v330_v27 = vmul.f32 %v328_v25, %v215_v15  ;;  %5491 = vmatmul.mubr.f32.vlgmr.msra.gmra.mrb[8].mxu1 %v331_v24  ;;  %v1358_v24 = vld [vmem:[#allocation13 + $0x110] sm:$0xff]  ;;  %v1361_v25 = vld [vmem:[#allocation13 + $0x128] sm:$0xff] }
 0x2bb   :  { %5494 = vmatpush3.xpose.msra.mxu1 %v572_v23  ;;  %5495 = vmatprep.mubr.msk.f32.mxu1 %vm6940_vm0, %v6939_v56 }
 0x2bc   :  { %v332_v28 = vadd.f32 %v330_v27, %v324_v26  ;;  %5498 = vmatprep.subr.mxu1 %v6939_v56  ;;  %v1363_v26 = vld [vmem:[#allocation13 + $0x138] sm:$0xff]  ;;  %v5658_v27 = vpack.c.bf16 %v1358_v24, %v1356_v22  ;;  %v1324_v22 = vld [vmem:[#allocation13 + $0x8] sm:$0xff] }
 0x2bd   :  { %v446_v29 = vpop.permute.xlu1 %445 }
 0x2be   :  { %v449_v31 = vmul.f32 %v446_v29, %v214_v10  ;;  %5496 = vmatmul.mubr.f32.vlgmr.msra.gmra.mrb[10].mxu1 %v332_v28  ;;  %v5660_v28 = vpack.c.bf16 %v1363_v26, %v1361_v25  ;;  %v1360_v29 = vld [vmem:[#allocation13 + $0x120] sm:$0xff] }
 0x2bf   :  { %5499 = vmatpush3.xpose.msra.mxu1 %v571_v16  ;;  %5500 = vmatprep.mubr.msk.f32.mxu1 %vm6940_vm0, %v6939_v56  ;;  %v1323_v26 = vld [vmem:[#allocation13] sm:$0xff] }
 0x2c0   :  { %v451_v32 = vadd.f32 %v449_v31, %v443_v30  ;;  %5503 = vmatprep.subr.mxu1 %v6939_v56  ;;  %v1362_v30 = vld [vmem:[#allocation13 + $0x130] sm:$0xff]  ;;  %v1365_v31 = vld [vmem:[#allocation13 + $0x148] sm:$0xff] }
 0x2c1   :  { %v448_v33 = vpop.permute.xlu1 %447 }
 0x2c2   :  { %v450_v35 = vmul.f32 %v448_v33, %v215_v15  ;;  %5501 = vmatmul.mubr.f32.vlgmr.msra.gmra.mrb[12].mxu1 %v451_v32  ;;  %v1367_v32 = vld [vmem:[#allocation13 + $0x158] sm:$0xff]  ;;  %v5662_v33 = vpack.c.bf16 %v1362_v30, %v1360_v29  ;;  %v1328_v29 = vld [vmem:[#allocation13 + $0x28] sm:$0xff] }
 0x2c3   :  { %5504 = vmatpush3.xpose.msra.mxu1 %v572_v23  ;;  %5505 = vmatprep.mubr.msk.f32.mxu1 %vm6940_vm0, %v6939_v56  ;;  %v5656_v23 = vpack.c.bf16 %v1359_v21, %v1357_v0  ;;  %v1384_v0 = vld [vmem:[#allocation13 + $0x1e0] sm:$0xff]  ;;  %v1330_v30 = vld [vmem:[#allocation13 + $0x38] sm:$0xff] }
 0x2c4   :  { %v452_v36 = vadd.f32 %v450_v35, %v444_v34  ;;  %5508 = vmatprep.subr.mxu1 %v6939_v56  ;;  %v5664_v34 = vpack.c.bf16 %v1367_v32, %v1365_v31  ;;  %v1364_v35 = vld [vmem:[#allocation13 + $0x140] sm:$0xff] }
 0x2c5   :  { %5657 = vmatprep.subr.bf16.mxu0 %v5656_v23 }
 0x2c6   :  { %5506 = vmatmul.mubr.f32.vlgmr.msra.gmra.mrb[14].mxu1 %v452_v36  ;;  %5659 = vmatpush1.bf16.msra.mxu0 %v5658_v27  ;;  %v1366_v36 = vld [vmem:[#allocation13 + $0x150] sm:$0xff] }
 0x2c7   :  { %5509 = vmatpush3.msra.mxu1 %v7326_v63  ;;  %5510 = vmatprep.mubr.msk.f32.mxu1 %vm6940_vm0, %v6939_v56  ;;  %v1325_v27 = vld [vmem:[#allocation13 + $0x10] sm:$0xff] }
 0x2c8   :  { %5513 = vmatprep.subr.mxu1 %v6939_v56  ;;  %5661 = vmatprep.subr.bf16.mxu0 %v5660_v28  ;;  %v5690_v32 = vpack.c.bf16 %v1325_v27, %v1323_v26  ;;  %v1881_v27 = vld [vmem:[#allocation17] sm:$0xff] }
 0x2ca   :  { %5663 = vmatpush1.bf16.msra.mxu0 %v5662_v33  ;;  %v5692_v33 = vpack.c.bf16 %v1330_v30, %v1328_v29  ;;  %v1600_v29 = vld [vmem:[%s7935_s10 + $0x90] sm:$0xff] }
 0x2cb   :  { %5665 = vmatprep.subr.bf16.mxu0 %v5664_v34  ;;  %v1327_v34 = vld [vmem:[#allocation13 + $0x20] sm:$0xff] }
 0x38d   :  { %v772_v38 = vpop.f32.mrb[8].mxu1 }
 0x38e   :  { %v773_v39 = vadd.f32 %v772_v38, %v702_v37  ;;  %v5492_v40 = vpop.f32.mrb[9].mxu1  ;;  %v1369_v37 = vld [vmem:[#allocation13 + $0x168] sm:$0xff]  ;;  %v1371_v38 = vld [vmem:[#allocation13 + $0x178] sm:$0xff] }
 0x38f   :  { %v5668_v40 = vpack.c.bf16 %v1371_v38, %v1369_v37  ;;  %v1332_v37 = vld [vmem:[#allocation13 + $0x48] sm:$0xff]  ;;  %v1334_v38 = vld [vmem:[#allocation13 + $0x58] sm:$0xff] }
 0x390   :  { %v987_v42 = vsel %vm986_vm1, %v773_v39, -inf }
 0x391   :  { %988 = vmax.xlane.f32.xlu1 %v987_v42  ;;  %v842_v43 = vpop.f32.mrb[10].mxu1  ;;  %v1370_v42 = vld [vmem:[#allocation13 + $0x170] sm:$0xff] }
 0x392   :  { %v843_v44 = vadd.f32 %v842_v43, %v703_v41  ;;  %v5497_v45 = vpop.f32.mrb[11].mxu1  ;;  %v1368_v41 = vld [vmem:[#allocation13 + $0x160] sm:$0xff]  ;;  %v1373_v43 = vld [vmem:[#allocation13 + $0x188] sm:$0xff] }
 0x393   :  { %v5670_v45 = vpack.c.bf16 %v1370_v42, %v1368_v41  ;;  %v5696_v41 = vpack.c.bf16 %v1334_v38, %v1332_v37  ;;  %v1331_v42 = vld [vmem:[#allocation13 + $0x40] sm:$0xff]  ;;  %v1585_v37 = vld [vmem:[%s7935_s10 + $0x18] sm:$0xff] }
 0x394   :  { %v990_v47 = vsel %vm986_vm1, %v843_v44, -inf  ;;  %v1883_v38 = vld [vmem:[#allocation17 + $0x10] sm:$0xff] }
 0x395   :  { %991 = vmax.xlane.f32.xlu0 %v990_v47  ;;  %v912_v48 = vpop.f32.mrb[12].mxu1  ;;  %v1372_v47 = vld [vmem:[#allocation13 + $0x180] sm:$0xff] }
 0x396   :  { %v913_v49 = vadd.f32 %v912_v48, %v704_v46  ;;  %v5502_v50 = vpop.f32.mrb[13].mxu1  ;;  %v1374_v48 = vld [vmem:[#allocation13 + $0x190] sm:$0xff] }
 0x397   :  { %v1379_v50 = vld [vmem:[#allocation13 + $0x1b8] sm:$0xff] }
 0x398   :  { %v993_v52 = vsel %vm986_vm1, %v913_v49, -inf }
 0x399   :  { %994 = vmax.xlane.f32.xlu1 %v993_v52  ;;  %v982_v53 = vpop.f32.mrb[14].mxu1 }
 0x39a   :  { %v983_v55 = vadd.f32 %v982_v53, %v705_v51  ;;  %v5507_v17 = vpop.f32.mrb[15].mxu1  ;;  %v5674_v51 = vpack.c.bf16 %v1374_v48, %v1372_v47  ;;  %v1376_v53 = vld [vmem:[#allocation13 + $0x1a0] sm:$0xff] }
 0x39c   :  { %v996_v5 = vsel %vm986_vm1, %v983_v55, -inf }
 0x39d   :  { %997 = vmax.xlane.f32.xlu1 %v996_v5 }
 0x41e   :  { %v989_v2 = vpop.xlane.xlu1 %988 }
 0x41f   :  { %v999_v57 = vsub.f32 %v773_v39, %v989_v2  ;;  %v5666_v39 = vpack.c.bf16 %v1366_v36, %v1364_v35  ;;  %v1329_v35 = vld [vmem:[#allocation13 + $0x30] sm:$0xff] }
 0x421   :  { %v1003_v59 = vmul.f32 1.442695, %v999_v57  ;;  %5667 = vmatpush1.bf16.msra.mxu0 %v5666_v39 }
 0x422   :  { %v992_v62 = vpop.xlane.xlu0 %991  ;;  %5669 = vmatprep.subr.bf16.mxu0 %v5668_v40  ;;  %v5694_v40 = vpack.c.bf16 %v1329_v35, %v1327_v34 }
 0x423   :  { %6570 = vpow2.f32 %v1003_v59  ;;  %v1000_v3 = vsub.f32 %v843_v44, %v992_v62  ;;  %v1375_v44 = vld [vmem:[#allocation13 + $0x198] sm:$0xff] }
 0x424   :  { %v5672_v46 = vpack.c.bf16 %v1375_v44, %v1373_v43  ;;  %v1333_v43 = vld [vmem:[#allocation13 + $0x50] sm:$0xff] }
 0x425   :  { %v1005_v4 = vmul.f32 1.442695, %v1000_v3  ;;  %5671 = vmatpush1.bf16.msra.mxu0 %v5670_v45  ;;  %v1336_v45 = vld [vmem:[#allocation13 + $0x68] sm:$0xff]  ;;  %v5698_v48 = vpack.c.bf16 %v1333_v43, %v1331_v42 }
 0x426   :  { %v995_v6 = vpop.xlane.xlu1 %994  ;;  %5673 = vmatprep.subr.bf16.mxu0 %v5672_v46  ;;  %v1338_v46 = vld [vmem:[#allocation13 + $0x78] sm:$0xff]  ;;  %v1603_v42 = vld [vmem:[%s7935_s10 + $0xa8] sm:$0xff] }
 0x427   :  { %6572 = vpow2.f32 %v1005_v4  ;;  %v1001_v7 = vsub.f32 %v913_v49, %v995_v6  ;;  %v1377_v49 = vld [vmem:[#allocation13 + $0x1a8] sm:$0xff] }
 0x428   :  { %v5676_v52 = vpack.c.bf16 %v1379_v50, %v1377_v49  ;;  %v5700_v49 = vpack.c.bf16 %v1338_v46, %v1336_v45  ;;  %v1335_v50 = vld [vmem:[#allocation13 + $0x60] sm:$0xff]  ;;  %v1901_v45 = vld [vmem:[#allocation17 + $0xa0] sm:$0xff]  ;;  %v1902_v46 = vld [vmem:[#allocation17 + $0xa8] sm:$0xff] }
 0x429   :  { %v1007_v8 = vmul.f32 1.442695, %v1001_v7  ;;  %5675 = vmatpush1.bf16.msra.mxu0 %v5674_v51  ;;  %v1337_v51 = vld [vmem:[#allocation13 + $0x70] sm:$0xff] }
 0x42a   :  { %v998_v10 = vpop.xlane.xlu1 %997  ;;  %5677 = vmatprep.subr.bf16.mxu0 %v5676_v52  ;;  %v1340_v52 = vld [vmem:[#allocation13 + $0x88] sm:$0xff] }
 0x42b   :  { %6574 = vpow2.f32 %v1007_v8  ;;  %v1002_v11 = vsub.f32 %v983_v55, %v998_v10  ;;  %v1378_v55 = vld [vmem:[#allocation13 + $0x1b0] sm:$0xff] }
 0x42c   :  { %v5678_v17 = vpack.c.bf16 %v1378_v55, %v1376_v53  ;;  %v1342_v53 = vld [vmem:[#allocation13 + $0x98] sm:$0xff]  ;;  %v5702_v55 = vpack.c.bf16 %v1337_v51, %v1335_v50  ;;  %v1885_v50 = vld [vmem:[#allocation17 + $0x20] sm:$0xff] }
 0x42d   :  { %v7354_v12 = vpop.eup %6570  ;;  %v1009_v13 = vmul.f32 1.442695, %v1002_v11  ;;  %v1886_v51 = vld [vmem:[#allocation17 + $0x28] sm:$0xff] }
 0x42e   :  { %v1011_v14 = vsel %vm986_vm1, %v7354_v12, 0.0  ;;  %5679 = vmatpush1.bf16.msra.mxu0 %v5678_v17  ;;  %v5704_v17 = vpack.c.bf16 %v1342_v53, %v1340_v52  ;;  %v1604_v53 = vld [vmem:[%s7935_s10 + $0xb0] sm:$0xff] }
 0x42f   :  { %6576 = vpow2.f32 %v1009_v13  ;;  %1012 = vadd.xlane.f32.xlu0 %v1011_v14  ;;  %v1380_v14 = vld [vmem:[#allocation13 + $0x1c0] sm:$0xff] }
 0x431   :  { %v7358_v15 = vpop.eup %6572 }
 0x432   :  { %v1014_v16 = vsel %vm986_vm1, %v7358_v15, 0.0 }
 0x433   :  { %1015 = vadd.xlane.f32.xlu1 %v1014_v16 }
 0x435   :  { %v7362_v18 = vpop.eup %6574 }
 0x436   :  { %v1017_v19 = vsel %vm986_vm1, %v7362_v18, 0.0 }
 0x437   :  { %1018 = vadd.xlane.f32.xlu0 %v1017_v19  ;;  %v1387_v19 = vld [vmem:[#allocation13 + $0x1f8] sm:$0xff] }
 0x439   :  { %v7366_v20 = vpop.eup %6576 }
 0x43a   :  { %v1020_v1 = vsel %vm986_vm1, %v7366_v20, 0.0 }
 0x43b   :  { %1021 = vadd.xlane.f32.xlu1 %v1020_v1 }
 0x4bc   :  { %v1013_v5 = vpop.xlane.xlu0 %1012 }
 0x4bd   :  { %6578 = vrcp.f32 %v1013_v5  ;;  %v1339_v5 = vld [vmem:[#allocation13 + $0x80] sm:$0xff] }
 0x4c0   :  { %v1016_v2 = vpop.xlane.xlu1 %1015 }
 0x4c1   :  { %6580 = vrcp.f32 %v1016_v2  ;;  %v1341_v2 = vld [vmem:[#allocation13 + $0x90] sm:$0xff] }
 0x4c4   :  { %v1019_v57 = vpop.xlane.xlu0 %1018 }
 0x4c5   :  { %6582 = vrcp.f32 %v1019_v57  ;;  %v1344_v57 = vld [vmem:[#allocation13 + $0xa8] sm:$0xff] }
 0x4c7   :  { %v6579_v59 = vpop.eup %6578 }
 0x4c8   :  { %v1027_v62 = vmul.f32 %v6579_v59, %v7354_v12  ;;  %v1022_v3 = vpop.xlane.xlu1 %1021  ;;  %v1383_v12 = vld [vmem:[#allocation13 + $0x1d8] sm:$0xff] }
 0x4c9   :  { %6584 = vrcp.f32 %v1022_v3  ;;  %v1346_v59 = vld [vmem:[#allocation13 + $0xb8] sm:$0xff] }
 0x4ca   :  { %5511 = vmatmul.mubr.msk.f32.vlgmr.msra.gmra.mrb[16].mxu1 %vm986_vm1, %v1027_v62  ;;  %v5706_v62 = vpack.c.bf16 %v1341_v2, %v1339_v5  ;;  %v5708_v3 = vpack.c.bf16 %v1346_v59, %v1344_v57  ;;  %v5794_v5 = vpack.c.bf16 %v1886_v51, %v1885_v50  ;;  %v1904_v57 = vld [vmem:[#allocation17 + $0xb8] sm:$0xff]  ;;  %v1909_v51 = vld [vmem:[#allocation17 + $0xe0] sm:$0xff] }
 0x4cb   :  { %v6581_v4 = vpop.eup %6580  ;;  %5514 = vmatpush3.msra.mxu1 %v7328_v9  ;;  %5515 = vmatprep.mubr.msk.f32.mxu1 %vm6940_vm0, %v6939_v56  ;;  %v1611_v50 = vld [vmem:[%s7935_s10 + $0xe8] sm:$0xff] }
 0x4cc   :  { %v1028_v6 = vmul.f32 %v6581_v4, %v7358_v15  ;;  %5518 = vmatprep.subr.mxu1 %v6939_v56  ;;  %v1382_v15 = vld [vmem:[#allocation13 + $0x1d0] sm:$0xff]  ;;  %v1343_v4 = vld [vmem:[#allocation13 + $0xa0] sm:$0xff] }
 0x4cd   :  { %v5682_v16 = vpack.c.bf16 %v1382_v15, %v1380_v14  ;;  %v1354_v14 = vld [vmem:[#allocation13 + $0xf8] sm:$0xff] }
 0x4ce   :  { %5516 = vmatmul.mubr.msk.f32.vlgmr.msra.gmra.mrb[18].mxu1 %vm986_vm1, %v1028_v6  ;;  %v1345_v6 = vld [vmem:[#allocation13 + $0xb0] sm:$0xff] }
 0x4cf   :  { %v6583_v7 = vpop.eup %6582  ;;  %5519 = vmatpush3.msra.mxu1 %v7326_v63  ;;  %5520 = vmatprep.mubr.msk.f32.mxu1 %vm6940_vm0, %v6939_v56  ;;  %v1381_v63 = vld [vmem:[#allocation13 + $0x1c8] sm:$0xff] }
 0x4d0   :  { %v1029_v8 = vmul.f32 %v6583_v7, %v7362_v18  ;;  %5523 = vmatprep.subr.mxu1 %v6939_v56  ;;  %v5680_v13 = vpack.c.bf16 %v1383_v12, %v1381_v63  ;;  %v1385_v18 = vld [vmem:[#allocation13 + $0x1e8] sm:$0xff]  ;;  %v1347_v63 = vld [vmem:[#allocation13 + $0xc0] sm:$0xff]  ;;  %v1349_v12 = vld [vmem:[#allocation13 + $0xd0] sm:$0xff] }
 0x4d1   :  { %v5684_v1 = vpack.c.bf16 %v1387_v19, %v1385_v18  ;;  %v1348_v7 = vld [vmem:[#allocation13 + $0xc8] sm:$0xff]  ;;  %v5714_v15 = vpack.c.bf16 %v1349_v12, %v1347_v63  ;;  %v1351_v18 = vld [vmem:[#allocation13 + $0xe0] sm:$0xff]  ;;  %v1353_v19 = vld [vmem:[#allocation13 + $0xf0] sm:$0xff] }
 0x4d2   :  { %5521 = vmatmul.mubr.msk.f32.vlgmr.msra.gmra.mrb[20].mxu1 %vm986_vm1, %v1029_v8  ;;  %5681 = vmatprep.subr.bf16.mxu0 %v5680_v13  ;;  %v1350_v8 = vld [vmem:[#allocation13 + $0xd8] sm:$0xff]  ;;  %v1352_v13 = vld [vmem:[#allocation13 + $0xe8] sm:$0xff] }
 0x4d3   :  { %v6585_v10 = vpop.eup %6584  ;;  %5524 = vmatpush3.msra.mxu1 %v7328_v9  ;;  %5525 = vmatprep.mubr.msk.f32.mxu1 %vm6940_vm0, %v6939_v56  ;;  %v1386_v9 = vld [vmem:[#allocation13 + $0x1f0] sm:$0xff] }
 0x4d4   :  { %v1030_v11 = vmul.f32 %v6585_v10, %v7366_v20  ;;  %5683 = vmatpush1.bf16.msra.mxu0 %v5682_v16  ;;  %v5686_v21 = vpack.c.bf16 %v1386_v9, %v1384_v0  ;;  %v1326_v20 = vld [vmem:[#allocation13 + $0x18] sm:$0xff]  ;;  %v5710_v10 = vpack.c.bf16 %v1345_v6, %v1343_v4  ;;  %v5716_v16 = vpack.c.bf16 %v1354_v14, %v1352_v13  ;;  %v1599_v9 = vld [vmem:[%s7935_s10 + $0x88] sm:$0xff]  ;;  %v6668_v12 = vld [vmem:[%s7925_s0 + $0x10] sm:$0xff] }
 0x4d5   :  { %5685 = vmatprep.subr.bf16.mxu0 %v5684_v1  ;;  %v5688_v23 = vpack.c.bf16 %v1326_v20, %v1324_v22  ;;  %v5718_v1 = vpack.c.bf16 %v1353_v19, %v1351_v18  ;;  %v1598_v0 = vld [vmem:[%s7935_s10 + $0x80] sm:$0xff] }
 0x4d6   :  { %5526 = vmatmul.mubr.msk.f32.vlgmr.msra.gmra.mrb[22].mxu1 %vm986_vm1, %v1030_v11  ;;  %v5712_v11 = vpack.c.bf16 %v1350_v8, %v1348_v7  ;;  %v5720_v22 = vpack.c.bf16 %v1599_v9, %v1598_v0  ;;  %v1898_v20 = vld [vmem:[#allocation17 + $0x88] sm:$0xff]  ;;  %v6667_v7 = vld [vmem:[%s7925_s0 + $0x8] sm:$0xff]  ;;  %v1588_v9 = vld [vmem:[%s7935_s10 + $0x30] sm:$0xff] }
 0x4d8   :  { %5687 = vmatpush1.bf16.msra.mxu0 %v5686_v21  ;;  %v1897_v21 = vld [vmem:[#allocation17 + $0x80] sm:$0xff]  ;;  %5721 = vmatprep.subr.bf16.mxu1 %v5720_v22  ;;  %v1887_v22 = vld [vmem:[#allocation17 + $0x30] sm:$0xff] }
 0x4d9   :  { %5689 = vmatprep.subr.bf16.mxu0 %v5688_v23  ;;  %v1582_v23 = vld [vmem:[%s7935_s10] sm:$0xff] }
 0x59d   :  { %v7389_v24 = vpop.f32.mrb[16].mxu1 }
 0x59e   :  { %v5512_v25 = vpop.f32.mrb[17].mxu1 }
 0x59f   :  { %v5784_v25 = vpack.c.bf16 %v1898_v20, %v1897_v21  ;;  %v1589_v21 = vld [vmem:[%s7935_s10 + $0x38] sm:$0xff] }
 0x5a0   :  { %v5734_v20 = vpack.c.bf16 %v1589_v21, %v1588_v9  ;;  %v1791_v9 = vld [vmem:[#allocation16 + $0x88] sm:$0xff]  ;;  %v2146_v21 = vld [vmem:[#allocation16 + $0x180] sm:$0xff] }
 0x5a1   :  { %v7391_v28 = vpop.f32.mrb[18].mxu1 }
 0x5a2   :  { %v5517_v31 = vpop.f32.mrb[19].mxu1 }
 0x5a3   :  { %v1601_v31 = vld [vmem:[%s7935_s10 + $0x98] sm:$0xff] }
 0x5a4   :  { %v5724_v34 = vpack.c.bf16 %v1601_v31, %v1600_v29  ;;  %v1906_v29 = vld [vmem:[#allocation17 + $0xc8] sm:$0xff]  ;;  %v1591_v31 = vld [vmem:[%s7935_s10 + $0x48] sm:$0xff] }
 0x5a5   :  { %v1246_v36 = vpop.f32.mrb[20].mxu1 }
 0x5a6   :  { %v5522_v39 = vpop.f32.mrb[21].mxu1  ;;  %1453 = vmatmul.mubr.f32.vlgmr.msra.gmra.mrb[8].mxu0 %v1246_v36  ;;  %v1584_v36 = vld [vmem:[%s7935_s10 + $0x10] sm:$0xff] }
 0x5a7   :  { %5691 = vmatpush1.bf16.msra.mxu0 %v5690_v32  ;;  %1458 = vmatprep.mubr.f32.mxu0 %v6939_v56  ;;  %v1899_v32 = vld [vmem:[#allocation17 + $0x90] sm:$0xff]  ;;  %v5726_v39 = vpack.c.bf16 %v1585_v37, %v1584_v36  ;;  %v1608_v37 = vld [vmem:[%s7935_s10 + $0xd0] sm:$0xff] }
 0x5a8   :  { %5693 = vmatprep.subr.bf16.mxu0 %v5692_v33  ;;  %v1900_v33 = vld [vmem:[#allocation17 + $0x98] sm:$0xff] }
 0x5a9   :  { %v1319_v44 = vpop.f32.mrb[22].mxu1  ;;  %v5788_v35 = vpack.c.bf16 %v1900_v33, %v1899_v32 }
 0x5aa   :  { %v5527_v47 = vpop.f32.mrb[23].mxu1  ;;  %1459 = vmatmul.mubr.f32.gmra.mrb[10].mxu0 %v1319_v44 }
 0x5ab   :  { %5695 = vmatpush1.bf16.msra.mxu0 %v5694_v40  ;;  %1529 = vmatprep.mubr.f32.mxu0 %v6939_v56  ;;  %v1884_v40 = vld [vmem:[#allocation17 + $0x18] sm:$0xff]  ;;  %v1586_v47 = vld [vmem:[%s7935_s10 + $0x20] sm:$0xff] }
 0x5ac   :  { %5697 = vmatprep.subr.bf16.mxu0 %v5696_v41  ;;  %v1602_v41 = vld [vmem:[%s7935_s10 + $0xa0] sm:$0xff]  ;;  %v5790_v43 = vpack.c.bf16 %v1884_v40, %v1883_v38  ;;  %v1609_v38 = vld [vmem:[%s7935_s10 + $0xd8] sm:$0xff] }
 0x5ad   :  { %v5728_v44 = vpack.c.bf16 %v1603_v42, %v1602_v41  ;;  %v5740_v40 = vpack.c.bf16 %v1609_v38, %v1608_v37  ;;  %v1908_v41 = vld [vmem:[#allocation17 + $0xd8] sm:$0xff]  ;;  %v2131_v37 = vld [vmem:[#allocation16 + $0x108] sm:$0xff]  ;;  %v1792_v38 = vld [vmem:[#allocation16 + $0x90] sm:$0xff] }
 0x5ae   :  { %v1592_v42 = vld [vmem:[%s7935_s10 + $0x50] sm:$0xff] }
 0x5af   :  { %5699 = vmatpush1.bf16.msra.mxu0 %v5698_v48  ;;  %v5792_v48 = vpack.c.bf16 %v1902_v46, %v1901_v45  ;;  %v1891_v46 = vld [vmem:[#allocation17 + $0x50] sm:$0xff] }
 0x5b0   :  { %5701 = vmatprep.subr.bf16.mxu0 %v5700_v49  ;;  %v1587_v49 = vld [vmem:[%s7935_s10 + $0x28] sm:$0xff] }
 0x5b1   :  { %v5730_v52 = vpack.c.bf16 %v1587_v49, %v1586_v47  ;;  %v1892_v47 = vld [vmem:[#allocation17 + $0x58] sm:$0xff]  ;;  %v1610_v49 = vld [vmem:[%s7935_s10 + $0xe0] sm:$0xff] }
 0x5b3   :  { %5703 = vmatpush1.bf16.msra.mxu0 %v5702_v55  ;;  %v1605_v55 = vld [vmem:[%s7935_s10 + $0xb8] sm:$0xff] }
 0x5b4   :  { %5705 = vmatprep.subr.bf16.mxu0 %v5704_v17  ;;  %v1903_v17 = vld [vmem:[#allocation17 + $0xb0] sm:$0xff]  ;;  %v5732_v2 = vpack.c.bf16 %v1605_v55, %v1604_v53  ;;  %v1910_v53 = vld [vmem:[#allocation17 + $0xe8] sm:$0xff] }
 0x5b5   :  { %v5796_v59 = vpack.c.bf16 %v1904_v57, %v1903_v17  ;;  %v1594_v55 = vld [vmem:[%s7935_s10 + $0x60] sm:$0xff]  ;;  %v1595_v17 = vld [vmem:[%s7935_s10 + $0x68] sm:$0xff]  ;;  %v1893_v57 = vld [vmem:[#allocation17 + $0x60] sm:$0xff] }
 0x5b7   :  { %5707 = vmatpush1.bf16.msra.mxu0 %v5706_v62 }
 0x5b8   :  { %5709 = vmatprep.subr.bf16.mxu0 %v5708_v3  ;;  %v6666_v3 = vld [vmem:[%s7925_s0] sm:$0xff] }
 0x5bb   :  { %5711 = vmatpush1.bf16.msra.mxu0 %v5710_v10 }
 0x5bc   :  { %5713 = vmatprep.subr.bf16.mxu0 %v5712_v11 }
 0x5bf   :  { %5715 = vmatpush1.bf16.msra.mxu0 %v5714_v15  ;;  %v6669_v15 = vld [vmem:[%s7925_s0 + $0x18] sm:$0xff] }
 0x5c0   :  { %5717 = vmatprep.subr.bf16.mxu0 %v5716_v16 }
 0x5c3   :  { %5719 = vmatpush1.bf16.msra.mxu0 %v5718_v1 }
 0x5c4   :  { %5785 = vmatprep.subr.bf16.mxu0 %v5784_v25  ;;  %v1606_v25 = vld [vmem:[%s7935_s10 + $0xc0] sm:$0xff] }
 0x5c6   :  { %1530 = vmatmul.mubr.f32.vlgmr.msra.gmra.mrb[8].mxu0 %v7389_v24  ;;  %v1583_v24 = vld [vmem:[%s7935_s10 + $0x8] sm:$0xff] }
 0x5c7   :  { %1535 = vmatprep.mubr.f32.mxu0 %v6939_v56  ;;  %v5722_v26 = vpack.c.bf16 %v1583_v24, %v1582_v23  ;;  %v1888_v23 = vld [vmem:[#allocation17 + $0x38] sm:$0xff] }
 0x5c8   :  { %v5798_v24 = vpack.c.bf16 %v1888_v23, %v1887_v22 }
 0x5c9   :  { %5723 = vmatpush3.bf16.msra.mxu1 %v5722_v26  ;;  %v1607_v26 = vld [vmem:[%s7935_s10 + $0xc8] sm:$0xff] }
 0x5ca   :  { %1536 = vmatmul.mubr.f32.gmra.mrb[10].mxu0 %v7391_v28  ;;  %v1882_v28 = vld [vmem:[#allocation17 + $0x8] sm:$0xff]  ;;  %5725 = vmatprep.subr.bf16.mxu1 %v5724_v34  ;;  %v1889_v34 = vld [vmem:[#allocation17 + $0x40] sm:$0xff] }
 0x5cb   :  { %v5786_v30 = vpack.c.bf16 %v1882_v28, %v1881_v27  ;;  %v1905_v27 = vld [vmem:[#allocation17 + $0xc0] sm:$0xff]  ;;  %v5736_v28 = vpack.c.bf16 %v1607_v26, %v1606_v25 }
 0x5cc   :  { %v5800_v32 = vpack.c.bf16 %v1906_v29, %v1905_v27 }
 0x5cd   :  { %5787 = vmatpush3.bf16.msra.mxu0 %v5786_v30  ;;  %5727 = vmatpush3.bf16.msra.mxu1 %v5726_v39  ;;  %v1590_v30 = vld [vmem:[%s7935_s10 + $0x40] sm:$0xff] }
 0x5ce   :  { %5789 = vmatprep.subr.bf16.mxu0 %v5788_v35  ;;  %5729 = vmatprep.subr.bf16.mxu1 %v5728_v44  ;;  %v5738_v33 = vpack.c.bf16 %v1591_v31, %v1590_v30  ;;  %v1890_v35 = vld [vmem:[#allocation17 + $0x48] sm:$0xff]  ;;  %v1907_v39 = vld [vmem:[#allocation17 + $0xd0] sm:$0xff] }
 0x5cf   :  { %v5802_v36 = vpack.c.bf16 %v1890_v35, %v1889_v34  ;;  %v5804_v44 = vpack.c.bf16 %v1908_v41, %v1907_v39  ;;  %v1566_v30 = vld [vmem:[#allocation8] sm:$0x3]  ;;  %v1793_v41 = vld [vmem:[#allocation16 + $0x98] sm:$0xff] }
 0x5d0   :  { %v1575_v31 = vrot.slane %v1566_v30, %v204_v60  ;;  %v1775_v34 = vld [vmem:[#allocation16 + $0x8] sm:$0xff] }
 0x5d1   :  { %5791 = vmatpush3.bf16.msra.mxu0 %v5790_v43  ;;  %5731 = vmatpush3.bf16.msra.mxu1 %v5730_v52  ;;  %v1593_v43 = vld [vmem:[%s7935_s10 + $0x58] sm:$0xff]  ;;  %v5744_v52 = vpack.c.bf16 %v1611_v50, %v1610_v49  ;;  %v2132_v50 = vld [vmem:[#allocation16 + $0x110] sm:$0xff] }
 0x5d2   :  { %5793 = vmatprep.subr.bf16.mxu0 %v5792_v48  ;;  %5733 = vmatprep.subr.bf16.mxu1 %v5732_v2  ;;  %v5742_v45 = vpack.c.bf16 %v1593_v43, %v1592_v42  ;;  %v5806_v48 = vpack.c.bf16 %v1892_v47, %v1891_v46  ;;  %v5746_v2 = vpack.c.bf16 %v1595_v17, %v1594_v55  ;;  %v2148_v42 = vld [vmem:[#allocation16 + $0x190] sm:$0xff]  ;;  %v2149_v43 = vld [vmem:[#allocation16 + $0x198] sm:$0xff]  ;;  %v1795_v55 = vld [vmem:[#allocation16 + $0xa8] sm:$0xff] }
 0x5d3   :  { %v1777_v46 = vld [vmem:[#allocation16 + $0x18] sm:$0xff]  ;;  %v5852_v49 = vpack.c.bf16 %v2149_v43, %v2148_v42  ;;  %v2150_v17 = vld [vmem:[#allocation16 + $0x1a0] sm:$0xff]  ;;  %v2140_v43 = vld [vmem:[#allocation16 + $0x150] sm:$0xff] }
 0x5d5   :  { %5795 = vmatpush3.bf16.msra.mxu0 %v5794_v5  ;;  %5735 = vmatpush3.bf16.msra.mxu1 %v5734_v20  ;;  %v5808_v5 = vpack.c.bf16 %v1910_v53, %v1909_v51  ;;  %v2147_v20 = vld [vmem:[#allocation16 + $0x188] sm:$0xff]  ;;  %v2133_v51 = vld [vmem:[#allocation16 + $0x118] sm:$0xff] }
 0x5d6   :  { %5797 = vmatprep.subr.bf16.mxu0 %v5796_v59  ;;  %5737 = vmatprep.subr.bf16.mxu1 %v5736_v28  ;;  %v1894_v59 = vld [vmem:[#allocation17 + $0x68] sm:$0xff]  ;;  %v5848_v23 = vpack.c.bf16 %v2147_v20, %v2146_v21  ;;  %v2137_v21 = vld [vmem:[#allocation16 + $0x138] sm:$0xff] }
 0x5d7   :  { %v1799_v20 = vld [vmem:[#allocation16 + $0xc8] sm:$0xff] }
 0x5d9   :  { %5799 = vmatpush3.bf16.msra.mxu0 %v5798_v24  ;;  %5739 = vmatpush3.bf16.msra.mxu1 %v5738_v33  ;;  %v1774_v33 = vld [vmem:[#allocation16] sm:$0xff] }
 0x5da   :  { %5801 = vmatprep.subr.bf16.mxu0 %v5800_v32  ;;  %5741 = vmatprep.subr.bf16.mxu1 %v5740_v40  ;;  %v1571_v32 = vrot.slane %v1566_v30, %v200_v61  ;;  %v5754_v60 = vpack.c.bf16 %v1775_v34, %v1774_v33  ;;  %v1776_v61 = vld [vmem:[#allocation16 + $0x10] sm:$0xff]  ;;  %v1801_v34 = vld [vmem:[#allocation16 + $0xd8] sm:$0xff] }
 0x5db   :  { %v5758_v53 = vpack.c.bf16 %v1777_v46, %v1776_v61  ;;  %v1800_v33 = vld [vmem:[#allocation16 + $0xd0] sm:$0xff]  ;;  %v1803_v61 = vld [vmem:[#allocation16 + $0xe8] sm:$0xff]  ;;  %v2158_v46 = vld [vmem:[#allocation16 + $0x1e0] sm:$0xff] }
 0x5dd   :  { %5803 = vmatpush3.bf16.msra.mxu0 %v5802_v36  ;;  %5743 = vmatpush3.bf16.msra.mxu1 %v5742_v45  ;;  %v2130_v36 = vld [vmem:[#allocation16 + $0x100] sm:$0xff] }
 0x5de   :  { %5805 = vmatprep.subr.bf16.mxu0 %v5804_v44  ;;  %5745 = vmatprep.subr.bf16.mxu1 %v5744_v52  ;;  %v5850_v58 = vpack.c.bf16 %v2131_v37, %v2130_v36  ;;  %v1794_v52 = vld [vmem:[#allocation16 + $0xa0] sm:$0xff]  ;;  %v2157_v36 = vld [vmem:[#allocation16 + $0x1d8] sm:$0xff] }
 0x5e1   :  { %5807 = vmatpush3.bf16.msra.mxu0 %v5806_v48  ;;  %5747 = vmatpush3.bf16.msra.mxu1 %v5746_v2  ;;  %v5756_v48 = vpack.c.bf16 %v1793_v41, %v1792_v38  ;;  %v5772_v41 = vpack.c.bf16 %v1801_v34, %v1800_v33  ;;  %v2014_v34 = vld [vmem:[#allocation19 + $0x60] sm:$0xff] }
 0x5e2   :  { %5809 = vmatprep.subr.bf16.mxu0 %v5808_v5  ;;  %v2151_v5 = vld [vmem:[#allocation16 + $0x1a8] sm:$0xff] }
 0x699   :  { %v1531_v62 = vpop.f32.mrb[8].mxu0 }
 0x69a   :  { %v7443_v4 = vadd.f32 %v6666_v3, %v1531_v62  ;;  %v1533_v6 = vpop.f32.mrb[9].mxu0  ;;  %v5810_v62 = vpack.c.bf16 %v1894_v59, %v1893_v57  ;;  %v1612_v3 = vld [vmem:[%s7935_s10 + $0xf0] sm:$0xff]  ;;  %v1779_v59 = vld [vmem:[#allocation16 + $0x28] sm:$0xff] }
 0x69b   :  { %v7448_v8 = vadd.f32 %v6667_v7, %v1533_v6  ;;  %v1613_v6 = vld [vmem:[%s7935_s10 + $0xf8] sm:$0xff]  ;;  %v1911_v7 = vld [vmem:[#allocation17 + $0xf0] sm:$0xff] }
 0x69c   :  { %4621 = vst [vmem:[#allocation20] sm:$0xff] %v7443_v4  ;;  %v1546_v10 = vmul.f32 %v7443_v4, %v7443_v4  ;;  %5811 = vmatpush3.bf16.msra.mxu0 %v5810_v62  ;;  %v2134_v62 = vld [vmem:[#allocation16 + $0x120] sm:$0xff] }
 0x69d   :  { %4622 = vst [vmem:[#allocation20 + $0x8] sm:$0xff] %v7448_v8  ;;  %v1537_v11 = vpop.f32.mrb[10].mxu0  ;;  %v1547_v63 = vmul.f32 %v7448_v8, %v7448_v8 }
 0x69e   :  { %v7459_v13 = vadd.f32 %v6668_v12, %v1537_v11  ;;  %v1539_v14 = vpop.f32.mrb[11].mxu0  ;;  %v1912_v11 = vld [vmem:[#allocation17 + $0xf8] sm:$0xff]  ;;  %v1597_v12 = vld [vmem:[%s7935_s10 + $0x78] sm:$0xff] }
 0x69f   :  { %v7464_v16 = vadd.f32 %v6669_v15, %v1539_v14  ;;  %v1550_v18 = vadd.f32 %v1547_v63, %v1546_v10  ;;  %v5748_v10 = vpack.c.bf16 %v1613_v6, %v1612_v3  ;;  %v1596_v63 = vld [vmem:[%s7935_s10 + $0x70] sm:$0xff]  ;;  %v5812_v14 = vpack.c.bf16 %v1912_v11, %v1911_v7  ;;  %v2135_v3 = vld [vmem:[#allocation16 + $0x128] sm:$0xff]  ;;  %v1796_v6 = vld [vmem:[#allocation16 + $0xb0] sm:$0xff]  ;;  %s6950_s10 = smov [#allocation20]  }
 0x6a0   :  { %4623 = vst [vmem:[#allocation20 + $0x10] sm:$0xff] %v7459_v13  ;;  %v1548_v19 = vmul.f32 %v7459_v13, %v7459_v13  ;;  %v5750_v15 = vpack.c.bf16 %v1597_v12, %v1596_v63  ;;  %v5760_v7 = vpack.c.bf16 %v1795_v55, %v1794_v52  ;;  %v1797_v11 = vld [vmem:[#allocation16 + $0xb8] sm:$0xff]  ;;  %v2152_v63 = vld [vmem:[#allocation16 + $0x1b0] sm:$0xff]  ;;  %v2142_v52 = vld [vmem:[#allocation16 + $0x160] sm:$0xff]  ;;  %s4634_s5 = sshll.u32 %s6950_s10, 4  ;;  %s4635_s5 = int_to_ptr.vmem [resolvable:$true] %s4634_s5 }
 0x6a1   :  { %4624 = vst [vmem:[#allocation20 + $0x18] sm:$0xff] %v7464_v16  ;;  %1551 = vadd.xlane.f32.xlu0 %v1550_v18  ;;  %v1549_v1 = vmul.f32 %v7464_v16, %v7464_v16  ;;  %v1895_v18 = vld [vmem:[#allocation17 + $0x70] sm:$0xff]  ;;  %5749 = vmatprep.subr.bf16.mxu1 %v5748_v10  ;;  %v5856_v10 = vpack.c.bf16 %v2151_v5, %v2150_v17  ;;  %v2153_v12 = vld [vmem:[#allocation16 + $0x1b8] sm:$0xff]  ;;  %s6868_s1 = scalar_lea.vmem %s4635_s5, 512  ;;  %p6873_p3 = scmp.lt.s32.totalorder %s4635_s5, %s4635_s5 }
 0x6a2   :  { %5813 = vmatprep.subr.bf16.mxu0 %v5812_v14  ;;  %5751 = vmatpush3.bf16.msra.mxu1 %v5750_v15  ;;  %v5858_v15 = vpack.c.bf16 %v2135_v3, %v2134_v62  ;;  %v1804_v55 = vld [vmem:[#allocation16 + $0xf0] sm:$0xff]  ;;  %v1805_v17 = vld [vmem:[#allocation16 + $0xf8] sm:$0xff]  ;;  %p6869_p2 = scmp.ne.s32.totalorder %s4635_s5, %s6868_s1  ;;  %p6874_p4 = scmp.lt.s32.totalorder %s6868_s1, %s6868_s1 }
 0x6a3   :  { %v1553_v0 = vadd.f32 %v1549_v1, %v1548_v19  ;;  %v1896_v19 = vld [vmem:[#allocation17 + $0x78] sm:$0xff]  ;;  %v2160_v5 = vld [vmem:[#allocation16 + $0x1f0] sm:$0xff]  ;;  %v5780_v3 = vpack.c.bf16 %v1805_v17, %v1804_v55  ;;  %v2030_v17 = vld [vmem:[#allocation19 + $0xe0] sm:$0xff] }
 0x6a4   :  { %v5814_v1 = vpack.c.bf16 %v1896_v19, %v1895_v18  ;;  %v1780_v18 = vld [vmem:[#allocation16 + $0x30] sm:$0xff]  ;;  %v1781_v19 = vld [vmem:[#allocation16 + $0x38] sm:$0xff]  ;;  %p6875_p5 = por %p6874_p4, %p6873_p3 }
 0x6a5   :  { %1554 = vadd.xlane.f32.xlu1 %v1553_v0  ;;  %v1790_v0 = vld [vmem:[#allocation16 + $0x80] sm:$0xff]  ;;  %v1788_v62 = vld [vmem:[#allocation16 + $0x70] sm:$0xff] }
 0x6a6   :  { %5815 = vmatpush3.bf16.msra.mxu0 %v5814_v1  ;;  %v5752_v22 = vpack.c.bf16 %v1791_v9, %v1790_v0  ;;  %v5764_v1 = vpack.c.bf16 %v1797_v11, %v1796_v6  ;;  %v5860_v0 = vpack.c.bf16 %v2153_v12, %v2152_v63  ;;  %v2136_v9 = vld [vmem:[#allocation16 + $0x130] sm:$0xff]  ;;  %v2145_v11 = vld [vmem:[#allocation16 + $0x178] sm:$0xff]  ;;  %p6876_p6 = pnand %p6875_p5, %p6869_p2 }
 0x6a7   :  { %5849 = vmatprep.subr.bf16.mxu0 %v5848_v23  ;;  %v2154_v23 = vld [vmem:[#allocation16 + $0x1c0] sm:$0xff] }
 0x6a8   :  { %5753 = vmatprep.subr.bf16.mxu1 %v5752_v22  ;;  %v1798_v22 = vld [vmem:[#allocation16 + $0xc0] sm:$0xff] }
 0x72e   :  { %v1552_v24 = vpop.xlane.xlu0 %1551 }
 0x72f   :  { %v1556_v25 = vmul.f32 0.00390625, %v1552_v24  ;;  %v2155_v24 = vld [vmem:[#allocation16 + $0x1c8] sm:$0xff] }
 0x730   :  { %v5864_v30 = vpack.c.bf16 %v2155_v24, %v2154_v23  ;;  %v2008_v23 = vld [vmem:[#allocation19 + $0x30] sm:$0xff] }
 0x731   :  { %v1558_v26 = vadd.f32 1e-06, %v1556_v25  ;;  %v5766_v25 = vpack.c.bf16 %v1781_v19, %v1780_v18  ;;  %v2002_v19 = vld [vmem:[#allocation19] sm:$0xff] }
 0x732   :  { %v1555_v27 = vpop.xlane.xlu1 %1554 }
 0x733   :  { %6586 = vrsqrt.f32 %v1558_v26  ;;  %v1557_v28 = vmul.f32 0.00390625, %v1555_v27  ;;  %v5862_v26 = vpack.c.bf16 %v2137_v21, %v2136_v9  ;;  %v1782_v27 = vld [vmem:[#allocation16 + $0x40] sm:$0xff]  ;;  %v2007_v9 = vld [vmem:[#allocation19 + $0x28] sm:$0xff]  ;;  %v2009_v21 = vld [vmem:[#allocation19 + $0x38] sm:$0xff] }
 0x735   :  { %v1559_v29 = vadd.f32 1e-06, %v1557_v28  ;;  %v1783_v28 = vld [vmem:[#allocation16 + $0x48] sm:$0xff] }
 0x736   :  { %v5770_v37 = vpack.c.bf16 %v1783_v28, %v1782_v27  ;;  %v2010_v28 = vld [vmem:[#allocation19 + $0x40] sm:$0xff] }
 0x737   :  { %6588 = vrsqrt.f32 %v1559_v29  ;;  %v5768_v29 = vpack.c.bf16 %v1799_v20, %v1798_v22  ;;  %v5820_v22 = vpack.c.bf16 %v2009_v21, %v2007_v9  ;;  %v2006_v20 = vld [vmem:[#allocation19 + $0x20] sm:$0xff] }
 0x738   :  { %v5822_v24 = vpack.c.bf16 %v2008_v23, %v2006_v20 }
 0x73d   :  { %v6587_v35 = vpop.eup %6586 }
 0x73e   :  { %v1562_v39 = vmul.f32 %v6587_v35, %v7443_v4  ;;  %v1563_v40 = vmul.f32 %v6587_v35, %v7448_v8  ;;  %v2156_v35 = vld [vmem:[#allocation16 + $0x1d0] sm:$0xff] }
 0x73f   :  { %v5868_v42 = vpack.c.bf16 %v2157_v36, %v2156_v35  ;;  %v2016_v35 = vld [vmem:[#allocation19 + $0x70] sm:$0xff] }
 0x740   :  { %v7532_v44 = vmul.f32 %v1571_v32, %v1562_v39  ;;  %v7534_v45 = vmul.f32 %v1575_v31, %v1563_v40  ;;  %v1784_v39 = vld [vmem:[#allocation16 + $0x50] sm:$0xff]  ;;  %v1785_v40 = vld [vmem:[#allocation16 + $0x58] sm:$0xff]  ;;  %v5830_v36 = vpack.c.bf16 %v2016_v35, %v2014_v34 }
 0x741   :  { %v6589_v47 = vpop.eup %6588 }
 0x742   :  { %v1564_v4 = vmul.f32 %v6589_v47, %v7459_v13  ;;  %v1565_v8 = vmul.f32 %v6589_v47, %v7464_v16  ;;  %1678 = vmatprep.mubr.f32.mxu1 %v7534_v45  ;;  %1977 = vmatprep.mubr.f32.mxu0 %v7534_v45  ;;  %v5854_v13 = vpack.c.bf16 %v2133_v51, %v2132_v50  ;;  %v1778_v16 = vld [vmem:[#allocation16 + $0x20] sm:$0xff]  ;;  %v2159_v47 = vld [vmem:[#allocation16 + $0x1e8] sm:$0xff] }
 0x743   :  { %1679 = vmatmul.mubr.f32.vlgmr.msra.gmra.mrb[24].mxu1 %v7532_v44  ;;  %1978 = vmatmul.mubr.f32.vlgmr.msra.gmra.mrb[12].mxu0 %v7532_v44  ;;  %v5762_v14 = vpack.c.bf16 %v1779_v59, %v1778_v16  ;;  %v1786_v50 = vld [vmem:[#allocation16 + $0x60] sm:$0xff]  ;;  %v1787_v51 = vld [vmem:[#allocation16 + $0x68] sm:$0xff] }
 0x744   :  { %v7542_v2 = vmul.f32 %v1571_v32, %v1564_v4  ;;  %v7544_v57 = vmul.f32 %v1575_v31, %v1565_v8  ;;  %5755 = vmatpush3.bf16.msra.mxu1 %v5754_v60  ;;  %5851 = vmatpush3.bf16.msra.mxu0 %v5850_v58  ;;  %v2138_v31 = vld [vmem:[#allocation16 + $0x140] sm:$0xff]  ;;  %v2139_v32 = vld [vmem:[#allocation16 + $0x148] sm:$0xff]  ;;  %v2141_v60 = vld [vmem:[#allocation16 + $0x158] sm:$0xff]  ;;  %v5872_v8 = vpack.c.bf16 %v2159_v47, %v2158_v46 }
 0x745   :  { %5757 = vmatprep.subr.bf16.mxu1 %v5756_v48  ;;  %5853 = vmatprep.subr.bf16.mxu0 %v5852_v49  ;;  %v5866_v38 = vpack.c.bf16 %v2139_v32, %v2138_v31  ;;  %v1802_v58 = vld [vmem:[#allocation16 + $0xe0] sm:$0xff]  ;;  %v5774_v48 = vpack.c.bf16 %v1785_v40, %v1784_v39  ;;  %v5870_v49 = vpack.c.bf16 %v2141_v60, %v2140_v43  ;;  %v2015_v31 = vld [vmem:[#allocation19 + $0x68] sm:$0xff]  ;;  %v2017_v32 = vld [vmem:[#allocation19 + $0x78] sm:$0xff] }
 0x746   :  { %1683 = vmatprep.mubr.f32.mxu1 %v7544_v57  ;;  %1982 = vmatprep.mubr.f32.mxu0 %v7544_v57  ;;  %v5776_v4 = vpack.c.bf16 %v1803_v61, %v1802_v58  ;;  %v5778_v16 = vpack.c.bf16 %v1787_v51, %v1786_v50  ;;  %v5828_v33 = vpack.c.bf16 %v2017_v32, %v2015_v31  ;;  %v2018_v40 = vld [vmem:[#allocation19 + $0x80] sm:$0xff]  ;;  %v2023_v43 = vld [vmem:[#allocation19 + $0xa8] sm:$0xff]  ;;  %v2025_v60 = vld [vmem:[#allocation19 + $0xb8] sm:$0xff] }
 0x747   :  { %1684 = vmatmul.mubr.f32.gmra.mrb[26].mxu1 %v7542_v2  ;;  %1983 = vmatmul.mubr.f32.gmra.mrb[14].mxu0 %v7542_v2  ;;  %v5836_v58 = vpack.c.bf16 %v2025_v60, %v2023_v43  ;;  %v2022_v61 = vld [vmem:[#allocation19 + $0xa0] sm:$0xff]  ;;  %v2024_v46 = vld [vmem:[#allocation19 + $0xb0] sm:$0xff]  ;;  %v2257_v60 = vld [vmem:[#allocation17 + $0x198] sm:$0xff] }
 0x748   :  { %5759 = vmatpush3.bf16.msra.mxu1 %v5758_v53  ;;  %5855 = vmatpush3.bf16.msra.mxu0 %v5854_v13  ;;  %v2143_v53 = vld [vmem:[#allocation16 + $0x168] sm:$0xff]  ;;  %v2161_v13 = vld [vmem:[#allocation16 + $0x1f8] sm:$0xff]  ;;  %v5838_v47 = vpack.c.bf16 %v2024_v46, %v2022_v61  ;;  %v2026_v51 = vld [vmem:[#allocation19 + $0xc0] sm:$0xff] }
 0x749   :  { %1870 = vmatprep.mubr.f32.mxu1 %v7534_v45  ;;  %2226 = vmatprep.mubr.f32.mxu0 %v7534_v45  ;;  %v5874_v59 = vpack.c.bf16 %v2143_v53, %v2142_v52  ;;  %v5876_v6 = vpack.c.bf16 %v2161_v13, %v2160_v5  ;;  %v2031_v52 = vld [vmem:[#allocation19 + $0xe8] sm:$0xff]  ;;  %v2033_v53 = vld [vmem:[#allocation19 + $0xf8] sm:$0xff]  ;;  %v2032_v5 = vld [vmem:[#allocation19 + $0xf0] sm:$0xff] }
 0x74a   :  { %5761 = vmatprep.subr.bf16.mxu1 %v5760_v7  ;;  %5857 = vmatprep.subr.bf16.mxu0 %v5856_v10  ;;  %v1789_v7 = vld [vmem:[#allocation16 + $0x78] sm:$0xff]  ;;  %v2144_v10 = vld [vmem:[#allocation16 + $0x170] sm:$0xff]  ;;  %v5844_v55 = vpack.c.bf16 %v2033_v53, %v2031_v52  ;;  %v5846_v13 = vpack.c.bf16 %v2032_v5, %v2030_v17  ;;  %v2242_v17 = vld [vmem:[#allocation17 + $0x120] sm:$0xff] }
 0x74b   :  { %v5782_v63 = vpack.c.bf16 %v1789_v7, %v1788_v62  ;;  %v5878_v12 = vpack.c.bf16 %v2145_v11, %v2144_v10  ;;  %v2256_v43 = vld [vmem:[#allocation17 + $0x190] sm:$0xff]  ;;  %v2243_v5 = vld [vmem:[#allocation17 + $0x128] sm:$0xff] }
 0x74c   :  { %5763 = vmatpush3.bf16.msra.mxu1 %v5762_v14  ;;  %5859 = vmatpush3.bf16.msra.mxu0 %v5858_v15  ;;  %v2003_v14 = vld [vmem:[#allocation19 + $0x8] sm:$0xff]  ;;  %v2005_v15 = vld [vmem:[#allocation19 + $0x18] sm:$0xff] }
 0x74d   :  { %5765 = vmatprep.subr.bf16.mxu1 %v5764_v1  ;;  %5861 = vmatprep.subr.bf16.mxu0 %v5860_v0  ;;  %v5816_v18 = vpack.c.bf16 %v2005_v15, %v2003_v14  ;;  %v2004_v1 = vld [vmem:[#allocation19 + $0x10] sm:$0xff] }
 0x74e   :  { %v5818_v0 = vpack.c.bf16 %v2004_v1, %v2002_v19 }
 0x750   :  { %5767 = vmatpush3.bf16.msra.mxu1 %v5766_v25  ;;  %5863 = vmatpush3.bf16.msra.mxu0 %v5862_v26  ;;  %v2011_v25 = vld [vmem:[#allocation19 + $0x48] sm:$0xff]  ;;  %v2013_v26 = vld [vmem:[#allocation19 + $0x58] sm:$0xff] }
 0x751   :  { %5769 = vmatprep.subr.bf16.mxu1 %v5768_v29  ;;  %5865 = vmatprep.subr.bf16.mxu0 %v5864_v30  ;;  %v5824_v27 = vpack.c.bf16 %v2013_v26, %v2011_v25  ;;  %v2012_v29 = vld [vmem:[#allocation19 + $0x50] sm:$0xff] }
 0x752   :  { %v5826_v30 = vpack.c.bf16 %v2012_v29, %v2010_v28 }
 0x754   :  { %5771 = vmatpush3.bf16.msra.mxu1 %v5770_v37  ;;  %5867 = vmatpush3.bf16.msra.mxu0 %v5866_v38  ;;  %v2019_v37 = vld [vmem:[#allocation19 + $0x88] sm:$0xff]  ;;  %v2021_v38 = vld [vmem:[#allocation19 + $0x98] sm:$0xff] }
 0x755   :  { %5773 = vmatprep.subr.bf16.mxu1 %v5772_v41  ;;  %5869 = vmatprep.subr.bf16.mxu0 %v5868_v42  ;;  %v5832_v39 = vpack.c.bf16 %v2021_v38, %v2019_v37  ;;  %v2020_v41 = vld [vmem:[#allocation19 + $0x90] sm:$0xff] }
 0x756   :  { %v5834_v42 = vpack.c.bf16 %v2020_v41, %v2018_v40  ;;  %v2238_v40 = vld [vmem:[#allocation17 + $0x100] sm:$0xff]  ;;  %v2239_v41 = vld [vmem:[#allocation17 + $0x108] sm:$0xff] }
 0x757   :  { %v5882_v61 = vpack.c.bf16 %v2239_v41, %v2238_v40  ;;  %v2486_v40 = vld [vmem:[#allocation16 + $0x200] sm:$0xff]  ;;  %v2487_v41 = vld [vmem:[#allocation16 + $0x208] sm:$0xff] }
 0x758   :  { %5775 = vmatpush3.bf16.msra.mxu1 %v5774_v48  ;;  %5871 = vmatpush3.bf16.msra.mxu0 %v5870_v49  ;;  %v2027_v48 = vld [vmem:[#allocation19 + $0xc8] sm:$0xff]  ;;  %v2029_v49 = vld [vmem:[#allocation19 + $0xd8] sm:$0xff] }
 0x759   :  { %5777 = vmatprep.subr.bf16.mxu1 %v5776_v4  ;;  %5873 = vmatprep.subr.bf16.mxu0 %v5872_v8  ;;  %v5840_v50 = vpack.c.bf16 %v2029_v49, %v2027_v48  ;;  %v2028_v4 = vld [vmem:[#allocation19 + $0xd0] sm:$0xff]  ;;  %v2241_v49 = vld [vmem:[#allocation17 + $0x118] sm:$0xff] }
 0x75a   :  { %v5842_v8 = vpack.c.bf16 %v2028_v4, %v2026_v51  ;;  %v2240_v48 = vld [vmem:[#allocation17 + $0x110] sm:$0xff]  ;;  %v2258_v51 = vld [vmem:[#allocation17 + $0x1a0] sm:$0xff]  ;;  %v2259_v4 = vld [vmem:[#allocation17 + $0x1a8] sm:$0xff] }
 0x75b   :  { %v5886_v52 = vpack.c.bf16 %v2241_v49, %v2240_v48  ;;  %v2507_v48 = vld [vmem:[#allocation16 + $0x2a8] sm:$0xff] }
 0x75c   :  { %5779 = vmatpush3.bf16.msra.mxu1 %v5778_v16  ;;  %5875 = vmatpush3.bf16.msra.mxu0 %v5874_v59  ;;  %v2254_v16 = vld [vmem:[#allocation17 + $0x180] sm:$0xff]  ;;  %v2255_v59 = vld [vmem:[#allocation17 + $0x188] sm:$0xff] }
 0x75d   :  { %5781 = vmatprep.subr.bf16.mxu1 %v5780_v3  ;;  %5877 = vmatprep.subr.bf16.mxu0 %v5876_v6  ;;  %v5880_v62 = vpack.c.bf16 %v2255_v59, %v2254_v16  ;;  %v2261_v16 = vld [vmem:[#allocation17 + $0x1b8] sm:$0xff]  ;;  %v5890_v59 = vpack.c.bf16 %v2243_v5, %v2242_v17  ;;  %v2492_v17 = vld [vmem:[#allocation16 + $0x230] sm:$0xff] }
 0x75e   :  { %v2493_v5 = vld [vmem:[#allocation16 + $0x238] sm:$0xff] }
 0x760   :  { %5783 = vmatpush3.bf16.msra.mxu1 %v5782_v63  ;;  %5879 = vmatpush3.bf16.msra.mxu0 %v5878_v12 }
 0x761   :  { %5817 = vmatprep.subr.bf16.mxu1 %v5816_v18 }
 0x763   :  { %1871 = vmatmul.mubr.f32.vlgmr.msra.gmra.mrb[28].mxu1 %v7532_v44  ;;  %2227 = vmatmul.mubr.f32.vlgmr.msra.gmra.mrb[16].mxu0 %v7532_v44 }
 0x764   :  { %1875 = vmatprep.mubr.f32.mxu1 %v7544_v57  ;;  %2231 = vmatprep.mubr.f32.mxu0 %v7544_v57 }
 0x765   :  { %5819 = vmatpush1.bf16.msra.mxu1 %v5818_v0 }
 0x766   :  { %5821 = vmatprep.subr.bf16.mxu1 %v5820_v22 }
 0x767   :  { %1876 = vmatmul.mubr.f32.gmra.mrb[30].mxu1 %v7542_v2  ;;  %2232 = vmatmul.mubr.f32.gmra.mrb[18].mxu0 %v7542_v2 }
 0x768   :  { %2098 = vmatprep.mubr.f32.mxu1 %v6939_v56  ;;  %2456 = vmatprep.mubr.f32.mxu0 %v6939_v56 }
 0x769   :  { %5823 = vmatpush1.bf16.msra.mxu1 %v5822_v24 }
 0x76a   :  { %5825 = vmatprep.subr.bf16.mxu1 %v5824_v27 }
 0x76d   :  { %5827 = vmatpush1.bf16.msra.mxu1 %v5826_v30 }
 0x76e   :  { %5829 = vmatprep.subr.bf16.mxu1 %v5828_v33 }
 0x771   :  { %5831 = vmatpush1.bf16.msra.mxu1 %v5830_v36 }
 0x772   :  { %5833 = vmatprep.subr.bf16.mxu1 %v5832_v39 }
 0x775   :  { %5835 = vmatpush1.bf16.msra.mxu1 %v5834_v42 }
 0x776   :  { %5837 = vmatprep.subr.bf16.mxu1 %v5836_v58 }
 0x779   :  { %5839 = vmatpush1.bf16.msra.mxu1 %v5838_v47  ;;  %v5884_v47 = vpack.c.bf16 %v2257_v60, %v2256_v43  ;;  %v2505_v43 = vld [vmem:[#allocation16 + $0x298] sm:$0xff]  ;;  %v5946_v60 = vpack.c.bf16 %v2487_v41, %v2486_v40  ;;  %v2360_v40 = vld [vmem:[#allocation19 + $0x100] sm:$0xff]  ;;  %v2362_v41 = vld [vmem:[#allocation19 + $0x110] sm:$0xff] }
 0x77a   :  { %5841 = vmatprep.subr.bf16.mxu1 %v5840_v50 }
 0x77d   :  { %5843 = vmatpush1.bf16.msra.mxu1 %v5842_v8 }
 0x77e   :  { %5845 = vmatprep.subr.bf16.mxu1 %v5844_v55  ;;  %v5888_v55 = vpack.c.bf16 %v2259_v4, %v2258_v51  ;;  %v2490_v51 = vld [vmem:[#allocation16 + $0x220] sm:$0xff]  ;;  %v2491_v4 = vld [vmem:[#allocation16 + $0x228] sm:$0xff] }
 0x781   :  { %5847 = vmatpush1.bf16.msra.mxu1 %v5846_v13  ;;  %v2260_v13 = vld [vmem:[#allocation17 + $0x1b0] sm:$0xff] }
 0x782   :  { %5881 = vmatprep.subr.bf16.mxu1 %v5880_v62  ;;  %v5892_v62 = vpack.c.bf16 %v2261_v16, %v2260_v13  ;;  %v2510_v13 = vld [vmem:[#allocation16 + $0x2c0] sm:$0xff]  ;;  %v2511_v16 = vld [vmem:[#allocation16 + $0x2c8] sm:$0xff] }
 0x816   :  { %v4874_v3 = vpop.f32.mrb[24].mxu1  ;;  %v4950_v6 = vpop.f32.mrb[12].mxu0 }
 0x817   :  { %v4875_v7 = vpop.f32.mrb[25].mxu1  ;;  %v4951_v10 = vpop.f32.mrb[13].mxu0 }
 0x818   :  { %v7560_v11 = vadd.f32 %v4875_v7, %v4874_v3  ;;  %v4952_v63 = vadd.f32 %v4951_v10, %v4950_v6  ;;  %v2244_v3 = vld [vmem:[#allocation17 + $0x130] sm:$0xff]  ;;  %v2245_v6 = vld [vmem:[#allocation17 + $0x138] sm:$0xff]  ;;  %v2262_v7 = vld [vmem:[#allocation17 + $0x1c0] sm:$0xff] }
 0x819   :  { %v2263_v10 = vld [vmem:[#allocation17 + $0x1c8] sm:$0xff] }
 0x81a   :  { %v4877_v12 = vpop.f32.mrb[26].mxu1  ;;  %v4953_v14 = vpop.f32.mrb[14].mxu0  ;;  %v1689_v15 = vsel %vm986_vm1, %v7560_v11, -inf }
 0x81b   :  { %v4878_v18 = vpop.f32.mrb[27].mxu1  ;;  %v4954_v19 = vpop.f32.mrb[15].mxu0  ;;  %1690 = vmax.xlane.f32.xlu0 %v1689_v15  ;;  %v2247_v15 = vld [vmem:[#allocation17 + $0x148] sm:$0xff] }
 0x81c   :  { %v7564_v1 = vadd.f32 %v4878_v18, %v4877_v12  ;;  %v4955_v0 = vadd.f32 %v4954_v19, %v4953_v14  ;;  %v5896_v12 = vpack.c.bf16 %v2263_v10, %v2262_v7  ;;  %v2246_v14 = vld [vmem:[#allocation17 + $0x140] sm:$0xff]  ;;  %v2264_v18 = vld [vmem:[#allocation17 + $0x1d0] sm:$0xff]  ;;  %v2265_v19 = vld [vmem:[#allocation17 + $0x1d8] sm:$0xff] }
 0x81d   :  { %v2512_v7 = vld [vmem:[#allocation16 + $0x2d0] sm:$0xff]  ;;  %v2513_v10 = vld [vmem:[#allocation16 + $0x2d8] sm:$0xff] }
 0x81e   :  { %v1692_v9 = vsel %vm986_vm1, %v7564_v1, -inf }
 0x81f   :  { %1693 = vmax.xlane.f32.xlu1 %v1692_v9  ;;  %v5900_v9 = vpack.c.bf16 %v2265_v19, %v2264_v18  ;;  %v2514_v18 = vld [vmem:[#allocation16 + $0x2e0] sm:$0xff]  ;;  %v2515_v19 = vld [vmem:[#allocation16 + $0x2e8] sm:$0xff] }
 0x836   :  { %v4912_v21 = vpop.f32.mrb[28].mxu1  ;;  %v4988_v22 = vpop.f32.mrb[16].mxu0 }
 0x837   :  { %v4913_v20 = vpop.f32.mrb[29].mxu1  ;;  %v4989_v23 = vpop.f32.mrb[17].mxu0 }
 0x838   :  { %v4914_v24 = vadd.f32 %v4913_v20, %v4912_v21  ;;  %v7568_v25 = vadd.f32 %v4989_v23, %v4988_v22  ;;  %v2248_v21 = vld [vmem:[#allocation17 + $0x150] sm:$0xff]  ;;  %v2249_v22 = vld [vmem:[#allocation17 + $0x158] sm:$0xff]  ;;  %v2266_v20 = vld [vmem:[#allocation17 + $0x1e0] sm:$0xff] }
 0x839   :  { %v2267_v23 = vld [vmem:[#allocation17 + $0x1e8] sm:$0xff] }
 0x83a   :  { %v1988_v26 = vsub.f32 0.0, %v4914_v24  ;;  %v4915_v27 = vpop.f32.mrb[30].mxu1  ;;  %v4991_v28 = vpop.f32.mrb[18].mxu0 }
 0x83b   :  { %v4916_v29 = vpop.f32.mrb[31].mxu1  ;;  %v4992_v30 = vpop.f32.mrb[19].mxu0 }
 0x83c   :  { %v1990_v31 = vmul.f32 1.442695, %v1988_v26  ;;  %v4917_v32 = vadd.f32 %v4916_v29, %v4915_v27  ;;  %v7570_v33 = vadd.f32 %v4992_v30, %v4991_v28  ;;  %v5904_v26 = vpack.c.bf16 %v2267_v23, %v2266_v20  ;;  %v2250_v27 = vld [vmem:[#allocation17 + $0x160] sm:$0xff]  ;;  %v2251_v28 = vld [vmem:[#allocation17 + $0x168] sm:$0xff]  ;;  %v2268_v29 = vld [vmem:[#allocation17 + $0x1f0] sm:$0xff] }
 0x83d   :  { %v2269_v30 = vld [vmem:[#allocation17 + $0x1f8] sm:$0xff]  ;;  %v2516_v20 = vld [vmem:[#allocation16 + $0x2f0] sm:$0xff] }
 0x83e   :  { %6590 = vpow2.f32 %v1990_v31  ;;  %v1989_v34 = vsub.f32 0.0, %v4917_v32  ;;  %v5906_v31 = vpack.c.bf16 %v2251_v28, %v2250_v27  ;;  %v2517_v23 = vld [vmem:[#allocation16 + $0x2f8] sm:$0xff]  ;;  %v2500_v27 = vld [vmem:[#allocation16 + $0x270] sm:$0xff] }
 0x83f   :  { %v2501_v28 = vld [vmem:[#allocation16 + $0x278] sm:$0xff] }
 0x840   :  { %v1992_v35 = vmul.f32 1.442695, %v1989_v34  ;;  %v2252_v34 = vld [vmem:[#allocation17 + $0x170] sm:$0xff] }
 0x842   :  { %6592 = vpow2.f32 %v1992_v35  ;;  %v2253_v35 = vld [vmem:[#allocation17 + $0x178] sm:$0xff] }
 0x848   :  { %v6591_v36 = vpop.eup %6590 }
 0x849   :  { %v1994_v37 = vadd.f32 1.0, %v6591_v36  ;;  %v2502_v36 = vld [vmem:[#allocation16 + $0x280] sm:$0xff] }
 0x84b   :  { %6594 = vrcp.f32 %v1994_v37  ;;  %v2503_v37 = vld [vmem:[#allocation16 + $0x288] sm:$0xff] }
 0x84c   :  { %v6593_v38 = vpop.eup %6592 }
 0x84d   :  { %v1995_v39 = vadd.f32 1.0, %v6593_v38  ;;  %v5910_v38 = vpack.c.bf16 %v2253_v35, %v2252_v34 }
 0x84f   :  { %6596 = vrcp.f32 %v1995_v39  ;;  %v5944_v39 = vpack.c.bf16 %v2503_v37, %v2502_v36  ;;  %v2361_v37 = vld [vmem:[#allocation19 + $0x108] sm:$0xff] }
 0x855   :  { %v6595_v42 = vpop.eup %6594 }
 0x856   :  { %v1998_v58 = vmul.f32 %v6595_v42, %v4914_v24  ;;  %v5902_v24 = vpack.c.bf16 %v2249_v22, %v2248_v21  ;;  %v2504_v42 = vld [vmem:[#allocation16 + $0x290] sm:$0xff]  ;;  %v2498_v21 = vld [vmem:[#allocation16 + $0x260] sm:$0xff]  ;;  %v2499_v22 = vld [vmem:[#allocation16 + $0x268] sm:$0xff] }
 0x858   :  { %v2000_v46 = vmul.f32 %v4952_v63, %v1998_v58  ;;  %v5894_v63 = vpack.c.bf16 %v2245_v6, %v2244_v3  ;;  %v5948_v58 = vpack.c.bf16 %v2505_v43, %v2504_v42  ;;  %v2494_v3 = vld [vmem:[#allocation16 + $0x240] sm:$0xff]  ;;  %v2495_v6 = vld [vmem:[#allocation16 + $0x248] sm:$0xff]  ;;  %v5914_v42 = vpack.c.bf16 %v2362_v41, %v2360_v40 }
 0x859   :  { %v6597_v50 = vpop.eup %6596  ;;  %v2365_v43 = vld [vmem:[#allocation19 + $0x128] sm:$0xff] }
 0x85a   :  { %v1999_v8 = vmul.f32 %v6597_v50, %v4917_v32  ;;  %2099 = vmatmul.mubr.f32.vlgmr.msra.gmra.mrb[32].mxu1 %v2000_v46  ;;  %v5908_v32 = vpack.c.bf16 %v2269_v30, %v2268_v29  ;;  %v2489_v46 = vld [vmem:[#allocation16 + $0x218] sm:$0xff]  ;;  %v5974_v29 = vpack.c.bf16 %v2501_v28, %v2500_v27 }
 0x85b   :  { %5883 = vmatpush3.bf16.msra.mxu1 %v5882_v61  ;;  %2104 = vmatprep.mubr.f32.mxu1 %v6939_v56  ;;  %v2488_v61 = vld [vmem:[#allocation16 + $0x210] sm:$0xff]  ;;  %v2391_v27 = vld [vmem:[#allocation19 + $0x1f8] sm:$0xff] }
 0x85c   :  { %5885 = vmatprep.subr.bf16.mxu1 %v5884_v47  ;;  %v2001_v53 = vmul.f32 %v4955_v0, %v1999_v8  ;;  %v5898_v0 = vpack.c.bf16 %v2247_v15, %v2246_v14  ;;  %v2506_v47 = vld [vmem:[#allocation16 + $0x2a0] sm:$0xff]  ;;  %v5950_v49 = vpack.c.bf16 %v2489_v46, %v2488_v61  ;;  %v2508_v8 = vld [vmem:[#allocation16 + $0x2b0] sm:$0xff]  ;;  %v2497_v15 = vld [vmem:[#allocation16 + $0x258] sm:$0xff] }
 0x85d   :  { %v5952_v50 = vpack.c.bf16 %v2507_v48, %v2506_v47  ;;  %v2496_v14 = vld [vmem:[#allocation16 + $0x250] sm:$0xff]  ;;  %v2369_v46 = vld [vmem:[#allocation19 + $0x148] sm:$0xff]  ;;  %v2371_v47 = vld [vmem:[#allocation19 + $0x158] sm:$0xff] }
 0x85e   :  { %2105 = vmatmul.mubr.f32.gmra.mrb[34].mxu1 %v2001_v53  ;;  %v5954_v53 = vpack.c.bf16 %v2491_v4, %v2490_v51  ;;  %v2373_v51 = vld [vmem:[#allocation19 + $0x168] sm:$0xff]  ;;  %v2375_v4 = vld [vmem:[#allocation19 + $0x178] sm:$0xff] }
 0x85f   :  { %5887 = vmatpush3.bf16.msra.mxu1 %v5886_v52  ;;  %2334 = vmatprep.mubr.f32.mxu1 %v7534_v45  ;;  %v2509_v52 = vld [vmem:[#allocation16 + $0x2b8] sm:$0xff] }
 0x860   :  { %5889 = vmatprep.subr.bf16.mxu1 %v5888_v55  ;;  %v5956_v55 = vpack.c.bf16 %v2509_v52, %v2508_v8 }
 0x863   :  { %5891 = vmatpush3.bf16.msra.mxu1 %v5890_v59  ;;  %v5958_v59 = vpack.c.bf16 %v2493_v5, %v2492_v17  ;;  %v2372_v17 = vld [vmem:[#allocation19 + $0x160] sm:$0xff]  ;;  %v2374_v5 = vld [vmem:[#allocation19 + $0x170] sm:$0xff] }
 0x864   :  { %5893 = vmatprep.subr.bf16.mxu1 %v5892_v62  ;;  %v5960_v62 = vpack.c.bf16 %v2511_v16, %v2510_v13  ;;  %v2377_v13 = vld [vmem:[#allocation19 + $0x188] sm:$0xff]  ;;  %v2379_v16 = vld [vmem:[#allocation19 + $0x198] sm:$0xff] }
 0x867   :  { %5895 = vmatpush3.bf16.msra.mxu1 %v5894_v63  ;;  %v5962_v63 = vpack.c.bf16 %v2495_v6, %v2494_v3  ;;  %v5928_v6 = vpack.c.bf16 %v2379_v16, %v2377_v13 }
 0x868   :  { %5897 = vmatprep.subr.bf16.mxu1 %v5896_v12  ;;  %v5964_v12 = vpack.c.bf16 %v2513_v10, %v2512_v7  ;;  %v2376_v7 = vld [vmem:[#allocation19 + $0x180] sm:$0xff]  ;;  %v2378_v10 = vld [vmem:[#allocation19 + $0x190] sm:$0xff] }
 0x86b   :  { %5899 = vmatpush3.bf16.msra.mxu1 %v5898_v0  ;;  %v5966_v0 = vpack.c.bf16 %v2497_v15, %v2496_v14  ;;  %v5930_v14 = vpack.c.bf16 %v2378_v10, %v2376_v7  ;;  %v2597_v7 = vld [vmem:[#allocation17 + $0x218] sm:$0xff] }
 0x86c   :  { %5901 = vmatprep.subr.bf16.mxu1 %v5900_v9  ;;  %v5968_v9 = vpack.c.bf16 %v2515_v19, %v2514_v18  ;;  %v2380_v18 = vld [vmem:[#allocation19 + $0x1a0] sm:$0xff]  ;;  %v2382_v19 = vld [vmem:[#allocation19 + $0x1b0] sm:$0xff] }
 0x86f   :  { %5903 = vmatpush3.bf16.msra.mxu1 %v5902_v24  ;;  %v5970_v24 = vpack.c.bf16 %v2499_v22, %v2498_v21  ;;  %v2387_v21 = vld [vmem:[#allocation19 + $0x1d8] sm:$0xff]  ;;  %v2384_v22 = vld [vmem:[#allocation19 + $0x1c0] sm:$0xff] }
 0x870   :  { %5905 = vmatprep.subr.bf16.mxu1 %v5904_v26  ;;  %v5972_v26 = vpack.c.bf16 %v2517_v23, %v2516_v20  ;;  %v2386_v23 = vld [vmem:[#allocation19 + $0x1d0] sm:$0xff] }
 0x873   :  { %5907 = vmatpush3.bf16.msra.mxu1 %v5906_v31 }
 0x874   :  { %5909 = vmatprep.subr.bf16.mxu1 %v5908_v32 }
 0x877   :  { %5911 = vmatpush3.bf16.msra.mxu1 %v5910_v38  ;;  %v2363_v38 = vld [vmem:[#allocation19 + $0x118] sm:$0xff] }
 0x878   :  { %5945 = vmatprep.subr.bf16.mxu1 %v5944_v39  ;;  %v5912_v39 = vpack.c.bf16 %v2363_v38, %v2361_v37  ;;  %v2346_v38 = vsub.f32 0.0, %v7570_v33 }
 0x87a   :  { %2335 = vmatmul.mubr.f32.vlgmr.msra.gmra.mrb[36].mxu1 %v7532_v44  ;;  %5913 = vmatprep.subr.bf16.mxu0 %v5912_v39  ;;  %v2349_v41 = vmul.f32 1.442695, %v2346_v38 }
 0x87b   :  { %2339 = vmatprep.mubr.f32.mxu1 %v7544_v57  ;;  %5947 = vmatpush3.bf16.msra.mxu1 %v5946_v60  ;;  %v2367_v60 = vld [vmem:[#allocation19 + $0x138] sm:$0xff] }
 0x87c   :  { %5949 = vmatprep.subr.bf16.mxu1 %v5948_v58  ;;  %v2364_v58 = vld [vmem:[#allocation19 + $0x120] sm:$0xff]  ;;  %5915 = vmatpush1.bf16.msra.mxu0 %v5914_v42  ;;  %v5916_v61 = vpack.c.bf16 %v2367_v60, %v2365_v43 }
 0x87e   :  { %2340 = vmatmul.mubr.f32.gmra.mrb[38].mxu1 %v7542_v2  ;;  %5917 = vmatprep.subr.bf16.mxu0 %v5916_v61 }
 0x87f   :  { %5951 = vmatpush3.bf16.msra.mxu1 %v5950_v49  ;;  %2582 = vmatprep.mubr.f32.mxu1 %v7534_v45  ;;  %v5920_v49 = vpack.c.bf16 %v2371_v47, %v2369_v46 }
 0x880   :  { %5953 = vmatprep.subr.bf16.mxu1 %v5952_v50  ;;  %v2370_v50 = vld [vmem:[#allocation19 + $0x150] sm:$0xff] }
 0x883   :  { %5955 = vmatpush3.bf16.msra.mxu1 %v5954_v53 }
 0x884   :  { %5957 = vmatprep.subr.bf16.mxu1 %v5956_v55  ;;  %v5924_v55 = vpack.c.bf16 %v2375_v4, %v2373_v51  ;;  %v2612_v4 = vld [vmem:[#allocation17 + $0x290] sm:$0xff] }
 0x887   :  { %5959 = vmatpush3.bf16.msra.mxu1 %v5958_v59 }
 0x888   :  { %5961 = vmatprep.subr.bf16.mxu1 %v5960_v62  ;;  %v5926_v62 = vpack.c.bf16 %v2374_v5, %v2372_v17 }
 0x88b   :  { %5963 = vmatpush3.bf16.msra.mxu1 %v5962_v63  ;;  %v2381_v63 = vld [vmem:[#allocation19 + $0x1a8] sm:$0xff] }
 0x88c   :  { %5965 = vmatprep.subr.bf16.mxu1 %v5964_v12  ;;  %v2383_v12 = vld [vmem:[#allocation19 + $0x1b8] sm:$0xff] }
 0x88d   :  { %v5932_v15 = vpack.c.bf16 %v2383_v12, %v2381_v63  ;;  %v2614_v12 = vld [vmem:[#allocation17 + $0x2a0] sm:$0xff] }
 0x88f   :  { %5967 = vmatpush3.bf16.msra.mxu1 %v5966_v0  ;;  %v5934_v0 = vpack.c.bf16 %v2382_v19, %v2380_v18 }
 0x890   :  { %5969 = vmatprep.subr.bf16.mxu1 %v5968_v9  ;;  %v2385_v9 = vld [vmem:[#allocation19 + $0x1c8] sm:$0xff] }
 0x891   :  { %v5936_v20 = vpack.c.bf16 %v2387_v21, %v2385_v9 }
 0x893   :  { %5971 = vmatpush3.bf16.msra.mxu1 %v5970_v24  ;;  %v5938_v24 = vpack.c.bf16 %v2386_v23, %v2384_v22  ;;  %v2599_v22 = vld [vmem:[#allocation17 + $0x228] sm:$0xff]  ;;  %v2617_v23 = vld [vmem:[#allocation17 + $0x2b8] sm:$0xff] }
 0x894   :  { %5973 = vmatprep.subr.bf16.mxu1 %v5972_v26  ;;  %v2389_v26 = vld [vmem:[#allocation19 + $0x1e8] sm:$0xff] }
 0x895   :  { %v5940_v28 = vpack.c.bf16 %v2391_v27, %v2389_v26 }
 0x897   :  { %5975 = vmatpush3.bf16.msra.mxu1 %v5974_v29  ;;  %v2388_v29 = vld [vmem:[#allocation19 + $0x1e0] sm:$0xff] }
 0x89a   :  { %2583 = vmatmul.mubr.f32.vlgmr.msra.gmra.mrb[40].mxu1 %v7532_v44 }
 0x89b   :  { %2587 = vmatprep.mubr.f32.mxu1 %v7544_v57 }
 0x89e   :  { %2588 = vmatmul.mubr.f32.gmra.mrb[42].mxu1 %v7542_v2 }
 0x89f   :  { %2812 = vmatprep.mubr.f32.mxu1 %v6939_v56 }
 0x8a8   :  { %v1691_v30 = vpop.xlane.xlu0 %1690 }
 0x8a9   :  { %v1695_v31 = vsub.f32 %v7560_v11, %v1691_v30  ;;  %v2366_v11 = vld [vmem:[#allocation19 + $0x130] sm:$0xff] }
 0x8aa   :  { %v5918_v48 = vpack.c.bf16 %v2366_v11, %v2364_v58  ;;  %v2390_v30 = vld [vmem:[#allocation19 + $0x1f0] sm:$0xff] }
 0x8ab   :  { %v1697_v32 = vmul.f32 1.442695, %v1695_v31  ;;  %v5942_v31 = vpack.c.bf16 %v2390_v30, %v2388_v29  ;;  %v2601_v29 = vld [vmem:[#allocation17 + $0x238] sm:$0xff]  ;;  %v2618_v30 = vld [vmem:[#allocation17 + $0x2c0] sm:$0xff] }
 0x8ac   :  { %v1694_v34 = vpop.xlane.xlu1 %1693  ;;  %5919 = vmatpush1.bf16.msra.mxu0 %v5918_v48 }
 0x8ad   :  { %6598 = vpow2.f32 %v1697_v32  ;;  %v1696_v35 = vsub.f32 %v7564_v1, %v1694_v34  ;;  %v2368_v1 = vld [vmem:[#allocation19 + $0x140] sm:$0xff]  ;;  %5921 = vmatprep.subr.bf16.mxu0 %v5920_v49  ;;  %v2611_v34 = vld [vmem:[#allocation17 + $0x288] sm:$0xff] }
 0x8ae   :  { %v5922_v52 = vpack.c.bf16 %v2370_v50, %v2368_v1  ;;  %v2610_v32 = vld [vmem:[#allocation17 + $0x280] sm:$0xff]  ;;  %v2595_v50 = vld [vmem:[#allocation17 + $0x208] sm:$0xff] }
 0x8af   :  { %v1699_v36 = vmul.f32 1.442695, %v1696_v35  ;;  %v5976_v35 = vpack.c.bf16 %v2611_v34, %v2610_v32  ;;  %v2594_v1 = vld [vmem:[#allocation17 + $0x200] sm:$0xff] }
 0x8b0   :  { %5923 = vmatpush1.bf16.msra.mxu0 %v5922_v52  ;;  %v2613_v52 = vld [vmem:[#allocation17 + $0x298] sm:$0xff]  ;;  %v5978_v5 = vpack.c.bf16 %v2595_v50, %v2594_v1  ;;  %v2602_v34 = vld [vmem:[#allocation17 + $0x240] sm:$0xff]  ;;  %v2624_v1 = vld [vmem:[#allocation17 + $0x2f0] sm:$0xff] }
 0x8b1   :  { %6600 = vpow2.f32 %v1699_v36  ;;  %5925 = vmatprep.subr.bf16.mxu0 %v5924_v55  ;;  %v2345_v36 = vsub.f32 0.0, %v7568_v25  ;;  %v2625_v50 = vld [vmem:[#allocation17 + $0x2f8] sm:$0xff] }
 0x8b3   :  { %v2347_v37 = vmul.f32 1.442695, %v2345_v36  ;;  %v2620_v36 = vld [vmem:[#allocation17 + $0x2d0] sm:$0xff] }
 0x8b4   :  { %5927 = vmatpush1.bf16.msra.mxu0 %v5926_v62 }
 0x8b5   :  { %5929 = vmatprep.subr.bf16.mxu0 %v5928_v6  ;;  %6602 = vpow2.f32 %v2347_v37  ;;  %v2596_v6 = vld [vmem:[#allocation17 + $0x210] sm:$0xff]  ;;  %v2621_v37 = vld [vmem:[#allocation17 + $0x2d8] sm:$0xff] }
 0x8b6   :  { %6604 = vpow2.f32 %v2349_v41  ;;  %v5996_v41 = vpack.c.bf16 %v2621_v37, %v2620_v36  ;;  %v2850_v36 = vld [vmem:[#allocation16 + $0x340] sm:$0xff]  ;;  %v2851_v37 = vld [vmem:[#allocation16 + $0x348] sm:$0xff] }
 0x8b7   :  { %v7584_v8 = vpop.eup %6598 }
 0x8b8   :  { %v1701_v53 = vsel %vm986_vm1, %v7584_v8, 0.0  ;;  %5931 = vmatpush1.bf16.msra.mxu0 %v5930_v14  ;;  %v2615_v14 = vld [vmem:[#allocation17 + $0x2a8] sm:$0xff] }
 0x8b9   :  { %1702 = vadd.xlane.f32.xlu0 %v1701_v53  ;;  %5933 = vmatprep.subr.bf16.mxu0 %v5932_v15  ;;  %v5984_v21 = vpack.c.bf16 %v2615_v14, %v2614_v12 }
 0x8bb   :  { %v7588_v59 = vpop.eup %6600 }
 0x8bc   :  { %v1704_v3 = vsel %vm986_vm1, %v7588_v59, 0.0  ;;  %5935 = vmatpush1.bf16.msra.mxu0 %v5934_v0 }
 0x8bd   :  { %1705 = vadd.xlane.f32.xlu1 %v1704_v3  ;;  %5937 = vmatprep.subr.bf16.mxu0 %v5936_v20  ;;  %v5980_v3 = vpack.c.bf16 %v2613_v52, %v2612_v4  ;;  %v6004_v4 = vpack.c.bf16 %v2625_v50, %v2624_v1  ;;  %v2608_v52 = vld [vmem:[#allocation17 + $0x270] sm:$0xff]  ;;  %v2854_v1 = vld [vmem:[#allocation16 + $0x360] sm:$0xff]  ;;  %v2855_v50 = vld [vmem:[#allocation16 + $0x368] sm:$0xff] }
 0x8bf   :  { %v6603_v60 = vpop.eup %6602 }
 0x8c0   :  { %5939 = vmatpush1.bf16.msra.mxu0 %v5938_v24  ;;  %v2351_v58 = vadd.f32 1.0, %v6603_v60  ;;  %v6605_v61 = vpop.eup %6604  ;;  %v2604_v60 = vld [vmem:[#allocation17 + $0x250] sm:$0xff] }
 0x8c1   :  { %5941 = vmatprep.subr.bf16.mxu0 %v5940_v28  ;;  %v2352_v11 = vadd.f32 1.0, %v6605_v61  ;;  %v2600_v28 = vld [vmem:[#allocation17 + $0x230] sm:$0xff]  ;;  %v2622_v61 = vld [vmem:[#allocation17 + $0x2e0] sm:$0xff] }
 0x8c2   :  { %6606 = vrcp.f32 %v2351_v58  ;;  %v2605_v58 = vld [vmem:[#allocation17 + $0x258] sm:$0xff] }
 0x8c3   :  { %6608 = vrcp.f32 %v2352_v11  ;;  %v2623_v11 = vld [vmem:[#allocation17 + $0x2e8] sm:$0xff] }
 0x8c4   :  { %5943 = vmatpush1.bf16.msra.mxu0 %v5942_v31  ;;  %v2619_v31 = vld [vmem:[#allocation17 + $0x2c8] sm:$0xff] }
 0x8c5   :  { %5977 = vmatprep.subr.bf16.mxu0 %v5976_v35  ;;  %v5992_v32 = vpack.c.bf16 %v2619_v31, %v2618_v30  ;;  %v2603_v35 = vld [vmem:[#allocation17 + $0x248] sm:$0xff]  ;;  %v2848_v30 = vld [vmem:[#allocation16 + $0x330] sm:$0xff]  ;;  %v2849_v31 = vld [vmem:[#allocation16 + $0x338] sm:$0xff] }
 0x8c6   :  { %v5994_v38 = vpack.c.bf16 %v2603_v35, %v2602_v34  ;;  %v6054_v34 = vpack.c.bf16 %v2849_v31, %v2848_v30  ;;  %v2733_v30 = vld [vmem:[#allocation19 + $0x288] sm:$0xff]  ;;  %v2735_v31 = vld [vmem:[#allocation19 + $0x298] sm:$0xff] }
 0x8cc   :  { %v6607_v48 = vpop.eup %6606 }
 0x8cd   :  { %v2355_v53 = vmul.f32 %v6607_v48, %v7568_v25  ;;  %v6609_v17 = vpop.eup %6608  ;;  %v5982_v25 = vpack.c.bf16 %v2597_v7, %v2596_v6  ;;  %v2606_v48 = vld [vmem:[#allocation17 + $0x260] sm:$0xff]  ;;  %v2860_v7 = vld [vmem:[#allocation16 + $0x390] sm:$0xff] }
 0x8ce   :  { %v2356_v15 = vmul.f32 %v6609_v17, %v7570_v33  ;;  %v2616_v33 = vld [vmem:[#allocation17 + $0x2b0] sm:$0xff]  ;;  %v2859_v17 = vld [vmem:[#allocation16 + $0x388] sm:$0xff] }
 0x8cf   :  { %v5988_v27 = vpack.c.bf16 %v2617_v23, %v2616_v33  ;;  %v2846_v23 = vld [vmem:[#allocation16 + $0x320] sm:$0xff] }
 0x92d   :  { %v7594_v39 = vpop.f32.mrb[32].mxu1 }
 0x92e   :  { %v7596_v40 = vpop.f32.mrb[33].mxu1 }
 0x931   :  { %v7598_v42 = vpop.f32.mrb[34].mxu1 }
 0x932   :  { %v7600_v43 = vpop.f32.mrb[35].mxu1 }
 0x946   :  { %v1703_v46 = vpop.xlane.xlu0 %1702 }
 0x947   :  { %6610 = vrcp.f32 %v1703_v46  ;;  %v5998_v46 = vpack.c.bf16 %v2605_v58, %v2604_v60  ;;  %v6058_v60 = vpack.c.bf16 %v2851_v37, %v2850_v36  ;;  %v2737_v36 = vld [vmem:[#allocation19 + $0x2a8] sm:$0xff]  ;;  %v2739_v37 = vld [vmem:[#allocation19 + $0x2b8] sm:$0xff] }
 0x94a   :  { %v1706_v47 = vpop.xlane.xlu1 %1705 }
 0x94b   :  { %6612 = vrcp.f32 %v1706_v47  ;;  %v6000_v47 = vpack.c.bf16 %v2623_v11, %v2622_v61  ;;  %v2852_v61 = vld [vmem:[#allocation16 + $0x350] sm:$0xff]  ;;  %v2853_v11 = vld [vmem:[#allocation16 + $0x358] sm:$0xff] }
 0x94d   :  { %v5026_v49 = vpop.f32.mrb[36].mxu1 }
 0x94e   :  { %v5027_v51 = vpop.f32.mrb[37].mxu1 }
 0x94f   :  { %v5028_v55 = vadd.f32 %v5027_v51, %v5026_v49  ;;  %v2607_v49 = vld [vmem:[#allocation17 + $0x268] sm:$0xff] }
 0x950   :  { %v6002_v51 = vpack.c.bf16 %v2607_v49, %v2606_v48  ;;  %v6062_v48 = vpack.c.bf16 %v2853_v11, %v2852_v61  ;;  %v2741_v61 = vld [vmem:[#allocation19 + $0x2c8] sm:$0xff]  ;;  %v2743_v11 = vld [vmem:[#allocation19 + $0x2d8] sm:$0xff] }
 0x951   :  { %v6611_v13 = vpop.eup %6610  ;;  %v2357_v16 = vmul.f32 %v5028_v55, %v2355_v53  ;;  %v5029_v62 = vpop.f32.mrb[38].mxu1  ;;  %v2609_v53 = vld [vmem:[#allocation17 + $0x278] sm:$0xff]  ;;  %v2858_v55 = vld [vmem:[#allocation16 + $0x380] sm:$0xff] }
 0x952   :  { %v5030_v10 = vpop.f32.mrb[39].mxu1  ;;  %v7604_v63 = vmul.f32 %v6611_v13, %v7584_v8  ;;  %v2598_v8 = vld [vmem:[#allocation17 + $0x220] sm:$0xff] }
 0x953   :  { %v5031_v18 = vadd.f32 %v5030_v10, %v5029_v62  ;;  %2457 = vmatmul.mubr.f32.vlgmr.msra.gmra.mrb[20].mxu0 %v2357_v16  ;;  %v5986_v24 = vpack.c.bf16 %v2599_v22, %v2598_v8  ;;  %v6040_v16 = vpack.c.bf16 %v2859_v17, %v2858_v55  ;;  %v2842_v62 = vld [vmem:[#allocation16 + $0x300] sm:$0xff]  ;;  %v2861_v10 = vld [vmem:[#allocation16 + $0x398] sm:$0xff]  ;;  %v2856_v55 = vld [vmem:[#allocation16 + $0x370] sm:$0xff] }
 0x954   :  { %5979 = vmatpush3.bf16.msra.mxu0 %v5978_v5  ;;  %2462 = vmatprep.mubr.f32.mxu0 %v6939_v56  ;;  %v1714_v19 = vsel %vm986_vm1, %v7604_v63, -inf  ;;  %v6006_v5 = vpack.c.bf16 %v2609_v53, %v2608_v52  ;;  %v6066_v52 = vpack.c.bf16 %v2855_v50, %v2854_v1  ;;  %v2857_v17 = vld [vmem:[#allocation16 + $0x378] sm:$0xff]  ;;  %v2745_v50 = vld [vmem:[#allocation19 + $0x2e8] sm:$0xff] }
 0x955   :  { %v6613_v0 = vpop.eup %6612  ;;  %v2358_v9 = vmul.f32 %v5031_v18, %v2356_v15  ;;  %5981 = vmatprep.subr.bf16.mxu0 %v5980_v3  ;;  %1715 = vmax.xlane.f32.xlu0 %v1714_v19  ;;  %v2843_v3 = vld [vmem:[#allocation16 + $0x308] sm:$0xff]  ;;  %v6044_v18 = vpack.c.bf16 %v2861_v10, %v2860_v7  ;;  %v2845_v19 = vld [vmem:[#allocation16 + $0x318] sm:$0xff] }
 0x956   :  { %v7611_v20 = vmul.f32 %v6613_v0, %v7588_v59  ;;  %v5990_v59 = vpack.c.bf16 %v2601_v29, %v2600_v28  ;;  %v6042_v14 = vpack.c.bf16 %v2843_v3, %v2842_v62  ;;  %v2716_v3 = vld [vmem:[#allocation19 + $0x200] sm:$0xff]  ;;  %v2721_v10 = vld [vmem:[#allocation19 + $0x228] sm:$0xff] }
 0x957   :  { %2463 = vmatmul.mubr.f32.gmra.mrb[22].mxu0 %v2358_v9  ;;  %v2862_v9 = vld [vmem:[#allocation16 + $0x3a0] sm:$0xff] }
 0x958   :  { %5983 = vmatpush3.bf16.msra.mxu0 %v5982_v25  ;;  %2690 = vmatprep.mubr.f32.mxu0 %v7534_v45  ;;  %v1717_v26 = vsel %vm986_vm1, %v7611_v20, -inf  ;;  %v2844_v25 = vld [vmem:[#allocation16 + $0x310] sm:$0xff] }
 0x959   :  { %5985 = vmatprep.subr.bf16.mxu0 %v5984_v21  ;;  %1718 = vmax.xlane.f32.xlu1 %v1717_v26  ;;  %v2863_v21 = vld [vmem:[#allocation16 + $0x3a8] sm:$0xff]  ;;  %v6046_v22 = vpack.c.bf16 %v2845_v19, %v2844_v25  ;;  %v2864_v26 = vld [vmem:[#allocation16 + $0x3b0] sm:$0xff] }
 0x95a   :  { %v6048_v33 = vpack.c.bf16 %v2863_v21, %v2862_v9  ;;  %v2722_v25 = vld [vmem:[#allocation19 + $0x230] sm:$0xff]  ;;  %v2725_v19 = vld [vmem:[#allocation19 + $0x248] sm:$0xff] }
 0x95c   :  { %5987 = vmatpush3.bf16.msra.mxu0 %v5986_v24  ;;  %v2847_v24 = vld [vmem:[#allocation16 + $0x328] sm:$0xff] }
 0x95d   :  { %5989 = vmatprep.subr.bf16.mxu0 %v5988_v27  ;;  %v2865_v27 = vld [vmem:[#allocation16 + $0x3b8] sm:$0xff]  ;;  %v6050_v28 = vpack.c.bf16 %v2847_v24, %v2846_v23  ;;  %v2729_v23 = vld [vmem:[#allocation19 + $0x268] sm:$0xff] }
 0x95e   :  { %v6052_v29 = vpack.c.bf16 %v2865_v27, %v2864_v26  ;;  %v2731_v24 = vld [vmem:[#allocation19 + $0x278] sm:$0xff] }
 0x95f   :  { %v6020_v27 = vpack.c.bf16 %v2731_v24, %v2729_v23 }
 0x960   :  { %5991 = vmatpush3.bf16.msra.mxu0 %v5990_v59  ;;  %v2866_v59 = vld [vmem:[#allocation16 + $0x3c0] sm:$0xff] }
 0x961   :  { %5993 = vmatprep.subr.bf16.mxu0 %v5992_v32  ;;  %v2867_v32 = vld [vmem:[#allocation16 + $0x3c8] sm:$0xff] }
 0x962   :  { %v6056_v35 = vpack.c.bf16 %v2867_v32, %v2866_v59  ;;  %v6024_v32 = vpack.c.bf16 %v2735_v31, %v2733_v30  ;;  %v2951_v30 = vld [vmem:[#allocation17 + $0x308] sm:$0xff] }
 0x964   :  { %5995 = vmatpush3.bf16.msra.mxu0 %v5994_v38  ;;  %v2868_v38 = vld [vmem:[#allocation16 + $0x3d0] sm:$0xff] }
 0x965   :  { %5997 = vmatprep.subr.bf16.mxu0 %v5996_v41  ;;  %v2869_v41 = vld [vmem:[#allocation16 + $0x3d8] sm:$0xff] }
 0x966   :  { %v6060_v58 = vpack.c.bf16 %v2869_v41, %v2868_v38  ;;  %v6028_v41 = vpack.c.bf16 %v2739_v37, %v2737_v36 }
 0x968   :  { %5999 = vmatpush3.bf16.msra.mxu0 %v5998_v46  ;;  %v2870_v46 = vld [vmem:[#allocation16 + $0x3e0] sm:$0xff] }
 0x969   :  { %6001 = vmatprep.subr.bf16.mxu0 %v6000_v47  ;;  %v2871_v47 = vld [vmem:[#allocation16 + $0x3e8] sm:$0xff] }
 0x96a   :  { %v6064_v49 = vpack.c.bf16 %v2871_v47, %v2870_v46  ;;  %v6032_v47 = vpack.c.bf16 %v2743_v11, %v2741_v61  ;;  %v2953_v61 = vld [vmem:[#allocation17 + $0x318] sm:$0xff] }
 0x96c   :  { %6003 = vmatpush3.bf16.msra.mxu0 %v6002_v51  ;;  %v2872_v51 = vld [vmem:[#allocation16 + $0x3f0] sm:$0xff] }
 0x96d   :  { %v5064_v13 = vpop.f32.mrb[40].mxu1  ;;  %6005 = vmatprep.subr.bf16.mxu0 %v6004_v4  ;;  %v2873_v4 = vld [vmem:[#allocation16 + $0x3f8] sm:$0xff] }
 0x96e   :  { %v5065_v6 = vpop.f32.mrb[41].mxu1  ;;  %v6068_v53 = vpack.c.bf16 %v2873_v4, %v2872_v51  ;;  %v2747_v51 = vld [vmem:[#allocation19 + $0x2f8] sm:$0xff] }
 0x96f   :  { %v7616_v12 = vadd.f32 %v5065_v6, %v5064_v13  ;;  %v2717_v13 = vld [vmem:[#allocation19 + $0x208] sm:$0xff]  ;;  %v2718_v6 = vld [vmem:[#allocation19 + $0x210] sm:$0xff]  ;;  %v6036_v4 = vpack.c.bf16 %v2747_v51, %v2745_v50  ;;  %v2954_v51 = vld [vmem:[#allocation17 + $0x320] sm:$0xff] }
 0x970   :  { %6007 = vmatpush3.bf16.msra.mxu0 %v6006_v5  ;;  %v6070_v5 = vpack.c.bf16 %v2857_v17, %v2856_v55  ;;  %v6010_v7 = vpack.c.bf16 %v2718_v6, %v2716_v3  ;;  %v2966_v17 = vld [vmem:[#allocation17 + $0x380] sm:$0xff] }
 0x971   :  { %v5067_v15 = vpop.f32.mrb[42].mxu1  ;;  %6041 = vmatprep.subr.bf16.mxu0 %v6040_v16  ;;  %v2719_v16 = vld [vmem:[#allocation19 + $0x218] sm:$0xff] }
 0x972   :  { %v5068_v0 = vpop.f32.mrb[43].mxu1  ;;  %v6008_v62 = vpack.c.bf16 %v2719_v16, %v2717_v13  ;;  %v1712_v16 = vand.u32 127, %v198_v54 }
 0x973   :  { %v7618_v8 = vadd.f32 %v5068_v0, %v5067_v15  ;;  %2691 = vmatmul.mubr.f32.vlgmr.msra.gmra.mrb[24].mxu0 %v7532_v44  ;;  %v2720_v15 = vld [vmem:[#allocation19 + $0x220] sm:$0xff]  ;;  %v2727_v0 = vld [vmem:[#allocation19 + $0x258] sm:$0xff] }
 0x974   :  { %2695 = vmatprep.mubr.f32.mxu0 %v7544_v57  ;;  %6043 = vmatpush3.bf16.msra.mxu0 %v6042_v14  ;;  %v2723_v14 = vld [vmem:[#allocation19 + $0x238] sm:$0xff]  ;;  %v6014_v9 = vpack.c.bf16 %v2722_v25, %v2720_v15  ;;  %v6016_v21 = vpack.c.bf16 %v2727_v0, %v2725_v19  ;;  %v2701_v15 = vsub.f32 0.0, %v7616_v12 }
 0x975   :  { %6045 = vmatprep.subr.bf16.mxu0 %v6044_v18  ;;  %6009 = vmatprep.subr.bf16.mxu1 %v6008_v62  ;;  %v6012_v18 = vpack.c.bf16 %v2723_v14, %v2721_v10  ;;  %v7629_v62 = vcvt.s32.f32 %v1712_v16  ;;  %v2702_v25 = vsub.f32 0.0, %v7618_v8  ;;  %v2975_v16 = vld [vmem:[#allocation17 + $0x3c8] sm:$0xff] }
 0x976   :  { %6011 = vmatpush1.bf16.msra.mxu1 %v6010_v7 }
 0x977   :  { %2696 = vmatmul.mubr.f32.gmra.mrb[26].mxu0 %v7542_v2  ;;  %6013 = vmatprep.subr.bf16.mxu1 %v6012_v18  ;;  %v2703_v18 = vmul.f32 1.442695, %v2701_v15  ;;  %v2976_v15 = vld [vmem:[#allocation17 + $0x3d0] sm:$0xff] }
 0x978   :  { %6047 = vmatpush3.bf16.msra.mxu0 %v6046_v22  ;;  %2938 = vmatprep.mubr.f32.mxu0 %v7534_v45  ;;  %v2724_v22 = vld [vmem:[#allocation19 + $0x240] sm:$0xff] }
 0x979   :  { %6049 = vmatprep.subr.bf16.mxu0 %v6048_v33  ;;  %v2726_v33 = vld [vmem:[#allocation19 + $0x250] sm:$0xff]  ;;  %6614 = vpow2.f32 %v2703_v18  ;;  %v2977_v18 = vld [vmem:[#allocation17 + $0x3d8] sm:$0xff] }
 0x97a   :  { %6015 = vmatpush1.bf16.msra.mxu1 %v6014_v9  ;;  %v6018_v26 = vpack.c.bf16 %v2726_v33, %v2724_v22  ;;  %v2705_v9 = vmul.f32 1.442695, %v2702_v25 }
 0x97b   :  { %6017 = vmatprep.subr.bf16.mxu1 %v6016_v21 }
 0x97c   :  { %6051 = vmatpush3.bf16.msra.mxu0 %v6050_v28  ;;  %v2728_v28 = vld [vmem:[#allocation19 + $0x260] sm:$0xff]  ;;  %6616 = vpow2.f32 %v2705_v9  ;;  %v6092_v9 = vpack.c.bf16 %v2977_v18, %v2976_v15  ;;  %v3204_v15 = vld [vmem:[#allocation16 + $0x430] sm:$0xff]  ;;  %v3205_v18 = vld [vmem:[#allocation16 + $0x438] sm:$0xff] }
 0x97d   :  { %6053 = vmatprep.subr.bf16.mxu0 %v6052_v29  ;;  %v2730_v29 = vld [vmem:[#allocation19 + $0x270] sm:$0xff] }
 0x97e   :  { %6019 = vmatpush1.bf16.msra.mxu1 %v6018_v26  ;;  %v6022_v59 = vpack.c.bf16 %v2730_v29, %v2728_v28  ;;  %v2950_v29 = vld [vmem:[#allocation17 + $0x300] sm:$0xff] }
 0x97f   :  { %6021 = vmatprep.subr.bf16.mxu1 %v6020_v27  ;;  %v6074_v37 = vpack.c.bf16 %v2951_v30, %v2950_v29  ;;  %v2962_v29 = vld [vmem:[#allocation17 + $0x360] sm:$0xff]  ;;  %v2963_v30 = vld [vmem:[#allocation17 + $0x368] sm:$0xff] }
 0x980   :  { %6055 = vmatpush3.bf16.msra.mxu0 %v6054_v34  ;;  %v2732_v34 = vld [vmem:[#allocation19 + $0x280] sm:$0xff] }
 0x981   :  { %6057 = vmatprep.subr.bf16.mxu0 %v6056_v35  ;;  %v2734_v35 = vld [vmem:[#allocation19 + $0x290] sm:$0xff] }
 0x982   :  { %6023 = vmatpush1.bf16.msra.mxu1 %v6022_v59  ;;  %v6026_v38 = vpack.c.bf16 %v2734_v35, %v2732_v34  ;;  %v2968_v59 = vld [vmem:[#allocation17 + $0x390] sm:$0xff] }
 0x983   :  { %6025 = vmatprep.subr.bf16.mxu1 %v6024_v32  ;;  %v6615_v33 = vpop.eup %6614  ;;  %v2969_v32 = vld [vmem:[#allocation17 + $0x398] sm:$0xff] }
 0x984   :  { %6059 = vmatpush3.bf16.msra.mxu0 %v6058_v60  ;;  %v2736_v60 = vld [vmem:[#allocation19 + $0x2a0] sm:$0xff]  ;;  %v2707_v23 = vadd.f32 1.0, %v6615_v33  ;;  %v2960_v33 = vld [vmem:[#allocation17 + $0x350] sm:$0xff] }
 0x985   :  { %6061 = vmatprep.subr.bf16.mxu0 %v6060_v58  ;;  %v2738_v58 = vld [vmem:[#allocation19 + $0x2b0] sm:$0xff] }
 0x986   :  { %6027 = vmatpush1.bf16.msra.mxu1 %v6026_v38  ;;  %v6030_v46 = vpack.c.bf16 %v2738_v58, %v2736_v60  ;;  %v6617_v24 = vpop.eup %6616  ;;  %6618 = vrcp.f32 %v2707_v23  ;;  %v6076_v60 = vpack.c.bf16 %v2969_v32, %v2968_v59  ;;  %v2952_v58 = vld [vmem:[#allocation17 + $0x310] sm:$0xff]  ;;  %v2961_v23 = vld [vmem:[#allocation17 + $0x358] sm:$0xff]  ;;  %v6098_v32 = vpack.c.bf16 %v2963_v30, %v2962_v29  ;;  %v3207_v29 = vld [vmem:[#allocation16 + $0x448] sm:$0xff] }
 0x987   :  { %6029 = vmatprep.subr.bf16.mxu1 %v6028_v41  ;;  %v2708_v26 = vadd.f32 1.0, %v6617_v24  ;;  %v2978_v24 = vld [vmem:[#allocation17 + $0x3e0] sm:$0xff]  ;;  %v2981_v59 = vld [vmem:[#allocation17 + $0x3f8] sm:$0xff] }
 0x988   :  { %6063 = vmatpush3.bf16.msra.mxu0 %v6062_v48  ;;  %v2740_v48 = vld [vmem:[#allocation19 + $0x2c0] sm:$0xff] }
 0x989   :  { %6065 = vmatprep.subr.bf16.mxu0 %v6064_v49  ;;  %v2742_v49 = vld [vmem:[#allocation19 + $0x2d0] sm:$0xff]  ;;  %6620 = vrcp.f32 %v2708_v26  ;;  %v2979_v26 = vld [vmem:[#allocation17 + $0x3e8] sm:$0xff] }
 0x98a   :  { %6031 = vmatpush1.bf16.msra.mxu1 %v6030_v46  ;;  %v6034_v1 = vpack.c.bf16 %v2742_v49, %v2740_v48  ;;  %v2970_v46 = vld [vmem:[#allocation17 + $0x3a0] sm:$0xff] }
 0x98b   :  { %6033 = vmatprep.subr.bf16.mxu1 %v6032_v47  ;;  %v2971_v47 = vld [vmem:[#allocation17 + $0x3a8] sm:$0xff] }
 0x98c   :  { %6067 = vmatpush3.bf16.msra.mxu0 %v6066_v52  ;;  %v2744_v52 = vld [vmem:[#allocation19 + $0x2e0] sm:$0xff]  ;;  %v6080_v50 = vpack.c.bf16 %v2971_v47, %v2970_v46  ;;  %v3216_v47 = vld [vmem:[#allocation16 + $0x490] sm:$0xff] }
 0x98d   :  { %6069 = vmatprep.subr.bf16.mxu0 %v6068_v53  ;;  %v2746_v53 = vld [vmem:[#allocation19 + $0x2f0] sm:$0xff] }
 0x98e   :  { %6035 = vmatpush1.bf16.msra.mxu1 %v6034_v1  ;;  %v6038_v55 = vpack.c.bf16 %v2746_v53, %v2744_v52  ;;  %v6078_v1 = vpack.c.bf16 %v2953_v61, %v2952_v58  ;;  %v2972_v52 = vld [vmem:[#allocation17 + $0x3b0] sm:$0xff]  ;;  %v2973_v53 = vld [vmem:[#allocation17 + $0x3b8] sm:$0xff]  ;;  %v3198_v61 = vld [vmem:[#allocation16 + $0x400] sm:$0xff] }
 0x98f   :  { %6037 = vmatprep.subr.bf16.mxu1 %v6036_v4  ;;  %v2955_v4 = vld [vmem:[#allocation17 + $0x328] sm:$0xff] }
 0x990   :  { %6071 = vmatpush3.bf16.msra.mxu0 %v6070_v5  ;;  %v2967_v5 = vld [vmem:[#allocation17 + $0x388] sm:$0xff]  ;;  %v6619_v27 = vpop.eup %6618 }
 0x991   :  { %v6072_v13 = vpack.c.bf16 %v2967_v5, %v2966_v17  ;;  %v2711_v34 = vmul.f32 %v6619_v27, %v7616_v12  ;;  %v2956_v17 = vld [vmem:[#allocation17 + $0x330] sm:$0xff]  ;;  %v2957_v5 = vld [vmem:[#allocation17 + $0x338] sm:$0xff]  ;;  %v6094_v27 = vpack.c.bf16 %v2961_v23, %v2960_v33  ;;  %v3223_v33 = vld [vmem:[#allocation16 + $0x4c8] sm:$0xff]  ;;  %v6150_v23 = vpack.c.bf16 %v3205_v18, %v3204_v15 }
 0x992   :  { %6039 = vmatpush1.bf16.msra.mxu1 %v6038_v55  ;;  %v6082_v55 = vpack.c.bf16 %v2955_v4, %v2954_v51  ;;  %v3200_v51 = vld [vmem:[#allocation16 + $0x410] sm:$0xff]  ;;  %v3201_v4 = vld [vmem:[#allocation16 + $0x418] sm:$0xff] }
 0x993   :  { %2939 = vmatmul.mubr.f32.vlgmr.msra.gmra.mrb[28].mxu0 %v7532_v44  ;;  %6073 = vmatprep.subr.bf16.mxu1 %v6072_v13  ;;  %v6621_v36 = vpop.eup %6620  ;;  %v2974_v13 = vld [vmem:[#allocation17 + $0x3c0] sm:$0xff] }
 0x994   :  { %2943 = vmatprep.mubr.f32.mxu0 %v7544_v57  ;;  %v2712_v48 = vmul.f32 %v6621_v36, %v7618_v8  ;;  %v6084_v8 = vpack.c.bf16 %v2973_v53, %v2972_v52  ;;  %v2965_v36 = vld [vmem:[#allocation17 + $0x378] sm:$0xff]  ;;  %v3218_v53 = vld [vmem:[#allocation16 + $0x4a0] sm:$0xff] }
 0x997   :  { %2944 = vmatmul.mubr.f32.gmra.mrb[30].mxu0 %v7542_v2 }
 0x998   :  { %3168 = vmatprep.mubr.f32.mxu0 %v6939_v56 }
 0x9e2   :  { %v7631_v3 = vpop.xlane.xlu0 %1715 }
 0x9e3   :  { %vm1720_vm2 = vcmp.eq.f32.partialorder %v7604_v63, %v7631_v3 }
 0x9e4   :  { %v1722_v6 = vsel %vm1720_vm2, %v7629_v62, 8.0 }
 0x9e5   :  { %v1724_v7 = vsel %vm986_vm1, %v1722_v6, inf  ;;  %v6086_v6 = vpack.c.bf16 %v2957_v5, %v2956_v17  ;;  %v6142_v17 = vpack.c.bf16 %v3201_v4, %v3200_v51  ;;  %v3073_v51 = vld [vmem:[#allocation19 + $0x308] sm:$0xff]  ;;  %v3075_v4 = vld [vmem:[#allocation19 + $0x318] sm:$0xff] }
 0x9e6   :  { %v7637_v10 = vpop.xlane.xlu1 %1718  ;;  %1725 = vmin.xlane.f32.xlu0 %v1724_v7  ;;  %v6088_v7 = vpack.c.bf16 %v2975_v16, %v2974_v13  ;;  %v3202_v13 = vld [vmem:[#allocation16 + $0x420] sm:$0xff]  ;;  %v3203_v16 = vld [vmem:[#allocation16 + $0x428] sm:$0xff] }
 0x9e7   :  { %vm1721_vm3 = vcmp.eq.f32.partialorder %v7611_v20, %v7637_v10 }
 0x9e8   :  { %v1723_v14 = vsel %vm1721_vm3, %v7629_v62, 8.0 }
 0x9e9   :  { %v1727_v54 = vsel %vm986_vm1, %v1723_v14, inf  ;;  %v2958_v14 = vld [vmem:[#allocation17 + $0x340] sm:$0xff] }
 0x9ea   :  { %1728 = vmin.xlane.f32.xlu1 %v1727_v54  ;;  %v2959_v54 = vld [vmem:[#allocation17 + $0x348] sm:$0xff] }
 0x9eb   :  { %v6090_v25 = vpack.c.bf16 %v2959_v54, %v2958_v14  ;;  %v6146_v14 = vpack.c.bf16 %v3203_v16, %v3202_v13  ;;  %v3079_v13 = vld [vmem:[#allocation19 + $0x338] sm:$0xff]  ;;  %v3076_v16 = vld [vmem:[#allocation19 + $0x320] sm:$0xff] }
 0xa26   :  { %v7645_v19 = vpop.f32.mrb[20].mxu0 }
 0xa27   :  { %v7647_v0 = vpop.f32.mrb[21].mxu0 }
 0xa2a   :  { %v7649_v21 = vpop.f32.mrb[22].mxu0 }
 0xa2b   :  { %v7651_v22 = vpop.f32.mrb[23].mxu0 }
 0xa46   :  { %v5102_v28 = vpop.f32.mrb[24].mxu0 }
 0xa47   :  { %v5103_v31 = vpop.f32.mrb[25].mxu0 }
 0xa48   :  { %v5104_v35 = vadd.f32 %v5103_v31, %v5102_v28  ;;  %v6096_v28 = vpack.c.bf16 %v2979_v26, %v2978_v24  ;;  %v2980_v31 = vld [vmem:[#allocation17 + $0x3f0] sm:$0xff] }
 0xa4a   :  { %v2713_v38 = vmul.f32 %v5104_v35, %v2711_v34  ;;  %v5105_v41 = vpop.f32.mrb[26].mxu0  ;;  %v6100_v34 = vpack.c.bf16 %v2981_v59, %v2980_v31  ;;  %v2964_v35 = vld [vmem:[#allocation17 + $0x370] sm:$0xff]  ;;  %v3225_v59 = vld [vmem:[#allocation16 + $0x4d8] sm:$0xff] }
 0xa4b   :  { %v5106_v11 = vpop.f32.mrb[27].mxu0  ;;  %v3224_v31 = vld [vmem:[#allocation16 + $0x4d0] sm:$0xff] }
 0xa4c   :  { %v5107_v49 = vadd.f32 %v5106_v11, %v5105_v41  ;;  %2813 = vmatmul.mubr.f32.vlgmr.msra.gmra.mrb[44].mxu1 %v2713_v38  ;;  %v3215_v38 = vld [vmem:[#allocation16 + $0x488] sm:$0xff]  ;;  %v6102_v41 = vpack.c.bf16 %v2965_v36, %v2964_v35  ;;  %v6156_v35 = vpack.c.bf16 %v3225_v59, %v3224_v31  ;;  %v3208_v36 = vld [vmem:[#allocation16 + $0x450] sm:$0xff] }
 0xa4d   :  { %6075 = vmatpush3.bf16.msra.mxu1 %v6074_v37  ;;  %2818 = vmatprep.mubr.f32.mxu1 %v6939_v56  ;;  %v3214_v37 = vld [vmem:[#allocation16 + $0x480] sm:$0xff]  ;;  %v3199_v11 = vld [vmem:[#allocation16 + $0x408] sm:$0xff]  ;;  %v3086_v31 = vld [vmem:[#allocation19 + $0x370] sm:$0xff] }
 0xa4e   :  { %v2714_v12 = vmul.f32 %v5107_v49, %v2712_v48  ;;  %6077 = vmatprep.subr.bf16.mxu1 %v6076_v60  ;;  %v6136_v58 = vpack.c.bf16 %v3215_v38, %v3214_v37  ;;  %v3217_v48 = vld [vmem:[#allocation16 + $0x498] sm:$0xff]  ;;  %v3226_v38 = vld [vmem:[#allocation16 + $0x4e0] sm:$0xff]  ;;  %v3089_v59 = vld [vmem:[#allocation19 + $0x388] sm:$0xff] }
 0xa4f   :  { %v3209_v37 = vld [vmem:[#allocation16 + $0x458] sm:$0xff] }
 0xa50   :  { %2819 = vmatmul.mubr.f32.gmra.mrb[46].mxu1 %v2714_v12 }
 0xa51   :  { %6079 = vmatpush3.bf16.msra.mxu1 %v6078_v1  ;;  %3046 = vmatprep.mubr.f32.mxu1 %v7534_v45  ;;  %v6138_v1 = vpack.c.bf16 %v3199_v11, %v3198_v61  ;;  %v3210_v61 = vld [vmem:[#allocation16 + $0x460] sm:$0xff]  ;;  %v3211_v11 = vld [vmem:[#allocation16 + $0x468] sm:$0xff] }
 0xa52   :  { %6081 = vmatprep.subr.bf16.mxu1 %v6080_v50  ;;  %v6140_v50 = vpack.c.bf16 %v3217_v48, %v3216_v47  ;;  %v3229_v47 = vld [vmem:[#allocation16 + $0x4f8] sm:$0xff] }
 0xa55   :  { %6083 = vmatpush3.bf16.msra.mxu1 %v6082_v55  ;;  %v3219_v55 = vld [vmem:[#allocation16 + $0x4a8] sm:$0xff] }
 0xa56   :  { %6085 = vmatprep.subr.bf16.mxu1 %v6084_v8  ;;  %v6144_v5 = vpack.c.bf16 %v3219_v55, %v3218_v53  ;;  %v3072_v53 = vld [vmem:[#allocation19 + $0x300] sm:$0xff]  ;;  %v3074_v55 = vld [vmem:[#allocation19 + $0x310] sm:$0xff] }
 0xa59   :  { %6087 = vmatpush3.bf16.msra.mxu1 %v6086_v6  ;;  %v3220_v6 = vld [vmem:[#allocation16 + $0x4b0] sm:$0xff] }
 0xa5a   :  { %6089 = vmatprep.subr.bf16.mxu1 %v6088_v7  ;;  %v3221_v7 = vld [vmem:[#allocation16 + $0x4b8] sm:$0xff] }
 0xa5b   :  { %v6148_v54 = vpack.c.bf16 %v3221_v7, %v3220_v6  ;;  %v3078_v7 = vld [vmem:[#allocation19 + $0x330] sm:$0xff] }
 0xa5c   :  { %v6110_v15 = vpack.c.bf16 %v3078_v7, %v3076_v16 }
 0xa5d   :  { %6091 = vmatpush3.bf16.msra.mxu1 %v6090_v25 }
 0xa5e   :  { %6093 = vmatprep.subr.bf16.mxu1 %v6092_v9  ;;  %v3222_v9 = vld [vmem:[#allocation16 + $0x4c0] sm:$0xff] }
 0xa61   :  { %6095 = vmatpush3.bf16.msra.mxu1 %v6094_v27  ;;  %v6152_v27 = vpack.c.bf16 %v3223_v33, %v3222_v9  ;;  %v3080_v9 = vld [vmem:[#allocation19 + $0x340] sm:$0xff]  ;;  %v3082_v33 = vld [vmem:[#allocation19 + $0x350] sm:$0xff] }
 0xa62   :  { %6097 = vmatprep.subr.bf16.mxu1 %v6096_v28  ;;  %v3206_v28 = vld [vmem:[#allocation16 + $0x440] sm:$0xff] }
 0xa65   :  { %6099 = vmatpush3.bf16.msra.mxu1 %v6098_v32  ;;  %v6154_v32 = vpack.c.bf16 %v3207_v29, %v3206_v28  ;;  %v3084_v29 = vld [vmem:[#allocation19 + $0x360] sm:$0xff] }
 0xa66   :  { %v5140_v60 = vpop.f32.mrb[28].mxu0  ;;  %6101 = vmatprep.subr.bf16.mxu1 %v6100_v34 }
 0xa67   :  { %v5141_v46 = vpop.f32.mrb[29].mxu0 }
 0xa68   :  { %v7657_v49 = vadd.f32 %v5141_v46, %v5140_v60  ;;  %v6158_v60 = vpack.c.bf16 %v3209_v37, %v3208_v36  ;;  %v3228_v46 = vld [vmem:[#allocation16 + $0x4f0] sm:$0xff]  ;;  %v3088_v36 = vld [vmem:[#allocation19 + $0x380] sm:$0xff] }
 0xa69   :  { %6103 = vmatpush3.bf16.msra.mxu1 %v6102_v41  ;;  %v3227_v41 = vld [vmem:[#allocation16 + $0x4e8] sm:$0xff]  ;;  %v6164_v48 = vpack.c.bf16 %v3229_v47, %v3228_v46  ;;  %v3090_v37 = vld [vmem:[#allocation19 + $0x390] sm:$0xff]  ;;  %v3099_v47 = vld [vmem:[#allocation19 + $0x3d8] sm:$0xff] }
 0xa6a   :  { %v5143_v12 = vpop.f32.mrb[30].mxu0  ;;  %6137 = vmatprep.subr.bf16.mxu1 %v6136_v58  ;;  %v6160_v58 = vpack.c.bf16 %v3227_v41, %v3226_v38  ;;  %v3093_v38 = vld [vmem:[#allocation19 + $0x3a8] sm:$0xff]  ;;  %v3095_v41 = vld [vmem:[#allocation19 + $0x3b8] sm:$0xff] }
 0xa6b   :  { %v5144_v52 = vpop.f32.mrb[31].mxu0  ;;  %v3097_v46 = vld [vmem:[#allocation19 + $0x3c8] sm:$0xff] }
 0xa6c   :  { %v7659_v8 = vadd.f32 %v5144_v52, %v5143_v12  ;;  %3047 = vmatmul.mubr.f32.vlgmr.msra.gmra.mrb[48].mxu1 %v7532_v44  ;;  %v3213_v12 = vld [vmem:[#allocation16 + $0x478] sm:$0xff]  ;;  %v6104_v52 = vpack.c.bf16 %v3075_v4, %v3073_v51  ;;  %v3101_v51 = vld [vmem:[#allocation19 + $0x3e8] sm:$0xff] }
 0xa6d   :  { %3051 = vmatprep.mubr.f32.mxu1 %v7544_v57  ;;  %6139 = vmatpush3.bf16.msra.mxu1 %v6138_v1  ;;  %v3212_v1 = vld [vmem:[#allocation16 + $0x470] sm:$0xff]  ;;  %v3103_v4 = vld [vmem:[#allocation19 + $0x3f8] sm:$0xff] }
 0xa6e   :  { %6141 = vmatprep.subr.bf16.mxu1 %v6140_v50  ;;  %v6166_v50 = vpack.c.bf16 %v3213_v12, %v3212_v1  ;;  %6105 = vmatprep.subr.bf16.mxu0 %v6104_v52  ;;  %v3096_v1 = vld [vmem:[#allocation19 + $0x3c0] sm:$0xff]  ;;  %v3098_v12 = vld [vmem:[#allocation19 + $0x3d0] sm:$0xff]  ;;  %v6132_v52 = vpack.c.bf16 %v3103_v4, %v3101_v51  ;;  %v3309_v51 = vld [vmem:[#allocation17 + $0x418] sm:$0xff] }
 0xa70   :  { %3052 = vmatmul.mubr.f32.gmra.mrb[50].mxu1 %v7542_v2 }
 0xa71   :  { %6143 = vmatpush3.bf16.msra.mxu1 %v6142_v17  ;;  %3294 = vmatprep.mubr.f32.mxu1 %v7534_v45  ;;  %v6106_v17 = vpack.c.bf16 %v3074_v55, %v3072_v53  ;;  %v3100_v53 = vld [vmem:[#allocation19 + $0x3e0] sm:$0xff]  ;;  %v3102_v55 = vld [vmem:[#allocation19 + $0x3f0] sm:$0xff] }
 0xa72   :  { %6145 = vmatprep.subr.bf16.mxu1 %v6144_v5  ;;  %v3077_v5 = vld [vmem:[#allocation19 + $0x328] sm:$0xff] }
 0xa73   :  { %v7665_v25 = vpop.xlane.xlu0 %1725  ;;  %6107 = vmatpush1.bf16.msra.mxu0 %v6106_v17  ;;  %v6108_v6 = vpack.c.bf16 %v3079_v13, %v3077_v5  ;;  %v6134_v17 = vpack.c.bf16 %v3102_v55, %v3100_v53  ;;  %v3322_v5 = vld [vmem:[#allocation17 + $0x480] sm:$0xff]  ;;  %v3323_v13 = vld [vmem:[#allocation17 + $0x488] sm:$0xff] }
 0xa74   :  { %vm1730_vm4 = vcmp.eq.f32.partialorder %v7629_v62, %v7665_v25  ;;  %v6168_v16 = vpack.c.bf16 %v3323_v13, %v3322_v5  ;;  %v3327_v53 = vld [vmem:[#allocation17 + $0x4a8] sm:$0xff] }
 0xa75   :  { %6147 = vmatpush3.bf16.msra.mxu1 %v6146_v14  ;;  %v7673_v24 = vsel %vm1730_vm4, -inf, %v7604_v63  ;;  %v3081_v14 = vld [vmem:[#allocation19 + $0x348] sm:$0xff]  ;;  %6109 = vmatprep.subr.bf16.mxu0 %v6108_v6 }
 0xa76   :  { %6149 = vmatprep.subr.bf16.mxu1 %v6148_v54  ;;  %v1734_v26 = vsel %vm986_vm1, %v7673_v24, -inf  ;;  %v3083_v54 = vld [vmem:[#allocation19 + $0x358] sm:$0xff] }
 0xa77   :  { %v7677_v30 = vpop.xlane.xlu1 %1728  ;;  %1735 = vmax.xlane.f32.xlu0 %v1734_v26  ;;  %v6112_v18 = vpack.c.bf16 %v3083_v54, %v3081_v14  ;;  %v3087_v26 = vld [vmem:[#allocation19 + $0x378] sm:$0xff]  ;;  %6111 = vmatpush1.bf16.msra.mxu0 %v6110_v15 }
 0xa78   :  { %vm1731_vm5 = vcmp.eq.f32.partialorder %v7629_v62, %v7677_v30  ;;  %v3440_v30 = vld [vmem:[#allocation19 + $0x460] sm:$0xff] }
 0xa79   :  { %6151 = vmatpush3.bf16.msra.mxu1 %v6150_v23  ;;  %v7685_v63 = vsel %vm1731_vm5, -inf, %v7611_v20  ;;  %v6162_v20 = vpack.c.bf16 %v3211_v11, %v3210_v61  ;;  %v3085_v23 = vld [vmem:[#allocation19 + $0x368] sm:$0xff]  ;;  %6113 = vmatprep.subr.bf16.mxu0 %v6112_v18  ;;  %v3092_v61 = vld [vmem:[#allocation19 + $0x3a0] sm:$0xff]  ;;  %v3094_v11 = vld [vmem:[#allocation19 + $0x3b0] sm:$0xff] }
 0xa7a   :  { %6153 = vmatprep.subr.bf16.mxu1 %v6152_v27  ;;  %v1737_v34 = vsel %vm986_vm1, %v7685_v63, -inf  ;;  %v6114_v27 = vpack.c.bf16 %v3082_v33, %v3080_v9  ;;  %v6116_v28 = vpack.c.bf16 %v3087_v26, %v3085_v23  ;;  %v3057_v9 = vsub.f32 0.0, %v7657_v49 }
 0xa7b   :  { %1738 = vmax.xlane.f32.xlu1 %v1737_v34  ;;  %v6118_v34 = vpack.c.bf16 %v3086_v31, %v3084_v29  ;;  %v6942_v26 = vmov 1  }
 0xa7c   :  { %6115 = vmatpush1.bf16.msra.mxu0 %v6114_v27  ;;  %v3059_v33 = vmul.f32 1.442695, %v3057_v9  ;;  %6551 = vset.pattern.permute.xlu1 %v6942_v26  ;;  %v6943_v27 = vmov 0   ;;  %v3312_v9 = vld [vmem:[#allocation17 + $0x430] sm:$0xff] }
 0xa7d   :  { %6155 = vmatpush3.bf16.msra.mxu1 %v6154_v32  ;;  %v3091_v32 = vld [vmem:[#allocation19 + $0x398] sm:$0xff]  ;;  %6117 = vmatprep.subr.bf16.mxu0 %v6116_v28 }
 0xa7e   :  { %6157 = vmatprep.subr.bf16.mxu1 %v6156_v35  ;;  %v6120_v35 = vpack.c.bf16 %v3091_v32, %v3089_v59  ;;  %6550 = vset.pattern.permute.xlu0 %v6943_v27  ;;  %6622 = vpow2.f32 %v3059_v33  ;;  %v3313_v33 = vld [vmem:[#allocation17 + $0x438] sm:$0xff] }
 0xa80   :  { %6119 = vmatpush1.bf16.msra.mxu0 %v6118_v34 }
 0xa81   :  { %6159 = vmatpush3.bf16.msra.mxu1 %v6158_v60  ;;  %v6122_v60 = vpack.c.bf16 %v3090_v37, %v3088_v36  ;;  %6121 = vmatprep.subr.bf16.mxu0 %v6120_v35 }
 0xa82   :  { %6161 = vmatprep.subr.bf16.mxu1 %v6160_v58  ;;  %v6124_v58 = vpack.c.bf16 %v3095_v41, %v3093_v38  ;;  %v3306_v38 = vld [vmem:[#allocation17 + $0x400] sm:$0xff]  ;;  %v3307_v41 = vld [vmem:[#allocation17 + $0x408] sm:$0xff] }
 0xa84   :  { %6123 = vmatpush1.bf16.msra.mxu0 %v6122_v60 }
 0xa85   :  { %6163 = vmatpush3.bf16.msra.mxu1 %v6162_v20  ;;  %v6126_v20 = vpack.c.bf16 %v3094_v11, %v3092_v61  ;;  %6125 = vmatprep.subr.bf16.mxu0 %v6124_v58  ;;  %v3324_v58 = vld [vmem:[#allocation17 + $0x490] sm:$0xff]  ;;  %v3325_v61 = vld [vmem:[#allocation17 + $0x498] sm:$0xff] }
 0xa86   :  { %6165 = vmatprep.subr.bf16.mxu1 %v6164_v48  ;;  %v6128_v48 = vpack.c.bf16 %v3099_v47, %v3097_v46 }
 0xa88   :  { %6127 = vmatpush1.bf16.msra.mxu0 %v6126_v20  ;;  %v6623_v59 = vpop.eup %6622  ;;  %v6170_v20 = vpack.c.bf16 %v3307_v41, %v3306_v38 }
 0xa89   :  { %6167 = vmatpush3.bf16.msra.mxu1 %v6166_v50  ;;  %v6130_v50 = vpack.c.bf16 %v3098_v12, %v3096_v1  ;;  %6129 = vmatprep.subr.bf16.mxu0 %v6128_v48  ;;  %v3063_v32 = vadd.f32 1.0, %v6623_v59  ;;  %v6172_v12 = vpack.c.bf16 %v3325_v61, %v3324_v58  ;;  %v6182_v59 = vpack.c.bf16 %v3313_v33, %v3312_v9  ;;  %v3317_v58 = vld [vmem:[#allocation17 + $0x458] sm:$0xff]  ;;  %v3334_v61 = vld [vmem:[#allocation17 + $0x4e0] sm:$0xff] }
 0xa8c   :  { %3295 = vmatmul.mubr.f32.vlgmr.msra.gmra.mrb[52].mxu1 %v7532_v44  ;;  %6131 = vmatpush1.bf16.msra.mxu0 %v6130_v50  ;;  %v3308_v50 = vld [vmem:[#allocation17 + $0x410] sm:$0xff] }
 0xa8d   :  { %3299 = vmatprep.mubr.f32.mxu1 %v7544_v57  ;;  %6133 = vmatprep.subr.bf16.mxu0 %v6132_v52  ;;  %v3326_v52 = vld [vmem:[#allocation17 + $0x4a0] sm:$0xff]  ;;  %v6174_v5 = vpack.c.bf16 %v3309_v51, %v3308_v50 }
 0xa8e   :  { %v6176_v13 = vpack.c.bf16 %v3327_v53, %v3326_v52  ;;  %v3321_v52 = vld [vmem:[#allocation17 + $0x478] sm:$0xff]  ;;  %v3570_v53 = vld [vmem:[#allocation16 + $0x580] sm:$0xff] }
 0xa90   :  { %3300 = vmatmul.mubr.f32.gmra.mrb[54].mxu1 %v7542_v2  ;;  %6135 = vmatpush1.bf16.msra.mxu0 %v6134_v17 }
 0xa91   :  { %3524 = vmatprep.mubr.f32.mxu1 %v6939_v56  ;;  %6169 = vmatprep.subr.bf16.mxu0 %v6168_v16  ;;  %v3310_v16 = vld [vmem:[#allocation17 + $0x420] sm:$0xff] }
 0xb04   :  { %v7693_v6 = vpop.xlane.xlu0 %1735 }
 0xb05   :  { %vm1740_vm6 = vcmp.eq.f32.partialorder %v7673_v24, %v7693_v6  ;;  %v3058_v24 = vsub.f32 0.0, %v7659_v8 }
 0xb06   :  { %v1742_v7 = vsel %vm1740_vm6, %v7629_v62, 8.0 }
 0xb07   :  { %v1744_v14 = vsel %vm986_vm1, %v1742_v7, inf  ;;  %v3311_v7 = vld [vmem:[#allocation17 + $0x428] sm:$0xff] }
 0xb08   :  { %v7699_v54 = vpop.xlane.xlu1 %1738  ;;  %1745 = vmin.xlane.f32.xlu0 %v1744_v14  ;;  %v3328_v14 = vld [vmem:[#allocation17 + $0x4b0] sm:$0xff] }
 0xb09   :  { %vm1741_vm7 = vcmp.eq.f32.partialorder %v7685_v63, %v7699_v54  ;;  %v3061_v63 = vmul.f32 1.442695, %v3058_v24  ;;  %v3330_v24 = vld [vmem:[#allocation17 + $0x4c0] sm:$0xff] }
 0xb0a   :  { %v1743_v15 = vsel %vm1741_vm7, %v7629_v62, 8.0 }
 0xb0b   :  { %v1747_v18 = vsel %vm986_vm1, %v1743_v15, inf  ;;  %6624 = vpow2.f32 %v3061_v63  ;;  %v3329_v15 = vld [vmem:[#allocation17 + $0x4b8] sm:$0xff]  ;;  %v3331_v63 = vld [vmem:[#allocation17 + $0x4c8] sm:$0xff] }
 0xb0c   :  { %1748 = vmin.xlane.f32.xlu1 %v1747_v18  ;;  %6626 = vrcp.f32 %v3063_v32  ;;  %v6178_v18 = vpack.c.bf16 %v3311_v7, %v3310_v16  ;;  %v6184_v32 = vpack.c.bf16 %v3331_v63, %v3330_v24  ;;  %v3555_v16 = vld [vmem:[#allocation16 + $0x508] sm:$0xff]  ;;  %v3556_v24 = vld [vmem:[#allocation16 + $0x510] sm:$0xff]  ;;  %v3557_v63 = vld [vmem:[#allocation16 + $0x518] sm:$0xff] }
 0xb15   :  { %v6625_v34 = vpop.eup %6624 }
 0xb16   :  { %v3064_v35 = vadd.f32 1.0, %v6625_v34  ;;  %v6627_v36 = vpop.eup %6626  ;;  %v3314_v34 = vld [vmem:[#allocation17 + $0x440] sm:$0xff] }
 0xb17   :  { %v3067_v11 = vmul.f32 %v6627_v36, %v7657_v49  ;;  %v3332_v36 = vld [vmem:[#allocation17 + $0x4d0] sm:$0xff] }
 0xb18   :  { %6628 = vrcp.f32 %v3064_v35  ;;  %v3315_v35 = vld [vmem:[#allocation17 + $0x448] sm:$0xff] }
 0xb19   :  { %v6186_v38 = vpack.c.bf16 %v3315_v35, %v3314_v34  ;;  %v3575_v34 = vld [vmem:[#allocation16 + $0x5a8] sm:$0xff] }
 0xb1f   :  { %v7707_v23 = vpop.f32.mrb[44].mxu1 }
 0xb20   :  { %v7711_v28 = vpop.f32.mrb[45].mxu1 }
 0xb22   :  { %v6629_v47 = vpop.eup %6628 }
 0xb23   :  { %v7713_v29 = vpop.f32.mrb[46].mxu1  ;;  %v3068_v55 = vmul.f32 %v6629_v47, %v7659_v8  ;;  %v6180_v8 = vpack.c.bf16 %v3329_v15, %v3328_v14  ;;  %v3572_v14 = vld [vmem:[#allocation16 + $0x590] sm:$0xff]  ;;  %v3573_v15 = vld [vmem:[#allocation16 + $0x598] sm:$0xff] }
 0xb24   :  { %v7715_v31 = vpop.f32.mrb[47].mxu1  ;;  %v6236_v33 = vpack.c.bf16 %v3573_v15, %v3572_v14  ;;  %v3566_v14 = vld [vmem:[#allocation16 + $0x560] sm:$0xff]  ;;  %v3567_v15 = vld [vmem:[#allocation16 + $0x568] sm:$0xff] }
 0xb3f   :  { %v5178_v37 = vpop.f32.mrb[48].mxu1 }
 0xb40   :  { %v5179_v60 = vpop.f32.mrb[49].mxu1 }
 0xb41   :  { %v5180_v46 = vadd.f32 %v5179_v60, %v5178_v37  ;;  %v3333_v37 = vld [vmem:[#allocation17 + $0x4d8] sm:$0xff]  ;;  %v3316_v60 = vld [vmem:[#allocation17 + $0x450] sm:$0xff] }
 0xb42   :  { %v6188_v41 = vpack.c.bf16 %v3333_v37, %v3332_v36  ;;  %v6238_v36 = vpack.c.bf16 %v3557_v63, %v3556_v24  ;;  %v3568_v63 = vld [vmem:[#allocation16 + $0x570] sm:$0xff] }
 0xb43   :  { %v3069_v48 = vmul.f32 %v5180_v46, %v3067_v11  ;;  %v5181_v1 = vpop.f32.mrb[50].mxu1  ;;  %v3335_v11 = vld [vmem:[#allocation17 + $0x4e8] sm:$0xff]  ;;  %v6190_v46 = vpack.c.bf16 %v3317_v58, %v3316_v60  ;;  %v3576_v60 = vld [vmem:[#allocation16 + $0x5b0] sm:$0xff]  ;;  %v3577_v58 = vld [vmem:[#allocation16 + $0x5b8] sm:$0xff] }
 0xb44   :  { %v5182_v4 = vpop.f32.mrb[51].mxu1  ;;  %v6192_v47 = vpack.c.bf16 %v3335_v11, %v3334_v61  ;;  %v6244_v11 = vpack.c.bf16 %v3577_v58, %v3576_v60  ;;  %v4670_v58 = vsel %vm1730_vm4, 1.0, %v6939_v56 }
 0xb45   :  { %v5183_v17 = vadd.f32 %v5182_v4, %v5181_v1  ;;  %3169 = vmatmul.mubr.f32.vlgmr.msra.gmra.mrb[32].mxu0 %v3069_v48  ;;  %v3319_v48 = vld [vmem:[#allocation17 + $0x468] sm:$0xff]  ;;  %v3336_v1 = vld [vmem:[#allocation17 + $0x4f0] sm:$0xff] }
 0xb46   :  { %6171 = vmatpush3.bf16.msra.mxu0 %v6170_v20  ;;  %3174 = vmatprep.mubr.f32.mxu0 %v6939_v56  ;;  %v3318_v20 = vld [vmem:[#allocation17 + $0x460] sm:$0xff]  ;;  %v3320_v4 = vld [vmem:[#allocation17 + $0x470] sm:$0xff] }
 0xb47   :  { %v3070_v49 = vmul.f32 %v5183_v17, %v3068_v55  ;;  %6173 = vmatprep.subr.bf16.mxu0 %v6172_v12  ;;  %v3337_v12 = vld [vmem:[#allocation17 + $0x4f8] sm:$0xff]  ;;  %v6194_v50 = vpack.c.bf16 %v3319_v48, %v3318_v20  ;;  %v3571_v55 = vld [vmem:[#allocation16 + $0x588] sm:$0xff]  ;;  %v6198_v17 = vpack.c.bf16 %v3321_v52, %v3320_v4  ;;  %v3578_v20 = vld [vmem:[#allocation16 + $0x5c0] sm:$0xff] }
 0xb48   :  { %v6196_v51 = vpack.c.bf16 %v3337_v12, %v3336_v1  ;;  %v3579_v48 = vld [vmem:[#allocation16 + $0x5c8] sm:$0xff]  ;;  %v3580_v4 = vld [vmem:[#allocation16 + $0x5d0] sm:$0xff]  ;;  %v3581_v52 = vld [vmem:[#allocation16 + $0x5d8] sm:$0xff] }
 0xb49   :  { %3175 = vmatmul.mubr.f32.gmra.mrb[34].mxu0 %v3070_v49  ;;  %v6232_v49 = vpack.c.bf16 %v3571_v55, %v3570_v53  ;;  %v6248_v12 = vpack.c.bf16 %v3579_v48, %v3578_v20  ;;  %v6252_v55 = vpack.c.bf16 %v3581_v52, %v3580_v4  ;;  %v3431_v48 = vld [vmem:[#allocation19 + $0x418] sm:$0xff] }
 0xb4a   :  { %6175 = vmatpush3.bf16.msra.mxu0 %v6174_v5  ;;  %3402 = vmatprep.mubr.f32.mxu0 %v7534_v45 }
 0xb4b   :  { %6177 = vmatprep.subr.bf16.mxu0 %v6176_v13  ;;  %v3554_v13 = vld [vmem:[#allocation16 + $0x500] sm:$0xff] }
 0xb4e   :  { %6179 = vmatpush3.bf16.msra.mxu0 %v6178_v18 }
 0xb4f   :  { %6181 = vmatprep.subr.bf16.mxu0 %v6180_v8  ;;  %v6234_v8 = vpack.c.bf16 %v3555_v16, %v3554_v13  ;;  %v3583_v13 = vld [vmem:[#allocation16 + $0x5e8] sm:$0xff] }
 0xb52   :  { %6183 = vmatpush3.bf16.msra.mxu0 %v6182_v59 }
 0xb53   :  { %6185 = vmatprep.subr.bf16.mxu0 %v6184_v32  ;;  %v3574_v32 = vld [vmem:[#allocation16 + $0x5a0] sm:$0xff] }
 0xb54   :  { %v6240_v37 = vpack.c.bf16 %v3575_v34, %v3574_v32  ;;  %v1752_v34 = vadd.f32 %v7693_v6, %v7631_v3 }
 0xb56   :  { %6187 = vmatpush3.bf16.msra.mxu0 %v6186_v38  ;;  %v3558_v38 = vld [vmem:[#allocation16 + $0x520] sm:$0xff]  ;;  %6630 = vrcp.f32 %v1752_v34  ;;  %v3443_v34 = vld [vmem:[#allocation19 + $0x478] sm:$0xff] }
 0xb57   :  { %6189 = vmatprep.subr.bf16.mxu0 %v6188_v41  ;;  %v3559_v41 = vld [vmem:[#allocation16 + $0x528] sm:$0xff] }
 0xb58   :  { %v6242_v61 = vpack.c.bf16 %v3559_v41, %v3558_v38 }
 0xb5a   :  { %6191 = vmatpush3.bf16.msra.mxu0 %v6190_v46  ;;  %v3560_v46 = vld [vmem:[#allocation16 + $0x530] sm:$0xff] }
 0xb5b   :  { %6193 = vmatprep.subr.bf16.mxu0 %v6192_v47  ;;  %v3561_v47 = vld [vmem:[#allocation16 + $0x538] sm:$0xff] }
 0xb5c   :  { %v6246_v1 = vpack.c.bf16 %v3561_v47, %v3560_v46 }
 0xb5e   :  { %6195 = vmatpush3.bf16.msra.mxu0 %v6194_v50  ;;  %v3562_v50 = vld [vmem:[#allocation16 + $0x540] sm:$0xff] }
 0xb5f   :  { %v5216_v5 = vpop.f32.mrb[52].mxu1  ;;  %6197 = vmatprep.subr.bf16.mxu0 %v6196_v51  ;;  %v3563_v51 = vld [vmem:[#allocation16 + $0x548] sm:$0xff] }
 0xb60   :  { %v5217_v7 = vpop.f32.mrb[53].mxu1  ;;  %v6250_v53 = vpack.c.bf16 %v3563_v51, %v3562_v50  ;;  %v3430_v50 = vld [vmem:[#allocation19 + $0x410] sm:$0xff] }
 0xb61   :  { %v7721_v18 = vadd.f32 %v5217_v7, %v5216_v5  ;;  %v3565_v5 = vld [vmem:[#allocation16 + $0x558] sm:$0xff] }
 0xb62   :  { %6199 = vmatpush3.bf16.msra.mxu0 %v6198_v17  ;;  %v3564_v17 = vld [vmem:[#allocation16 + $0x550] sm:$0xff] }
 0xb63   :  { %v5219_v9 = vpop.f32.mrb[54].mxu1  ;;  %6233 = vmatprep.subr.bf16.mxu0 %v6232_v49  ;;  %v3582_v49 = vld [vmem:[#allocation16 + $0x5e0] sm:$0xff]  ;;  %v6254_v16 = vpack.c.bf16 %v3565_v5, %v3564_v17 }
 0xb64   :  { %v5220_v59 = vpop.f32.mrb[55].mxu1  ;;  %v6256_v7 = vpack.c.bf16 %v3583_v13, %v3582_v49  ;;  %v3432_v17 = vld [vmem:[#allocation19 + $0x420] sm:$0xff]  ;;  %v3434_v49 = vld [vmem:[#allocation19 + $0x430] sm:$0xff]  ;;  %v3437_v13 = vld [vmem:[#allocation19 + $0x448] sm:$0xff] }
 0xb65   :  { %v7723_v35 = vadd.f32 %v5220_v59, %v5219_v9  ;;  %3403 = vmatmul.mubr.f32.vlgmr.msra.gmra.mrb[36].mxu0 %v7532_v44  ;;  %v3585_v9 = vld [vmem:[#allocation16 + $0x5f8] sm:$0xff] }
 0xb66   :  { %3407 = vmatprep.mubr.f32.mxu0 %v7544_v57  ;;  %6235 = vmatpush3.bf16.msra.mxu0 %v6234_v8  ;;  %v3584_v8 = vld [vmem:[#allocation16 + $0x5f0] sm:$0xff]  ;;  %v3569_v59 = vld [vmem:[#allocation16 + $0x578] sm:$0xff] }
 0xb67   :  { %6237 = vmatprep.subr.bf16.mxu0 %v6236_v33  ;;  %v6258_v33 = vpack.c.bf16 %v3567_v15, %v3566_v14  ;;  %v6260_v24 = vpack.c.bf16 %v3585_v9, %v3584_v8  ;;  %v6262_v32 = vpack.c.bf16 %v3569_v59, %v3568_v63  ;;  %v6944_v14 = vmov 2   ;;  %v3441_v63 = vld [vmem:[#allocation19 + $0x468] sm:$0xff] }
 0xb68   :  { %v6945_v15 = vmov 4   ;;  %v6206_v8 = vpack.c.bf16 %v3434_v49, %v3432_v17  ;;  %v3454_v17 = vld [vmem:[#allocation19 + $0x4d0] sm:$0xff]  ;;  %v3457_v49 = vld [vmem:[#allocation19 + $0x4e8] sm:$0xff] }
 0xb69   :  { %3408 = vmatmul.mubr.f32.gmra.mrb[38].mxu0 %v7542_v2 }
 0xb6a   :  { %6239 = vmatpush3.bf16.msra.mxu0 %v6238_v36  ;;  %3650 = vmatprep.mubr.f32.mxu0 %v7534_v45  ;;  %v1753_v36 = vadd.f32 %v7699_v54, %v7637_v10 }
 0xb6b   :  { %6241 = vmatprep.subr.bf16.mxu0 %v6240_v37  ;;  %v6631_v37 = vpop.eup %6630 }
 0xb6c   :  { %6632 = vrcp.f32 %v1753_v36  ;;  %v1760_v38 = vmul.f32 %v6631_v37, %v7631_v3  ;;  %v1768_v60 = vmul.f32 %v6631_v37, %v7693_v6  ;;  %v3429_v3 = vld [vmem:[#allocation19 + $0x408] sm:$0xff]  ;;  %v6946_v36 = vmov 3  }
 0xb6d   :  { %v6200_v6 = vpack.c.bf16 %v3431_v48, %v3429_v3  ;;  %v6947_v37 = vmov 5   ;;  %v3449_v3 = vld [vmem:[#allocation19 + $0x4a8] sm:$0xff]  ;;  %v3451_v48 = vld [vmem:[#allocation19 + $0x4b8] sm:$0xff] }
 0xb6e   :  { %6243 = vmatpush3.bf16.msra.mxu0 %v6242_v61 }
 0xb6f   :  { %6245 = vmatprep.subr.bf16.mxu0 %v6244_v11  ;;  %v1762_v11 = vmul.f32 %v4670_v58, %v1760_v38  ;;  %6201 = vmatprep.subr.bf16.mxu1 %v6200_v6  ;;  %v3442_v38 = vld [vmem:[#allocation19 + $0x470] sm:$0xff]  ;;  %v3447_v58 = vld [vmem:[#allocation19 + $0x498] sm:$0xff]  ;;  %v6220_v6 = vpack.c.bf16 %v3451_v48, %v3449_v3 }
 0xb72   :  { %6247 = vmatpush3.bf16.msra.mxu0 %v6246_v1 }
 0xb73   :  { %6249 = vmatprep.subr.bf16.mxu0 %v6248_v12  ;;  %v3428_v12 = vld [vmem:[#allocation19 + $0x400] sm:$0xff] }
 0xb74   :  { %v6202_v25 = vpack.c.bf16 %v3430_v50, %v3428_v12  ;;  %v3448_v12 = vld [vmem:[#allocation19 + $0x4a0] sm:$0xff]  ;;  %v3450_v50 = vld [vmem:[#allocation19 + $0x4b0] sm:$0xff] }
 0xb76   :  { %6251 = vmatpush3.bf16.msra.mxu0 %v6250_v53  ;;  %v6633_v1 = vpop.eup %6632  ;;  %6203 = vmatpush1.bf16.msra.mxu1 %v6202_v25  ;;  %v3433_v53 = vld [vmem:[#allocation19 + $0x428] sm:$0xff]  ;;  %v6949_v25 = vmov 6  }
 0xb77   :  { %6253 = vmatprep.subr.bf16.mxu0 %v6252_v55  ;;  %v1769_v4 = vmul.f32 %v6633_v1, %v7699_v54  ;;  %v1761_v52 = vmul.f32 %v6633_v1, %v7637_v10  ;;  %v3435_v55 = vld [vmem:[#allocation19 + $0x438] sm:$0xff]  ;;  %v4671_v10 = vsel %vm1731_vm5, 1.0, %v6939_v56 }
 0xb78   :  { %v6204_v5 = vpack.c.bf16 %v3435_v55, %v3433_v53  ;;  %v3452_v55 = vld [vmem:[#allocation19 + $0x4c0] sm:$0xff] }
 0xb79   :  { %v1763_v54 = vmul.f32 %v4671_v10, %v1761_v52  ;;  %v6222_v52 = vpack.c.bf16 %v3450_v50, %v3448_v12  ;;  %v3679_v10 = vld [vmem:[#allocation17 + $0x588] sm:$0xff] }
 0xb7a   :  { %6255 = vmatpush3.bf16.msra.mxu0 %v6254_v16  ;;  %v3439_v16 = vld [vmem:[#allocation19 + $0x458] sm:$0xff]  ;;  %6205 = vmatprep.subr.bf16.mxu1 %v6204_v5  ;;  %v6226_v5 = vpack.c.bf16 %v3454_v17, %v3452_v55 }
 0xb7b   :  { %6257 = vmatprep.subr.bf16.mxu0 %v6256_v7  ;;  %v6208_v9 = vpack.c.bf16 %v3439_v16, %v3437_v13  ;;  %6207 = vmatpush1.bf16.msra.mxu1 %v6206_v8  ;;  %v3459_v13 = vld [vmem:[#allocation19 + $0x4f8] sm:$0xff]  ;;  %v3458_v8 = vld [vmem:[#allocation19 + $0x4f0] sm:$0xff] }
 0xb7c   :  { %v6228_v16 = vpack.c.bf16 %v3459_v13, %v3457_v49  ;;  %v3681_v49 = vld [vmem:[#allocation17 + $0x598] sm:$0xff] }
 0xb7d   :  { %6209 = vmatprep.subr.bf16.mxu1 %v6208_v9  ;;  %v3678_v9 = vld [vmem:[#allocation17 + $0x580] sm:$0xff] }
 0xb7e   :  { %6259 = vmatpush3.bf16.msra.mxu0 %v6258_v33  ;;  %v3436_v33 = vld [vmem:[#allocation19 + $0x440] sm:$0xff] }
 0xb7f   :  { %6261 = vmatprep.subr.bf16.mxu0 %v6260_v24  ;;  %v3438_v24 = vld [vmem:[#allocation19 + $0x450] sm:$0xff] }
 0xb82   :  { %6263 = vmatpush3.bf16.msra.mxu0 %v6262_v32  ;;  %v6210_v32 = vpack.c.bf16 %v3438_v24, %v3436_v33 }
 0xb84   :  { %6211 = vmatpush1.bf16.msra.mxu1 %v6210_v32 }
 0xb85   :  { %3651 = vmatmul.mubr.f32.vlgmr.msra.gmra.mrb[40].mxu0 %v7532_v44 }
 0xb86   :  { %3655 = vmatprep.mubr.f32.mxu0 %v7544_v57 }
 0xb89   :  { %3656 = vmatmul.mubr.f32.gmra.mrb[42].mxu0 %v7542_v2 }
 0xb8a   :  { %3880 = vmatprep.mubr.f32.mxu0 %v6939_v56 }
 0xb95   :  { %v1746_v41 = vpop.xlane.xlu0 %1745 }
 0xb96   :  { %vm1750_vm8 = vcmp.eq.f32.partialorder %v7629_v62, %v1746_v41  ;;  %v6214_v41 = vpack.c.bf16 %v3442_v38, %v3440_v30 }
 0xb97   :  { %v4672_v61 = vsel %vm1750_vm8, 1.0, %v6939_v56 }
 0xb98   :  { %v1770_v46 = vmul.f32 %v4672_v61, %v1768_v60  ;;  %v3445_v60 = vld [vmem:[#allocation19 + $0x488] sm:$0xff] }
 0xb99   :  { %v1749_v47 = vpop.xlane.xlu1 %1748  ;;  %v6216_v61 = vpack.c.bf16 %v3447_v58, %v3445_v60 }
 0xb9a   :  { %v7745_v20 = vadd.f32 %v1770_v46, %v1762_v11  ;;  %vm1751_vm9 = vcmp.eq.f32.partialorder %v7629_v62, %v1749_v47  ;;  %v6212_v62 = vpack.c.bf16 %v3443_v34, %v3441_v63  ;;  %v3444_v11 = vld [vmem:[#allocation19 + $0x480] sm:$0xff]  ;;  %v3446_v46 = vld [vmem:[#allocation19 + $0x490] sm:$0xff]  ;;  %v6948_v47 = vmov 7  }
 0xb9b   :  { %v4673_v51 = vsel %vm1751_vm9, 1.0, %v6939_v56  ;;  %v6218_v1 = vpack.c.bf16 %v3446_v46, %v3444_v11 }
 0xb9c   :  { %2470 = vperm.xlu1 %6551, %v7745_v20   ;;  %2113 = vperm.xlu0 %6550, %v7745_v20   ;;  %v1771_v7 = vmul.f32 %v4673_v51, %v1769_v4  ;;  %v3453_v51 = vld [vmem:[#allocation19 + $0x4c8] sm:$0xff]  ;;  %v3455_v4 = vld [vmem:[#allocation19 + $0x4d8] sm:$0xff] }
 0xb9d   :  { %6213 = vmatprep.subr.bf16.mxu1 %v6212_v62  ;;  %v6224_v53 = vpack.c.bf16 %v3455_v4, %v3453_v51  ;;  %v3662_v51 = vld [vmem:[#allocation17 + $0x500] sm:$0xff]  ;;  %v3663_v4 = vld [vmem:[#allocation17 + $0x508] sm:$0xff] }
 0xb9e   :  { %v7761_v59 = vadd.f32 %v1771_v7, %v1763_v54  ;;  %6215 = vmatpush1.bf16.msra.mxu1 %v6214_v41  ;;  %v3456_v7 = vld [vmem:[#allocation19 + $0x4e0] sm:$0xff] }
 0xb9f   :  { %6217 = vmatprep.subr.bf16.mxu1 %v6216_v61 }
 0xba0   :  { %6552 = vset.pattern.permute.xlu1 %v6944_v14  ;;  %6554 = vset.pattern.permute.xlu0 %v6945_v15 }
 0xba1   :  { %2826 = vperm.xlu1 %6552, %v7745_v20   ;;  %3538 = vperm.xlu0 %6554, %v7745_v20  }
 0xba2   :  { %6219 = vmatpush1.bf16.msra.mxu1 %v6218_v1 }
 0xba3   :  { %6221 = vmatprep.subr.bf16.mxu1 %v6220_v6 }
 0xba5   :  { %6553 = vset.pattern.permute.xlu1 %v6946_v36  ;;  %6562 = vset.pattern.permute.xlu0 %v6947_v37 }
 0xba6   :  { %3182 = vperm.xlu1 %6553, %v7745_v20   ;;  %3898 = vperm.xlu0 %6562, %v7761_v59  }
 0xba7   :  { %6223 = vmatpush1.bf16.msra.mxu1 %v6222_v52 }
 0xba8   :  { %6225 = vmatprep.subr.bf16.mxu1 %v6224_v53 }
 0xbaa   :  { %6555 = vset.pattern.permute.xlu1 %v6947_v37  ;;  %6564 = vset.pattern.permute.xlu0 %v6948_v47 }
 0xbab   :  { %3894 = vperm.xlu1 %6555, %v7745_v20   ;;  %4606 = vperm.xlu0 %6564, %v7745_v20  }
 0xbac   :  { %6227 = vmatpush1.bf16.msra.mxu1 %v6226_v5  ;;  %v3680_v5 = vld [vmem:[#allocation17 + $0x590] sm:$0xff] }
 0xbad   :  { %6229 = vmatprep.subr.bf16.mxu1 %v6228_v16 }
 0xbaf   :  { %6556 = vset.pattern.permute.xlu1 %v6949_v25 }
 0xbb0   :  { %4250 = vperm.xlu1 %6556, %v7745_v20   ;;  %v6230_v20 = vpack.c.bf16 %v3458_v8, %v3456_v7 }
 0xbb2   :  { %6231 = vmatpush1.bf16.msra.mxu1 %v6230_v20 }
 0xbb4   :  { %6557 = vset.pattern.permute.xlu1 %v6943_v27  ;;  %v6264_v27 = vpack.c.bf16 %v3679_v10, %v3678_v9  ;;  %v6266_v9 = vpack.c.bf16 %v3663_v4, %v3662_v51  ;;  %v3688_v51 = vld [vmem:[#allocation17 + $0x5d0] sm:$0xff]  ;;  %v3689_v4 = vld [vmem:[#allocation17 + $0x5d8] sm:$0xff] }
 0xbb5   :  { %2118 = vperm.xlu1 %6557, %v7761_v59  }
 0xbb6   :  { %6265 = vmatprep.subr.bf16.mxu1 %v6264_v27 }
 0xbb9   :  { %6558 = vset.pattern.permute.xlu1 %v6942_v26  ;;  %v3413_v26 = vsub.f32 0.0, %v7721_v18 }
 0xbba   :  { %2474 = vperm.xlu1 %6558, %v7761_v59  }
 0xbbb   :  { %v3415_v54 = vmul.f32 1.442695, %v3413_v26 }
 0xbbd   :  { %6634 = vpow2.f32 %v3415_v54 }
 0xbbe   :  { %6559 = vset.pattern.permute.xlu1 %v6944_v14  ;;  %v3414_v14 = vsub.f32 0.0, %v7723_v35 }
 0xbbf   :  { %2830 = vperm.xlu1 %6559, %v7761_v59  }
 0xbc0   :  { %v3417_v63 = vmul.f32 1.442695, %v3414_v14  ;;  %v3664_v14 = vld [vmem:[#allocation17 + $0x510] sm:$0xff] }
 0xbc2   :  { %6636 = vpow2.f32 %v3417_v63  ;;  %v3683_v63 = vld [vmem:[#allocation17 + $0x5a8] sm:$0xff] }
 0xbc3   :  { %6560 = vset.pattern.permute.xlu1 %v6946_v36 }
 0xbc4   :  { %3186 = vperm.xlu1 %6560, %v7761_v59  }
 0xbc8   :  { %6561 = vset.pattern.permute.xlu1 %v6945_v15 }
 0xbc9   :  { %3542 = vperm.xlu1 %6561, %v7761_v59  }
 0xbcd   :  { %6563 = vset.pattern.permute.xlu1 %v6949_v25 }
 0xbce   :  { %4254 = vperm.xlu1 %6563, %v7761_v59  }
 0xbd2   :  { %6565 = vset.pattern.permute.xlu1 %v6948_v47  ;;  %v6635_v47 = vpop.eup %6634 }
 0xbd3   :  { %4610 = vperm.xlu1 %6565, %v7761_v59   ;;  %v3419_v48 = vadd.f32 1.0, %v6635_v47  ;;  %v6637_v1 = vpop.eup %6636  ;;  %v3668_v47 = vld [vmem:[#allocation17 + $0x530] sm:$0xff] }
 0xbd4   :  { %v3420_v12 = vadd.f32 1.0, %v6637_v1 }
 0xbd5   :  { %6638 = vrcp.f32 %v3419_v48 }
 0xbd6   :  { %6640 = vrcp.f32 %v3420_v12 }
 0xc18   :  { %v3170_v33 = vpop.f32.mrb[32].mxu0 }
 0xc19   :  { %v3172_v24 = vpop.f32.mrb[33].mxu0 }
 0xc1b   :  { %v2471_v32 = vpop.permute.xlu1 %2470  ;;  %v2114_v34 = vpop.permute.xlu0 %2113 }
 0xc1c   :  { %v7781_v15 = vpop.f32.mrb[34].mxu0  ;;  %v2477_v36 = vmul.f32 %v2471_v32, %v7645_v19  ;;  %v2478_v37 = vmul.f32 %v2471_v32, %v7647_v0  ;;  %v2121_v62 = vmul.f32 %v2114_v34, %v7594_v39  ;;  %v2122_v59 = vmul.f32 %v2114_v34, %v7596_v40 }
 0xc1d   :  { %v7787_v30 = vpop.f32.mrb[35].mxu0 }
 0xc1e   :  { %v2481_v38 = vadd.f32 %v2477_v36, %v2121_v62  ;;  %v2482_v41 = vadd.f32 %v2478_v37, %v2122_v59  ;;  %v3666_v59 = vld [vmem:[#allocation17 + $0x520] sm:$0xff] }
 0xc20   :  { %v2827_v60 = vpop.permute.xlu1 %2826 }
 0xc21   :  { %v2833_v58 = vmul.f32 %v2827_v60, %v7707_v23  ;;  %v2834_v61 = vmul.f32 %v2827_v60, %v7711_v28  ;;  %v6639_v28 = vpop.eup %6638 }
 0xc22   :  { %v3423_v52 = vmul.f32 %v6639_v28, %v7721_v18  ;;  %v6641_v20 = vpop.eup %6640  ;;  %v6268_v18 = vpack.c.bf16 %v3681_v49, %v3680_v5  ;;  %v3670_v28 = vld [vmem:[#allocation17 + $0x540] sm:$0xff] }
 0xc23   :  { %v2837_v11 = vadd.f32 %v2833_v58, %v2481_v38  ;;  %v2838_v46 = vadd.f32 %v2834_v61, %v2482_v41  ;;  %v3424_v32 = vmul.f32 %v6641_v20, %v7723_v35  ;;  %v3667_v38 = vld [vmem:[#allocation17 + $0x528] sm:$0xff]  ;;  %v3684_v58 = vld [vmem:[#allocation17 + $0x5b0] sm:$0xff]  ;;  %v3685_v35 = vld [vmem:[#allocation17 + $0x5b8] sm:$0xff] }
 0xc24   :  { %v6274_v61 = vpack.c.bf16 %v3667_v38, %v3666_v59  ;;  %v3930_v38 = vld [vmem:[#allocation16 + $0x6a0] sm:$0xff] }
 0xc25   :  { %v3183_v19 = vpop.permute.xlu1 %3182 }
 0xc26   :  { %v3189_v3 = vmul.f32 %v3183_v19, %v3170_v33  ;;  %v3190_v0 = vmul.f32 %v3183_v19, %v3172_v24  ;;  %v3665_v33 = vld [vmem:[#allocation17 + $0x518] sm:$0xff]  ;;  %v3682_v24 = vld [vmem:[#allocation17 + $0x5a0] sm:$0xff] }
 0xc27   :  { %v6272_v62 = vpack.c.bf16 %v3683_v63, %v3682_v24  ;;  %v3669_v19 = vld [vmem:[#allocation17 + $0x538] sm:$0xff]  ;;  %v3911_v24 = vld [vmem:[#allocation16 + $0x608] sm:$0xff] }
 0xc28   :  { %v7791_v39 = vadd.f32 %v3189_v3, %v2837_v11  ;;  %v7793_v40 = vadd.f32 %v3190_v0, %v2838_v46  ;;  %v6276_v46 = vpack.c.bf16 %v3685_v35, %v3684_v58  ;;  %v3686_v3 = vld [vmem:[#allocation17 + $0x5c0] sm:$0xff]  ;;  %v3687_v0 = vld [vmem:[#allocation17 + $0x5c8] sm:$0xff]  ;;  %v6278_v12 = vpack.c.bf16 %v3669_v19, %v3668_v47  ;;  %v3916_v19 = vld [vmem:[#allocation16 + $0x630] sm:$0xff] }
 0xc2a   :  { %v7795_v6 = vpop.permute.xlu1 %3894 }
 0xc2f   :  { %v7797_v50 = vpop.permute.xlu1 %4250 }
 0xc34   :  { %v2119_v23 = vpop.permute.xlu1 %2118 }
 0xc35   :  { %v2123_v55 = vmul.f32 %v2119_v23, %v7598_v42  ;;  %v2124_v16 = vmul.f32 %v2119_v23, %v7600_v43  ;;  %v6280_v23 = vpack.c.bf16 %v3687_v0, %v3686_v3  ;;  %v3917_v3 = vld [vmem:[#allocation16 + $0x638] sm:$0xff]  ;;  %v3934_v0 = vld [vmem:[#allocation16 + $0x6c0] sm:$0xff] }
 0xc38   :  { %v5254_v25 = vpop.f32.mrb[36].mxu0 }
 0xc39   :  { %v5255_v53 = vpop.f32.mrb[37].mxu0  ;;  %v2475_v17 = vpop.permute.xlu1 %2474 }
 0xc3a   :  { %v5256_v13 = vadd.f32 %v5255_v53, %v5254_v25  ;;  %v2479_v7 = vmul.f32 %v2475_v17, %v7649_v21  ;;  %v2480_v8 = vmul.f32 %v2475_v17, %v7651_v22  ;;  %v6270_v21 = vpack.c.bf16 %v3665_v33, %v3664_v14  ;;  %v3671_v25 = vld [vmem:[#allocation17 + $0x548] sm:$0xff]  ;;  %v3673_v53 = vld [vmem:[#allocation17 + $0x558] sm:$0xff] }
 0xc3b   :  { %v3691_v17 = vld [vmem:[#allocation17 + $0x5e8] sm:$0xff] }
 0xc3c   :  { %v3425_v10 = vmul.f32 %v5256_v13, %v3423_v52  ;;  %v5257_v27 = vpop.f32.mrb[38].mxu0  ;;  %v2483_v26 = vadd.f32 %v2479_v7, %v2123_v55  ;;  %v2484_v54 = vadd.f32 %v2480_v8, %v2124_v16  ;;  %v3672_v52 = vld [vmem:[#allocation17 + $0x550] sm:$0xff]  ;;  %v3690_v55 = vld [vmem:[#allocation17 + $0x5e0] sm:$0xff]  ;;  %v3675_v16 = vld [vmem:[#allocation17 + $0x568] sm:$0xff] }
 0xc3d   :  { %v5258_v42 = vpop.f32.mrb[39].mxu0  ;;  %v6286_v5 = vpack.c.bf16 %v3673_v53, %v3672_v52  ;;  %v6288_v49 = vpack.c.bf16 %v3691_v17, %v3690_v55  ;;  %v3674_v13 = vld [vmem:[#allocation17 + $0x560] sm:$0xff]  ;;  %v3692_v7 = vld [vmem:[#allocation17 + $0x5f0] sm:$0xff]  ;;  %v3693_v8 = vld [vmem:[#allocation17 + $0x5f8] sm:$0xff] }
 0xc3e   :  { %v5259_v34 = vadd.f32 %v5258_v42, %v5257_v27  ;;  %3525 = vmatmul.mubr.f32.vlgmr.msra.gmra.mrb[56].mxu1 %v3425_v10  ;;  %v2831_v43 = vpop.permute.xlu1 %2830  ;;  %v6290_v20 = vpack.c.bf16 %v3675_v16, %v3674_v13  ;;  %v3676_v10 = vld [vmem:[#allocation17 + $0x570] sm:$0xff]  ;;  %v3677_v27 = vld [vmem:[#allocation17 + $0x578] sm:$0xff]  ;;  %v3910_v42 = vld [vmem:[#allocation16 + $0x600] sm:$0xff] }
 0xc3f   :  { %6267 = vmatpush3.bf16.msra.mxu1 %v6266_v9  ;;  %3530 = vmatprep.mubr.f32.mxu1 %v6939_v56  ;;  %v2835_v22 = vmul.f32 %v2831_v43, %v7713_v29  ;;  %v2836_v36 = vmul.f32 %v2831_v43, %v7715_v31  ;;  %v6292_v9 = vpack.c.bf16 %v3693_v8, %v3692_v7  ;;  %v3920_v53 = vld [vmem:[#allocation16 + $0x650] sm:$0xff]  ;;  %v3921_v55 = vld [vmem:[#allocation16 + $0x658] sm:$0xff]  ;;  %v3938_v17 = vld [vmem:[#allocation16 + $0x6e0] sm:$0xff] }
 0xc40   :  { %v3426_v37 = vmul.f32 %v5259_v34, %v3424_v32  ;;  %6269 = vmatprep.subr.bf16.mxu1 %v6268_v18  ;;  %v6294_v18 = vpack.c.bf16 %v3677_v27, %v3676_v10  ;;  %v3928_v32 = vld [vmem:[#allocation16 + $0x690] sm:$0xff]  ;;  %v3929_v34 = vld [vmem:[#allocation16 + $0x698] sm:$0xff]  ;;  %v3922_v16 = vld [vmem:[#allocation16 + $0x660] sm:$0xff] }
 0xc41   :  { %v2839_v41 = vadd.f32 %v2835_v22, %v2483_v26  ;;  %v2840_v60 = vadd.f32 %v2836_v36, %v2484_v54  ;;  %v3926_v26 = vld [vmem:[#allocation16 + $0x680] sm:$0xff]  ;;  %v3927_v54 = vld [vmem:[#allocation16 + $0x688] sm:$0xff]  ;;  %v6332_v36 = vpack.c.bf16 %v3929_v34, %v3928_v32  ;;  %v3940_v8 = vld [vmem:[#allocation16 + $0x6f0] sm:$0xff] }
 0xc42   :  { %3531 = vmatmul.mubr.f32.gmra.mrb[58].mxu1 %v3426_v37  ;;  %v6328_v33 = vpack.c.bf16 %v3927_v54, %v3926_v26  ;;  %v3912_v37 = vld [vmem:[#allocation16 + $0x610] sm:$0xff]  ;;  %v3923_v7 = vld [vmem:[#allocation16 + $0x668] sm:$0xff]  ;;  %v3925_v26 = vld [vmem:[#allocation16 + $0x678] sm:$0xff] }
 0xc43   :  { %6271 = vmatpush3.bf16.msra.mxu1 %v6270_v21  ;;  %3758 = vmatprep.mubr.f32.mxu1 %v7534_v45  ;;  %v3187_v11 = vpop.permute.xlu1 %3186  ;;  %v6330_v21 = vpack.c.bf16 %v3911_v24, %v3910_v42  ;;  %v3924_v27 = vld [vmem:[#allocation16 + $0x670] sm:$0xff]  ;;  %v3784_v42 = vld [vmem:[#allocation19 + $0x500] sm:$0xff]  ;;  %v3789_v32 = vld [vmem:[#allocation19 + $0x528] sm:$0xff] }
 0xc44   :  { %6273 = vmatprep.subr.bf16.mxu1 %v6272_v62  ;;  %v3191_v29 = vmul.f32 %v3187_v11, %v7781_v15  ;;  %v3192_v31 = vmul.f32 %v3187_v11, %v7787_v30  ;;  %v6282_v15 = vpack.c.bf16 %v3671_v25, %v3670_v28  ;;  %v6284_v30 = vpack.c.bf16 %v3689_v4, %v3688_v51  ;;  %v3913_v62 = vld [vmem:[#allocation16 + $0x618] sm:$0xff]  ;;  %v3915_v11 = vld [vmem:[#allocation16 + $0x628] sm:$0xff]  ;;  %v3918_v25 = vld [vmem:[#allocation16 + $0x640] sm:$0xff] }
 0xc45   :  { %v6334_v58 = vpack.c.bf16 %v3913_v62, %v3912_v37  ;;  %v3919_v51 = vld [vmem:[#allocation16 + $0x648] sm:$0xff]  ;;  %v3936_v4 = vld [vmem:[#allocation16 + $0x6d0] sm:$0xff]  ;;  %v6358_v54 = vpack.c.bf16 %v3925_v26, %v3924_v27  ;;  %v3791_v34 = vld [vmem:[#allocation19 + $0x538] sm:$0xff] }
 0xc46   :  { %v7811_v48 = vadd.f32 %v3191_v29, %v2839_v41  ;;  %v7813_v1 = vadd.f32 %v3192_v31, %v2840_v60  ;;  %v3931_v41 = vld [vmem:[#allocation16 + $0x6a8] sm:$0xff]  ;;  %v3932_v29 = vld [vmem:[#allocation16 + $0x6b0] sm:$0xff]  ;;  %v3933_v31 = vld [vmem:[#allocation16 + $0x6b8] sm:$0xff] }
 0xc47   :  { %6275 = vmatpush3.bf16.msra.mxu1 %v6274_v61  ;;  %v6336_v35 = vpack.c.bf16 %v3931_v41, %v3930_v38  ;;  %v3914_v61 = vld [vmem:[#allocation16 + $0x620] sm:$0xff]  ;;  %v6340_v47 = vpack.c.bf16 %v3933_v31, %v3932_v29  ;;  %v3786_v24 = vld [vmem:[#allocation19 + $0x510] sm:$0xff]  ;;  %v3793_v62 = vld [vmem:[#allocation19 + $0x548] sm:$0xff] }
 0xc48   :  { %6277 = vmatprep.subr.bf16.mxu1 %v6276_v46  ;;  %v6338_v46 = vpack.c.bf16 %v3915_v11, %v3914_v61  ;;  %v3792_v38 = vld [vmem:[#allocation19 + $0x540] sm:$0xff]  ;;  %v3799_v61 = vld [vmem:[#allocation19 + $0x578] sm:$0xff]  ;;  %v4035_v26 = vld [vmem:[#allocation17 + $0x688] sm:$0xff] }
 0xc49   :  { %v3796_v31 = vld [vmem:[#allocation19 + $0x560] sm:$0xff] }
 0xc4a   :  { %v4034_v27 = vld [vmem:[#allocation17 + $0x680] sm:$0xff] }
 0xc4b   :  { %6279 = vmatpush3.bf16.msra.mxu1 %v6278_v12  ;;  %v3935_v12 = vld [vmem:[#allocation16 + $0x6c8] sm:$0xff] }
 0xc4c   :  { %6281 = vmatprep.subr.bf16.mxu1 %v6280_v23  ;;  %v6342_v23 = vpack.c.bf16 %v3917_v3, %v3916_v19  ;;  %v6344_v28 = vpack.c.bf16 %v3935_v12, %v3934_v0  ;;  %v3803_v19 = vld [vmem:[#allocation19 + $0x598] sm:$0xff]  ;;  %v3800_v12 = vld [vmem:[#allocation19 + $0x580] sm:$0xff] }
 0xc4f   :  { %6283 = vmatpush3.bf16.msra.mxu1 %v6282_v15  ;;  %v3937_v15 = vld [vmem:[#allocation16 + $0x6d8] sm:$0xff] }
 0xc50   :  { %6285 = vmatprep.subr.bf16.mxu1 %v6284_v30  ;;  %v6346_v30 = vpack.c.bf16 %v3919_v51, %v3918_v25  ;;  %v6348_v52 = vpack.c.bf16 %v3937_v15, %v3936_v4  ;;  %v3807_v25 = vld [vmem:[#allocation19 + $0x5b8] sm:$0xff]  ;;  %v3804_v15 = vld [vmem:[#allocation19 + $0x5a0] sm:$0xff] }
 0xc53   :  { %6287 = vmatpush3.bf16.msra.mxu1 %v6286_v5  ;;  %v3939_v5 = vld [vmem:[#allocation16 + $0x6e8] sm:$0xff] }
 0xc54   :  { %6289 = vmatprep.subr.bf16.mxu1 %v6288_v49  ;;  %v6350_v49 = vpack.c.bf16 %v3921_v55, %v3920_v53  ;;  %v6352_v13 = vpack.c.bf16 %v3939_v5, %v3938_v17  ;;  %v3811_v53 = vld [vmem:[#allocation19 + $0x5d8] sm:$0xff]  ;;  %v3808_v5 = vld [vmem:[#allocation19 + $0x5c0] sm:$0xff] }
 0xc57   :  { %6291 = vmatpush3.bf16.msra.mxu1 %v6290_v20  ;;  %v3941_v20 = vld [vmem:[#allocation16 + $0x6f8] sm:$0xff] }
 0xc58   :  { %v5292_v14 = vpop.f32.mrb[40].mxu0  ;;  %6293 = vmatprep.subr.bf16.mxu1 %v6292_v9  ;;  %v6354_v9 = vpack.c.bf16 %v3923_v7, %v3922_v16  ;;  %v6356_v10 = vpack.c.bf16 %v3941_v20, %v3940_v8  ;;  %v3813_v16 = vld [vmem:[#allocation19 + $0x5e8] sm:$0xff]  ;;  %v3815_v7 = vld [vmem:[#allocation19 + $0x5f8] sm:$0xff]  ;;  %v3812_v20 = vld [vmem:[#allocation19 + $0x5e0] sm:$0xff] }
 0xc59   :  { %v5293_v63 = vpop.f32.mrb[41].mxu0  ;;  %v6324_v8 = vpack.c.bf16 %v3815_v7, %v3813_v16  ;;  %v4023_v16 = vld [vmem:[#allocation17 + $0x628] sm:$0xff]  ;;  %v4040_v7 = vld [vmem:[#allocation17 + $0x6b0] sm:$0xff] }
 0xc5a   :  { %v7815_v43 = vadd.f32 %v5293_v63, %v5292_v14  ;;  %v3787_v14 = vld [vmem:[#allocation19 + $0x518] sm:$0xff]  ;;  %v6298_v63 = vpack.c.bf16 %v3786_v24, %v3784_v42 }
 0xc5b   :  { %6295 = vmatpush3.bf16.msra.mxu1 %v6294_v18  ;;  %v3785_v18 = vld [vmem:[#allocation19 + $0x508] sm:$0xff] }
 0xc5c   :  { %v5295_v22 = vpop.f32.mrb[42].mxu0  ;;  %6329 = vmatprep.subr.bf16.mxu1 %v6328_v33  ;;  %v6296_v33 = vpack.c.bf16 %v3787_v14, %v3785_v18  ;;  %v3769_v18 = vsub.f32 0.0, %v7815_v43  ;;  %v3539_v14 = vpop.permute.xlu0 %3538 }
 0xc5d   :  { %v5296_v59 = vpop.f32.mrb[43].mxu0 }
 0xc5e   :  { %v7817_v60 = vadd.f32 %v5296_v59, %v5295_v22  ;;  %3759 = vmatmul.mubr.f32.vlgmr.msra.gmra.mrb[60].mxu1 %v7532_v44  ;;  %6297 = vmatprep.subr.bf16.mxu0 %v6296_v33  ;;  %v3788_v22 = vld [vmem:[#allocation19 + $0x520] sm:$0xff]  ;;  %v3795_v59 = vld [vmem:[#allocation19 + $0x558] sm:$0xff]  ;;  %v3771_v33 = vmul.f32 1.442695, %v3769_v18 }
 0xc5f   :  { %3763 = vmatprep.mubr.f32.mxu1 %v7544_v57  ;;  %6331 = vmatpush3.bf16.msra.mxu1 %v6330_v21  ;;  %v6300_v21 = vpack.c.bf16 %v3791_v34, %v3789_v32  ;;  %v6304_v41 = vpack.c.bf16 %v3795_v59, %v3793_v62 }
 0xc60   :  { %6333 = vmatprep.subr.bf16.mxu1 %v6332_v36  ;;  %6299 = vmatpush1.bf16.msra.mxu0 %v6298_v63  ;;  %v3790_v36 = vld [vmem:[#allocation19 + $0x530] sm:$0xff]  ;;  %v3770_v42 = vsub.f32 0.0, %v7817_v60  ;;  %6642 = vpow2.f32 %v3771_v33  ;;  %v4027_v33 = vld [vmem:[#allocation17 + $0x648] sm:$0xff] }
 0xc61   :  { %v6302_v37 = vpack.c.bf16 %v3790_v36, %v3788_v22  ;;  %6301 = vmatprep.subr.bf16.mxu0 %v6300_v21  ;;  %v3543_v22 = vpop.permute.xlu1 %3542 }
 0xc62   :  { %3764 = vmatmul.mubr.f32.gmra.mrb[62].mxu1 %v7542_v2  ;;  %v3773_v36 = vmul.f32 1.442695, %v3770_v42  ;;  %v4044_v42 = vld [vmem:[#allocation17 + $0x6d0] sm:$0xff] }
 0xc63   :  { %6335 = vmatpush3.bf16.msra.mxu1 %v6334_v58  ;;  %4006 = vmatprep.mubr.f32.mxu1 %v7534_v45  ;;  %v3794_v58 = vld [vmem:[#allocation19 + $0x550] sm:$0xff] }
 0xc64   :  { %6337 = vmatprep.subr.bf16.mxu1 %v6336_v35  ;;  %v3797_v35 = vld [vmem:[#allocation19 + $0x568] sm:$0xff]  ;;  %6303 = vmatpush1.bf16.msra.mxu0 %v6302_v37  ;;  %v6306_v11 = vpack.c.bf16 %v3794_v58, %v3792_v38  ;;  %6644 = vpow2.f32 %v3773_v36  ;;  %v4046_v36 = vld [vmem:[#allocation17 + $0x6e0] sm:$0xff] }
 0xc65   :  { %6305 = vmatprep.subr.bf16.mxu0 %v6304_v41  ;;  %v6308_v29 = vpack.c.bf16 %v3799_v61, %v3797_v35 }
 0xc67   :  { %6339 = vmatpush3.bf16.msra.mxu1 %v6338_v46  ;;  %v3798_v46 = vld [vmem:[#allocation19 + $0x570] sm:$0xff] }
 0xc68   :  { %6341 = vmatprep.subr.bf16.mxu1 %v6340_v47  ;;  %v3801_v47 = vld [vmem:[#allocation19 + $0x588] sm:$0xff]  ;;  %6307 = vmatpush1.bf16.msra.mxu0 %v6306_v11  ;;  %v6310_v3 = vpack.c.bf16 %v3798_v46, %v3796_v31  ;;  %v4018_v46 = vld [vmem:[#allocation17 + $0x600] sm:$0xff] }
 0xc69   :  { %6309 = vmatprep.subr.bf16.mxu0 %v6308_v29  ;;  %v6312_v0 = vpack.c.bf16 %v3803_v19, %v3801_v47  ;;  %v4019_v47 = vld [vmem:[#allocation17 + $0x608] sm:$0xff] }
 0xc6a   :  { %v6643_v61 = vpop.eup %6642 }
 0xc6b   :  { %6343 = vmatpush3.bf16.msra.mxu1 %v6342_v23  ;;  %v3802_v23 = vld [vmem:[#allocation19 + $0x590] sm:$0xff] }
 0xc6c   :  { %6345 = vmatprep.subr.bf16.mxu1 %v6344_v28  ;;  %v3805_v28 = vld [vmem:[#allocation19 + $0x5a8] sm:$0xff]  ;;  %6311 = vmatpush1.bf16.msra.mxu0 %v6310_v3  ;;  %v6314_v51 = vpack.c.bf16 %v3802_v23, %v3800_v12  ;;  %v4036_v3 = vld [vmem:[#allocation17 + $0x690] sm:$0xff] }
 0xc6d   :  { %6313 = vmatprep.subr.bf16.mxu0 %v6312_v0  ;;  %v6316_v4 = vpack.c.bf16 %v3807_v25, %v3805_v28  ;;  %v4037_v0 = vld [vmem:[#allocation17 + $0x698] sm:$0xff]  ;;  %v6362_v28 = vpack.c.bf16 %v4019_v47, %v4018_v46  ;;  %v4282_v47 = vld [vmem:[#allocation16 + $0x780] sm:$0xff] }
 0xc6e   :  { %v6645_v11 = vpop.eup %6644  ;;  %v4033_v46 = vld [vmem:[#allocation17 + $0x678] sm:$0xff] }
 0xc6f   :  { %6347 = vmatpush3.bf16.msra.mxu1 %v6346_v30  ;;  %v3806_v30 = vld [vmem:[#allocation19 + $0x5b0] sm:$0xff]  ;;  %v3776_v29 = vadd.f32 1.0, %v6645_v11  ;;  %v4049_v11 = vld [vmem:[#allocation17 + $0x6f8] sm:$0xff] }
 0xc70   :  { %6349 = vmatprep.subr.bf16.mxu1 %v6348_v52  ;;  %v3809_v52 = vld [vmem:[#allocation19 + $0x5c8] sm:$0xff]  ;;  %6315 = vmatpush1.bf16.msra.mxu0 %v6314_v51  ;;  %v6318_v55 = vpack.c.bf16 %v3806_v30, %v3804_v15  ;;  %v6364_v51 = vpack.c.bf16 %v4037_v0, %v4036_v3  ;;  %v4021_v15 = vld [vmem:[#allocation17 + $0x618] sm:$0xff] }
 0xc71   :  { %6317 = vmatprep.subr.bf16.mxu0 %v6316_v4  ;;  %v6320_v17 = vpack.c.bf16 %v3811_v53, %v3809_v52  ;;  %v4020_v4 = vld [vmem:[#allocation17 + $0x610] sm:$0xff]  ;;  %v4038_v52 = vld [vmem:[#allocation17 + $0x6a0] sm:$0xff]  ;;  %v4039_v53 = vld [vmem:[#allocation17 + $0x6a8] sm:$0xff] }
 0xc73   :  { %6351 = vmatpush3.bf16.msra.mxu1 %v6350_v49  ;;  %v3810_v49 = vld [vmem:[#allocation19 + $0x5d0] sm:$0xff] }
 0xc74   :  { %6353 = vmatprep.subr.bf16.mxu1 %v6352_v13  ;;  %6319 = vmatpush1.bf16.msra.mxu0 %v6318_v55  ;;  %v6322_v13 = vpack.c.bf16 %v3810_v49, %v3808_v5  ;;  %v6366_v5 = vpack.c.bf16 %v4021_v15, %v4020_v4  ;;  %v6368_v49 = vpack.c.bf16 %v4039_v53, %v4038_v52  ;;  %v4268_v52 = vld [vmem:[#allocation16 + $0x710] sm:$0xff]  ;;  %v4269_v53 = vld [vmem:[#allocation16 + $0x718] sm:$0xff] }
 0xc75   :  { %6321 = vmatprep.subr.bf16.mxu0 %v6320_v17 }
 0xc77   :  { %6355 = vmatpush3.bf16.msra.mxu1 %v6354_v9  ;;  %v3814_v9 = vld [vmem:[#allocation19 + $0x5f0] sm:$0xff] }
 0xc78   :  { %6357 = vmatprep.subr.bf16.mxu1 %v6356_v10  ;;  %6323 = vmatpush1.bf16.msra.mxu0 %v6322_v13  ;;  %v6326_v10 = vpack.c.bf16 %v3814_v9, %v3812_v20  ;;  %v4022_v13 = vld [vmem:[#allocation17 + $0x620] sm:$0xff]  ;;  %v4024_v9 = vld [vmem:[#allocation17 + $0x630] sm:$0xff] }
 0xc79   :  { %6325 = vmatprep.subr.bf16.mxu0 %v6324_v8  ;;  %v4041_v8 = vld [vmem:[#allocation17 + $0x6b8] sm:$0xff]  ;;  %v6370_v20 = vpack.c.bf16 %v4023_v16, %v4022_v13  ;;  %v4270_v16 = vld [vmem:[#allocation16 + $0x720] sm:$0xff] }
 0xc7b   :  { %6359 = vmatpush3.bf16.msra.mxu1 %v6358_v54  ;;  %v6360_v54 = vpack.c.bf16 %v4035_v26, %v4034_v27  ;;  %v4042_v27 = vld [vmem:[#allocation17 + $0x6c0] sm:$0xff]  ;;  %v4043_v26 = vld [vmem:[#allocation17 + $0x6c8] sm:$0xff] }
 0xc7c   :  { %6327 = vmatpush1.bf16.msra.mxu0 %v6326_v10  ;;  %v4025_v10 = vld [vmem:[#allocation17 + $0x638] sm:$0xff]  ;;  %v6376_v18 = vpack.c.bf16 %v4043_v26, %v4042_v27  ;;  %v4290_v26 = vld [vmem:[#allocation16 + $0x7c0] sm:$0xff] }
 0xc7d   :  { %6361 = vmatprep.subr.bf16.mxu0 %v6360_v54  ;;  %v6374_v54 = vpack.c.bf16 %v4025_v10, %v4024_v9  ;;  %v4272_v10 = vld [vmem:[#allocation16 + $0x730] sm:$0xff]  ;;  %v4273_v27 = vld [vmem:[#allocation16 + $0x738] sm:$0xff] }
 0xc7e   :  { %4007 = vmatmul.mubr.f32.vlgmr.msra.gmra.mrb[64].mxu1 %v7532_v44 }
 0xc7f   :  { %4011 = vmatprep.mubr.f32.mxu1 %v7544_v57 }
 0xc82   :  { %4012 = vmatmul.mubr.f32.gmra.mrb[66].mxu1 %v7542_v2 }
 0xc83   :  { %4236 = vmatprep.mubr.f32.mxu1 %v6939_v56 }
 0xd11   :  { %v3526_v24 = vpop.f32.mrb[56].mxu1 }
 0xd12   :  { %v3545_v63 = vmul.f32 %v3539_v14, %v3526_v24  ;;  %v3528_v32 = vpop.f32.mrb[57].mxu1  ;;  %v4045_v24 = vld [vmem:[#allocation17 + $0x6d8] sm:$0xff] }
 0xd13   :  { %v3546_v34 = vmul.f32 %v3539_v14, %v3528_v32  ;;  %v4026_v14 = vld [vmem:[#allocation17 + $0x640] sm:$0xff]  ;;  %v6380_v32 = vpack.c.bf16 %v4045_v24, %v4044_v42  ;;  %v4275_v42 = vld [vmem:[#allocation16 + $0x748] sm:$0xff]  ;;  %v4292_v24 = vld [vmem:[#allocation16 + $0x7d0] sm:$0xff] }
 0xd14   :  { %v7830_v21 = vadd.f32 %v3545_v63, %v7791_v39  ;;  %v3775_v39 = vadd.f32 1.0, %v6643_v61  ;;  %v6378_v63 = vpack.c.bf16 %v4027_v33, %v4026_v14  ;;  %v4031_v61 = vld [vmem:[#allocation17 + $0x668] sm:$0xff]  ;;  %v4274_v33 = vld [vmem:[#allocation16 + $0x740] sm:$0xff] }
 0xd15   :  { %v7833_v37 = vadd.f32 %v3546_v34, %v7793_v40  ;;  %v3532_v62 = vpop.f32.mrb[58].mxu1  ;;  %v4028_v34 = vld [vmem:[#allocation17 + $0x650] sm:$0xff] }
 0xd16   :  { %v3547_v59 = vmul.f32 %v3543_v22, %v3532_v62  ;;  %v3534_v38 = vpop.f32.mrb[59].mxu1  ;;  %6646 = vrcp.f32 %v3775_v39  ;;  %v4047_v62 = vld [vmem:[#allocation17 + $0x6e8] sm:$0xff]  ;;  %v4048_v39 = vld [vmem:[#allocation17 + $0x6f0] sm:$0xff] }
 0xd17   :  { %v3548_v41 = vmul.f32 %v3543_v22, %v3534_v38  ;;  %6648 = vrcp.f32 %v3776_v29  ;;  %v4029_v22 = vld [vmem:[#allocation17 + $0x658] sm:$0xff]  ;;  %v6384_v38 = vpack.c.bf16 %v4047_v62, %v4046_v36  ;;  %v4294_v62 = vld [vmem:[#allocation16 + $0x7e0] sm:$0xff] }
 0xd18   :  { %v7836_v58 = vadd.f32 %v3547_v59, %v7811_v48  ;;  %v6382_v59 = vpack.c.bf16 %v4029_v22, %v4028_v34  ;;  %v4276_v22 = vld [vmem:[#allocation16 + $0x750] sm:$0xff]  ;;  %v4277_v36 = vld [vmem:[#allocation16 + $0x758] sm:$0xff] }
 0xd19   :  { %v7839_v35 = vadd.f32 %v3548_v41, %v7813_v1  ;;  %v4030_v41 = vld [vmem:[#allocation17 + $0x660] sm:$0xff] }
 0xd1a   :  { %v6386_v29 = vpack.c.bf16 %v4031_v61, %v4030_v41  ;;  %v4278_v61 = vld [vmem:[#allocation16 + $0x760] sm:$0xff] }
 0xd20   :  { %v6647_v31 = vpop.eup %6646 }
 0xd21   :  { %v3779_v48 = vmul.f32 %v6647_v31, %v7815_v43  ;;  %v6649_v23 = vpop.eup %6648  ;;  %v6388_v31 = vpack.c.bf16 %v4049_v11, %v4048_v39  ;;  %v4279_v39 = vld [vmem:[#allocation16 + $0x768] sm:$0xff]  ;;  %v4296_v11 = vld [vmem:[#allocation16 + $0x7f0] sm:$0xff] }
 0xd22   :  { %v3780_v55 = vmul.f32 %v6649_v23, %v7817_v60  ;;  %v6372_v60 = vpack.c.bf16 %v4041_v8, %v4040_v7  ;;  %v4267_v23 = vld [vmem:[#allocation16 + $0x708] sm:$0xff]  ;;  %v4288_v8 = vld [vmem:[#allocation16 + $0x7b0] sm:$0xff] }
 0xd23   :  { %v4271_v7 = vld [vmem:[#allocation16 + $0x728] sm:$0xff] }
 0xd31   :  { %v5330_v40 = vpop.f32.mrb[60].mxu1 }
 0xd32   :  { %v5331_v19 = vpop.f32.mrb[61].mxu1 }
 0xd33   :  { %v5332_v12 = vadd.f32 %v5331_v19, %v5330_v40  ;;  %v4032_v40 = vld [vmem:[#allocation17 + $0x670] sm:$0xff]  ;;  %v4283_v19 = vld [vmem:[#allocation16 + $0x788] sm:$0xff] }
 0xd34   :  { %v6390_v3 = vpack.c.bf16 %v4033_v46, %v4032_v40  ;;  %v4280_v46 = vld [vmem:[#allocation16 + $0x770] sm:$0xff] }
 0xd35   :  { %v3781_v1 = vmul.f32 %v5332_v12, %v3779_v48  ;;  %v5333_v25 = vpop.f32.mrb[62].mxu1  ;;  %v6424_v48 = vpack.c.bf16 %v4283_v19, %v4282_v47  ;;  %v4266_v12 = vld [vmem:[#allocation16 + $0x700] sm:$0xff]  ;;  %v4281_v47 = vld [vmem:[#allocation16 + $0x778] sm:$0xff] }
 0xd36   :  { %v5334_v30 = vpop.f32.mrb[63].mxu1  ;;  %v6426_v4 = vpack.c.bf16 %v4267_v23, %v4266_v12  ;;  %v6454_v19 = vpack.c.bf16 %v4281_v47, %v4280_v46  ;;  %v4140_v12 = vld [vmem:[#allocation19 + $0x600] sm:$0xff]  ;;  %v4142_v23 = vld [vmem:[#allocation19 + $0x610] sm:$0xff]  ;;  %v4391_v47 = vld [vmem:[#allocation17 + $0x788] sm:$0xff] }
 0xd37   :  { %v5335_v17 = vadd.f32 %v5334_v30, %v5333_v25  ;;  %3881 = vmatmul.mubr.f32.vlgmr.msra.gmra.mrb[44].mxu0 %v3781_v1  ;;  %v4284_v1 = vld [vmem:[#allocation16 + $0x790] sm:$0xff]  ;;  %v4285_v25 = vld [vmem:[#allocation16 + $0x798] sm:$0xff]  ;;  %v4390_v46 = vld [vmem:[#allocation17 + $0x780] sm:$0xff] }
 0xd38   :  { %6363 = vmatpush3.bf16.msra.mxu0 %v6362_v28  ;;  %3886 = vmatprep.mubr.f32.mxu0 %v6939_v56  ;;  %v6428_v30 = vpack.c.bf16 %v4285_v25, %v4284_v1  ;;  %v4145_v1 = vld [vmem:[#allocation19 + $0x628] sm:$0xff]  ;;  %v4147_v25 = vld [vmem:[#allocation19 + $0x638] sm:$0xff] }
 0xd39   :  { %v3782_v43 = vmul.f32 %v5335_v17, %v3780_v55  ;;  %6365 = vmatprep.subr.bf16.mxu0 %v6364_v51  ;;  %v4286_v17 = vld [vmem:[#allocation16 + $0x7a0] sm:$0xff] }
 0xd3b   :  { %3887 = vmatmul.mubr.f32.gmra.mrb[46].mxu0 %v3782_v43 }
 0xd3c   :  { %6367 = vmatpush3.bf16.msra.mxu0 %v6366_v5  ;;  %4114 = vmatprep.mubr.f32.mxu0 %v7534_v45  ;;  %v4287_v5 = vld [vmem:[#allocation16 + $0x7a8] sm:$0xff] }
 0xd3d   :  { %6369 = vmatprep.subr.bf16.mxu0 %v6368_v49  ;;  %v6430_v49 = vpack.c.bf16 %v4269_v53, %v4268_v52  ;;  %v6432_v13 = vpack.c.bf16 %v4287_v5, %v4286_v17  ;;  %v4149_v53 = vld [vmem:[#allocation19 + $0x648] sm:$0xff]  ;;  %v4148_v17 = vld [vmem:[#allocation19 + $0x640] sm:$0xff] }
 0xd40   :  { %6371 = vmatpush3.bf16.msra.mxu0 %v6370_v20  ;;  %v4289_v20 = vld [vmem:[#allocation16 + $0x7b8] sm:$0xff] }
 0xd41   :  { %6373 = vmatprep.subr.bf16.mxu0 %v6372_v60  ;;  %v6434_v60 = vpack.c.bf16 %v4271_v7, %v4270_v16  ;;  %v6436_v9 = vpack.c.bf16 %v4289_v20, %v4288_v8  ;;  %v4155_v16 = vld [vmem:[#allocation19 + $0x678] sm:$0xff]  ;;  %v4152_v20 = vld [vmem:[#allocation19 + $0x660] sm:$0xff] }
 0xd44   :  { %6375 = vmatpush3.bf16.msra.mxu0 %v6374_v54  ;;  %v4291_v54 = vld [vmem:[#allocation16 + $0x7c8] sm:$0xff] }
 0xd45   :  { %6377 = vmatprep.subr.bf16.mxu0 %v6376_v18  ;;  %v6438_v18 = vpack.c.bf16 %v4273_v27, %v4272_v10  ;;  %v6440_v14 = vpack.c.bf16 %v4291_v54, %v4290_v26  ;;  %v4159_v10 = vld [vmem:[#allocation19 + $0x698] sm:$0xff]  ;;  %v4156_v54 = vld [vmem:[#allocation19 + $0x680] sm:$0xff] }
 0xd48   :  { %6379 = vmatpush3.bf16.msra.mxu0 %v6378_v63  ;;  %v4293_v63 = vld [vmem:[#allocation16 + $0x7d8] sm:$0xff] }
 0xd49   :  { %6381 = vmatprep.subr.bf16.mxu0 %v6380_v32  ;;  %v6442_v32 = vpack.c.bf16 %v4275_v42, %v4274_v33  ;;  %v6444_v34 = vpack.c.bf16 %v4293_v63, %v4292_v24  ;;  %v4163_v33 = vld [vmem:[#allocation19 + $0x6b8] sm:$0xff]  ;;  %v4160_v63 = vld [vmem:[#allocation19 + $0x6a0] sm:$0xff] }
 0xd4c   :  { %6383 = vmatpush3.bf16.msra.mxu0 %v6382_v59  ;;  %v4295_v59 = vld [vmem:[#allocation16 + $0x7e8] sm:$0xff] }
 0xd4d   :  { %6385 = vmatprep.subr.bf16.mxu0 %v6384_v38  ;;  %v6446_v38 = vpack.c.bf16 %v4277_v36, %v4276_v22  ;;  %v6448_v41 = vpack.c.bf16 %v4295_v59, %v4294_v62  ;;  %v4167_v22 = vld [vmem:[#allocation19 + $0x6d8] sm:$0xff]  ;;  %v4164_v59 = vld [vmem:[#allocation19 + $0x6c0] sm:$0xff] }
 0xd50   :  { %6387 = vmatpush3.bf16.msra.mxu0 %v6386_v29  ;;  %v4297_v29 = vld [vmem:[#allocation16 + $0x7f8] sm:$0xff] }
 0xd51   :  { %v5368_v0 = vpop.f32.mrb[64].mxu1  ;;  %6389 = vmatprep.subr.bf16.mxu0 %v6388_v31  ;;  %v6450_v31 = vpack.c.bf16 %v4279_v39, %v4278_v61  ;;  %v6452_v40 = vpack.c.bf16 %v4297_v29, %v4296_v11  ;;  %v4169_v61 = vld [vmem:[#allocation19 + $0x6e8] sm:$0xff]  ;;  %v4171_v39 = vld [vmem:[#allocation19 + $0x6f8] sm:$0xff]  ;;  %v4168_v29 = vld [vmem:[#allocation19 + $0x6e0] sm:$0xff] }
 0xd52   :  { %v5369_v28 = vpop.f32.mrb[65].mxu1  ;;  %v6420_v11 = vpack.c.bf16 %v4171_v39, %v4169_v61  ;;  %v4397_v61 = vld [vmem:[#allocation17 + $0x7b8] sm:$0xff] }
 0xd53   :  { %v7845_v51 = vadd.f32 %v5369_v28, %v5368_v0  ;;  %v4143_v0 = vld [vmem:[#allocation19 + $0x618] sm:$0xff]  ;;  %v6394_v28 = vpack.c.bf16 %v4142_v23, %v4140_v12 }
 0xd54   :  { %6391 = vmatpush3.bf16.msra.mxu0 %v6390_v3  ;;  %v4141_v3 = vld [vmem:[#allocation19 + $0x608] sm:$0xff] }
 0xd55   :  { %v5371_v15 = vpop.f32.mrb[66].mxu1  ;;  %6425 = vmatprep.subr.bf16.mxu0 %v6424_v48  ;;  %v6392_v48 = vpack.c.bf16 %v4143_v0, %v4141_v3  ;;  %v4125_v3 = vsub.f32 0.0, %v7845_v51 }
 0xd56   :  { %v5372_v55 = vpop.f32.mrb[67].mxu1 }
 0xd57   :  { %v7847_v43 = vadd.f32 %v5372_v55, %v5371_v15  ;;  %4115 = vmatmul.mubr.f32.vlgmr.msra.gmra.mrb[48].mxu0 %v7532_v44  ;;  %6393 = vmatprep.subr.bf16.mxu1 %v6392_v48  ;;  %v4144_v15 = vld [vmem:[#allocation19 + $0x620] sm:$0xff]  ;;  %v4151_v55 = vld [vmem:[#allocation19 + $0x658] sm:$0xff]  ;;  %v4127_v0 = vmul.f32 1.442695, %v4125_v3  ;;  %v4383_v3 = vld [vmem:[#allocation17 + $0x748] sm:$0xff] }
 0xd58   :  { %4119 = vmatprep.mubr.f32.mxu0 %v7544_v57  ;;  %6427 = vmatpush3.bf16.msra.mxu0 %v6426_v4  ;;  %v6396_v4 = vpack.c.bf16 %v4147_v25, %v4145_v1  ;;  %v6400_v5 = vpack.c.bf16 %v4151_v55, %v4149_v53 }
 0xd59   :  { %6429 = vmatprep.subr.bf16.mxu0 %v6428_v30  ;;  %6395 = vmatpush1.bf16.msra.mxu1 %v6394_v28  ;;  %v4146_v30 = vld [vmem:[#allocation19 + $0x630] sm:$0xff]  ;;  %v4126_v48 = vsub.f32 0.0, %v7847_v43  ;;  %6650 = vpow2.f32 %v4127_v0 }
 0xd5a   :  { %v6398_v52 = vpack.c.bf16 %v4146_v30, %v4144_v15  ;;  %6397 = vmatprep.subr.bf16.mxu1 %v6396_v4  ;;  %v3899_v4 = vpop.permute.xlu0 %3898  ;;  %v4400_v0 = vld [vmem:[#allocation17 + $0x7d0] sm:$0xff] }
 0xd5b   :  { %4120 = vmatmul.mubr.f32.gmra.mrb[50].mxu0 %v7542_v2  ;;  %v4129_v15 = vmul.f32 1.442695, %v4126_v48  ;;  %v4401_v48 = vld [vmem:[#allocation17 + $0x7d8] sm:$0xff] }
 0xd5c   :  { %6431 = vmatpush3.bf16.msra.mxu0 %v6430_v49  ;;  %4362 = vmatprep.mubr.f32.mxu0 %v7534_v45  ;;  %v4150_v49 = vld [vmem:[#allocation19 + $0x650] sm:$0xff] }
 0xd5d   :  { %6433 = vmatprep.subr.bf16.mxu0 %v6432_v13  ;;  %v4153_v13 = vld [vmem:[#allocation19 + $0x668] sm:$0xff]  ;;  %6399 = vmatpush1.bf16.msra.mxu1 %v6398_v52  ;;  %v6402_v7 = vpack.c.bf16 %v4150_v49, %v4148_v17  ;;  %6652 = vpow2.f32 %v4129_v15 }
 0xd5e   :  { %6401 = vmatprep.subr.bf16.mxu1 %v6400_v5  ;;  %v6404_v8 = vpack.c.bf16 %v4155_v16, %v4153_v13 }
 0xd60   :  { %6435 = vmatpush3.bf16.msra.mxu0 %v6434_v60  ;;  %v4154_v60 = vld [vmem:[#allocation19 + $0x670] sm:$0xff] }
 0xd61   :  { %6437 = vmatprep.subr.bf16.mxu0 %v6436_v9  ;;  %v4157_v9 = vld [vmem:[#allocation19 + $0x688] sm:$0xff]  ;;  %6403 = vmatpush1.bf16.msra.mxu1 %v6402_v7  ;;  %v6406_v27 = vpack.c.bf16 %v4154_v60, %v4152_v20 }
 0xd62   :  { %6405 = vmatprep.subr.bf16.mxu1 %v6404_v8  ;;  %v6408_v26 = vpack.c.bf16 %v4159_v10, %v4157_v9  ;;  %v4374_v8 = vld [vmem:[#allocation17 + $0x700] sm:$0xff]  ;;  %v4375_v20 = vld [vmem:[#allocation17 + $0x708] sm:$0xff]  ;;  %v4392_v9 = vld [vmem:[#allocation17 + $0x790] sm:$0xff] }
 0xd63   :  { %v4393_v10 = vld [vmem:[#allocation17 + $0x798] sm:$0xff] }
 0xd64   :  { %6439 = vmatpush3.bf16.msra.mxu0 %v6438_v18  ;;  %v4158_v18 = vld [vmem:[#allocation19 + $0x690] sm:$0xff] }
 0xd65   :  { %6441 = vmatprep.subr.bf16.mxu0 %v6440_v14  ;;  %v4161_v14 = vld [vmem:[#allocation19 + $0x6a8] sm:$0xff]  ;;  %6407 = vmatpush1.bf16.msra.mxu1 %v6406_v27  ;;  %v6410_v42 = vpack.c.bf16 %v4158_v18, %v4156_v54  ;;  %v6458_v54 = vpack.c.bf16 %v4375_v20, %v4374_v8 }
 0xd66   :  { %6409 = vmatprep.subr.bf16.mxu1 %v6408_v26  ;;  %v6412_v24 = vpack.c.bf16 %v4163_v33, %v4161_v14  ;;  %v6460_v14 = vpack.c.bf16 %v4393_v10, %v4392_v9  ;;  %v4376_v33 = vld [vmem:[#allocation17 + $0x710] sm:$0xff] }
 0xd68   :  { %6443 = vmatpush3.bf16.msra.mxu0 %v6442_v32  ;;  %v4162_v32 = vld [vmem:[#allocation19 + $0x6b0] sm:$0xff] }
 0xd69   :  { %6445 = vmatprep.subr.bf16.mxu0 %v6444_v34  ;;  %v4165_v34 = vld [vmem:[#allocation19 + $0x6c8] sm:$0xff]  ;;  %6411 = vmatpush1.bf16.msra.mxu1 %v6410_v42  ;;  %v6414_v36 = vpack.c.bf16 %v4162_v32, %v4160_v63  ;;  %v4377_v42 = vld [vmem:[#allocation17 + $0x718] sm:$0xff]  ;;  %v4394_v63 = vld [vmem:[#allocation17 + $0x7a0] sm:$0xff] }
 0xd6a   :  { %6413 = vmatprep.subr.bf16.mxu1 %v6412_v24  ;;  %v6416_v62 = vpack.c.bf16 %v4167_v22, %v4165_v34  ;;  %v4395_v32 = vld [vmem:[#allocation17 + $0x7a8] sm:$0xff] }
 0xd6c   :  { %6447 = vmatpush3.bf16.msra.mxu0 %v6446_v38  ;;  %v4166_v38 = vld [vmem:[#allocation19 + $0x6d0] sm:$0xff] }
 0xd6d   :  { %6449 = vmatprep.subr.bf16.mxu0 %v6448_v41  ;;  %6415 = vmatpush1.bf16.msra.mxu1 %v6414_v36  ;;  %v6418_v41 = vpack.c.bf16 %v4166_v38, %v4164_v59  ;;  %v6462_v36 = vpack.c.bf16 %v4377_v42, %v4376_v33  ;;  %v4378_v59 = vld [vmem:[#allocation17 + $0x720] sm:$0xff]  ;;  %v4379_v38 = vld [vmem:[#allocation17 + $0x728] sm:$0xff]  ;;  %v4503_v42 = vld [vmem:[#allocation19 + $0x738] sm:$0xff] }
 0xd6e   :  { %6417 = vmatprep.subr.bf16.mxu1 %v6416_v62  ;;  %v6464_v62 = vpack.c.bf16 %v4395_v32, %v4394_v63  ;;  %v6466_v39 = vpack.c.bf16 %v4379_v38, %v4378_v59  ;;  %v4501_v33 = vld [vmem:[#allocation19 + $0x728] sm:$0xff]  ;;  %v4500_v63 = vld [vmem:[#allocation19 + $0x720] sm:$0xff]  ;;  %v4502_v32 = vld [vmem:[#allocation19 + $0x730] sm:$0xff] }
 0xd70   :  { %6451 = vmatpush3.bf16.msra.mxu0 %v6450_v31  ;;  %v4170_v31 = vld [vmem:[#allocation19 + $0x6f0] sm:$0xff] }
 0xd71   :  { %6453 = vmatprep.subr.bf16.mxu0 %v6452_v40  ;;  %6419 = vmatpush1.bf16.msra.mxu1 %v6418_v41  ;;  %v6422_v40 = vpack.c.bf16 %v4170_v31, %v4168_v29  ;;  %v4396_v41 = vld [vmem:[#allocation17 + $0x7b0] sm:$0xff]  ;;  %v4381_v29 = vld [vmem:[#allocation17 + $0x738] sm:$0xff]  ;;  %v4398_v31 = vld [vmem:[#allocation17 + $0x7c0] sm:$0xff] }
 0xd72   :  { %6421 = vmatprep.subr.bf16.mxu1 %v6420_v11  ;;  %v4380_v11 = vld [vmem:[#allocation17 + $0x730] sm:$0xff] }
 0xd74   :  { %6455 = vmatpush3.bf16.msra.mxu0 %v6454_v19  ;;  %v6456_v19 = vpack.c.bf16 %v4391_v47, %v4390_v46  ;;  %v6470_v46 = vpack.c.bf16 %v4381_v29, %v4380_v11 }
 0xd75   :  { %6423 = vmatpush1.bf16.msra.mxu1 %v6422_v40  ;;  %v4399_v40 = vld [vmem:[#allocation17 + $0x7c8] sm:$0xff] }
 0xd76   :  { %6457 = vmatprep.subr.bf16.mxu1 %v6456_v19  ;;  %v6472_v47 = vpack.c.bf16 %v4399_v40, %v4398_v31  ;;  %v4382_v19 = vld [vmem:[#allocation17 + $0x740] sm:$0xff]  ;;  %v4514_v40 = vld [vmem:[#allocation19 + $0x790] sm:$0xff] }
 0xd77   :  { %4363 = vmatmul.mubr.f32.vlgmr.msra.gmra.mrb[52].mxu0 %v7532_v44  ;;  %v4512_v31 = vld [vmem:[#allocation19 + $0x780] sm:$0xff] }
 0xd78   :  { %4367 = vmatprep.mubr.f32.mxu0 %v7544_v57 }
 0xd7b   :  { %4368 = vmatmul.mubr.f32.gmra.mrb[54].mxu0 %v7542_v2 }
 0xd7c   :  { %4592 = vmatprep.mubr.f32.mxu0 %v6939_v56 }
 0xe0a   :  { %v3882_v12 = vpop.f32.mrb[44].mxu0 }
 0xe0b   :  { %v3901_v23 = vmul.f32 %v7795_v6, %v3882_v12  ;;  %v3884_v28 = vpop.f32.mrb[45].mxu0  ;;  %v6474_v12 = vpack.c.bf16 %v4383_v3, %v4382_v19  ;;  %v6506_v19 = vpack.c.bf16 %v4514_v40, %v4512_v31 }
 0xe0c   :  { %v3902_v1 = vmul.f32 %v7795_v6, %v3884_v28  ;;  %v6651_v6 = vpop.eup %6650  ;;  %v4385_v28 = vld [vmem:[#allocation17 + $0x758] sm:$0xff] }
 0xe0d   :  { %v7862_v25 = vadd.f32 %v3901_v23, %v7830_v21  ;;  %v4131_v21 = vadd.f32 1.0, %v6651_v6  ;;  %v6653_v13 = vpop.eup %6652  ;;  %v6476_v23 = vpack.c.bf16 %v4401_v48, %v4400_v0  ;;  %v4405_v6 = vld [vmem:[#allocation17 + $0x7f8] sm:$0xff]  ;;  %v4516_v0 = vld [vmem:[#allocation19 + $0x7a0] sm:$0xff]  ;;  %v4518_v48 = vld [vmem:[#allocation19 + $0x7b0] sm:$0xff] }
 0xe0e   :  { %v7865_v30 = vadd.f32 %v3902_v1, %v7833_v37  ;;  %v3888_v52 = vpop.f32.mrb[46].mxu0  ;;  %v4132_v16 = vadd.f32 1.0, %v6653_v13  ;;  %v4402_v1 = vld [vmem:[#allocation17 + $0x7e0] sm:$0xff] }
 0xe0f   :  { %v3903_v53 = vmul.f32 %v3899_v4, %v3888_v52  ;;  %v3890_v55 = vpop.f32.mrb[47].mxu0  ;;  %6654 = vrcp.f32 %v4131_v21 }
 0xe10   :  { %v3904_v17 = vmul.f32 %v3899_v4, %v3890_v55  ;;  %6656 = vrcp.f32 %v4132_v16  ;;  %v4403_v4 = vld [vmem:[#allocation17 + $0x7e8] sm:$0xff]  ;;  %v4388_v16 = vld [vmem:[#allocation17 + $0x770] sm:$0xff] }
 0xe11   :  { %v7868_v5 = vadd.f32 %v3903_v53, %v7836_v58  ;;  %v6480_v52 = vpack.c.bf16 %v4403_v4, %v4402_v1  ;;  %v4386_v53 = vld [vmem:[#allocation17 + $0x760] sm:$0xff]  ;;  %v4387_v55 = vld [vmem:[#allocation17 + $0x768] sm:$0xff]  ;;  %v4522_v4 = vld [vmem:[#allocation19 + $0x7d0] sm:$0xff] }
 0xe12   :  { %v7871_v49 = vadd.f32 %v3904_v17, %v7839_v35  ;;  %v4404_v17 = vld [vmem:[#allocation17 + $0x7f0] sm:$0xff]  ;;  %v6482_v21 = vpack.c.bf16 %v4387_v55, %v4386_v53  ;;  %v4520_v1 = vld [vmem:[#allocation19 + $0x7c0] sm:$0xff]  ;;  %v4527_v53 = vld [vmem:[#allocation19 + $0x7f8] sm:$0xff] }
 0xe13   :  { %v6484_v13 = vpack.c.bf16 %v4405_v6, %v4404_v17  ;;  %v4524_v17 = vld [vmem:[#allocation19 + $0x7e0] sm:$0xff]  ;;  %v4526_v6 = vld [vmem:[#allocation19 + $0x7f0] sm:$0xff] }
 0xe19   :  { %v6655_v7 = vpop.eup %6654 }
 0xe1a   :  { %v4135_v58 = vmul.f32 %v6655_v7, %v7845_v51  ;;  %v6657_v26 = vpop.eup %6656  ;;  %v4389_v7 = vld [vmem:[#allocation17 + $0x778] sm:$0xff] }
 0xe1b   :  { %v4136_v34 = vmul.f32 %v6657_v26, %v7847_v43  ;;  %v6468_v43 = vpack.c.bf16 %v4397_v61, %v4396_v41  ;;  %v4499_v26 = vld [vmem:[#allocation19 + $0x718] sm:$0xff]  ;;  %v4508_v41 = vld [vmem:[#allocation19 + $0x760] sm:$0xff]  ;;  %v4510_v61 = vld [vmem:[#allocation19 + $0x770] sm:$0xff] }
 0xe1c   :  { %v6502_v11 = vpack.c.bf16 %v4510_v61, %v4508_v41 }
 0xe2a   :  { %v5406_v37 = vpop.f32.mrb[48].mxu0 }
 0xe2b   :  { %v5407_v60 = vpop.f32.mrb[49].mxu0 }
 0xe2c   :  { %v5408_v27 = vadd.f32 %v5407_v60, %v5406_v37  ;;  %v6486_v37 = vpack.c.bf16 %v4389_v7, %v4388_v16 }
 0xe2e   :  { %v4137_v35 = vmul.f32 %v5408_v27, %v4135_v58  ;;  %v5409_v18 = vpop.f32.mrb[50].mxu0  ;;  %v4497_v27 = vld [vmem:[#allocation19 + $0x708] sm:$0xff] }
 0xe2f   :  { %v5410_v24 = vpop.f32.mrb[51].mxu0 }
 0xe30   :  { %v5411_v22 = vadd.f32 %v5410_v24, %v5409_v18  ;;  %4237 = vmatmul.mubr.f32.vlgmr.msra.gmra.mrb[68].mxu1 %v4137_v35  ;;  %v4496_v35 = vld [vmem:[#allocation19 + $0x700] sm:$0xff]  ;;  %v4498_v18 = vld [vmem:[#allocation19 + $0x710] sm:$0xff]  ;;  %v6492_v24 = vpack.c.bf16 %v4503_v42, %v4501_v33 }
 0xe31   :  { %6459 = vmatpush3.bf16.msra.mxu1 %v6458_v54  ;;  %4242 = vmatprep.mubr.f32.mxu1 %v6939_v56  ;;  %v6488_v54 = vpack.c.bf16 %v4499_v26, %v4497_v27  ;;  %v4255_v27 = vpop.permute.xlu1 %4254 }
 0xe32   :  { %v4138_v51 = vmul.f32 %v5411_v22, %v4136_v34  ;;  %6461 = vmatprep.subr.bf16.mxu1 %v6460_v14  ;;  %v6490_v14 = vpack.c.bf16 %v4498_v18, %v4496_v35  ;;  %v4505_v34 = vld [vmem:[#allocation19 + $0x748] sm:$0xff]  ;;  %v6494_v22 = vpack.c.bf16 %v4502_v32, %v4500_v63 }
 0xe33   :  { %6489 = vmatprep.subr.bf16.mxu0 %v6488_v54 }
 0xe34   :  { %4243 = vmatmul.mubr.f32.gmra.mrb[70].mxu1 %v4138_v51  ;;  %6491 = vmatpush1.bf16.msra.mxu0 %v6490_v14  ;;  %v4509_v51 = vld [vmem:[#allocation19 + $0x768] sm:$0xff] }
 0xe35   :  { %6463 = vmatpush3.bf16.msra.mxu1 %v6462_v36  ;;  %4470 = vmatprep.mubr.f32.mxu1 %v7534_v45  ;;  %v4384_v45 = vld [vmem:[#allocation17 + $0x750] sm:$0xff]  ;;  %v4504_v36 = vld [vmem:[#allocation19 + $0x740] sm:$0xff] }
 0xe36   :  { %6465 = vmatprep.subr.bf16.mxu1 %v6464_v62  ;;  %v6478_v15 = vpack.c.bf16 %v4385_v28, %v4384_v45  ;;  %6493 = vmatprep.subr.bf16.mxu0 %v6492_v24  ;;  %v4511_v62 = vld [vmem:[#allocation19 + $0x778] sm:$0xff]  ;;  %v6510_v45 = vpack.c.bf16 %v4518_v48, %v4516_v0 }
 0xe37   :  { %v6500_v38 = vpack.c.bf16 %v4511_v62, %v4509_v51 }
 0xe38   :  { %6495 = vmatpush1.bf16.msra.mxu0 %v6494_v22 }
 0xe39   :  { %6467 = vmatpush3.bf16.msra.mxu1 %v6466_v39  ;;  %v4513_v39 = vld [vmem:[#allocation19 + $0x788] sm:$0xff] }
 0xe3a   :  { %6469 = vmatprep.subr.bf16.mxu1 %v6468_v43  ;;  %v4515_v43 = vld [vmem:[#allocation19 + $0x798] sm:$0xff] }
 0xe3b   :  { %v6504_v29 = vpack.c.bf16 %v4515_v43, %v4513_v39 }
 0xe3d   :  { %6471 = vmatpush3.bf16.msra.mxu1 %v6470_v46  ;;  %v4517_v46 = vld [vmem:[#allocation19 + $0x7a8] sm:$0xff] }
 0xe3e   :  { %6473 = vmatprep.subr.bf16.mxu1 %v6472_v47  ;;  %v4519_v47 = vld [vmem:[#allocation19 + $0x7b8] sm:$0xff] }
 0xe3f   :  { %v6508_v3 = vpack.c.bf16 %v4519_v47, %v4517_v46 }
 0xe41   :  { %6475 = vmatpush3.bf16.msra.mxu1 %v6474_v12  ;;  %v4521_v12 = vld [vmem:[#allocation19 + $0x7c8] sm:$0xff] }
 0xe42   :  { %6477 = vmatprep.subr.bf16.mxu1 %v6476_v23  ;;  %v4523_v23 = vld [vmem:[#allocation19 + $0x7d8] sm:$0xff] }
 0xe43   :  { %v6512_v28 = vpack.c.bf16 %v4523_v23, %v4521_v12 }
 0xe45   :  { %6479 = vmatpush3.bf16.msra.mxu1 %v6478_v15  ;;  %v6514_v15 = vpack.c.bf16 %v4522_v4, %v4520_v1 }
 0xe46   :  { %6481 = vmatprep.subr.bf16.mxu1 %v6480_v52  ;;  %v4525_v52 = vld [vmem:[#allocation19 + $0x7e8] sm:$0xff] }
 0xe47   :  { %v6516_v55 = vpack.c.bf16 %v4527_v53, %v4525_v52 }
 0xe49   :  { %6483 = vmatpush3.bf16.msra.mxu1 %v6482_v21  ;;  %v6518_v21 = vpack.c.bf16 %v4526_v6, %v4524_v17 }
 0xe4a   :  { %v5444_v8 = vpop.f32.mrb[52].mxu0  ;;  %6485 = vmatprep.subr.bf16.mxu1 %v6484_v13 }
 0xe4b   :  { %v5445_v20 = vpop.f32.mrb[53].mxu0 }
 0xe4c   :  { %v7877_v60 = vadd.f32 %v5445_v20, %v5444_v8 }
 0xe4d   :  { %6487 = vmatpush3.bf16.msra.mxu1 %v6486_v37 }
 0xe4e   :  { %v5447_v9 = vpop.f32.mrb[54].mxu0  ;;  %v4481_v13 = vsub.f32 0.0, %v7877_v60 }
 0xe4f   :  { %v5448_v10 = vpop.f32.mrb[55].mxu0 }
 0xe50   :  { %v7879_v58 = vadd.f32 %v5448_v10, %v5447_v9  ;;  %4471 = vmatmul.mubr.f32.vlgmr.msra.gmra.mrb[72].mxu1 %v7532_v44  ;;  %v4507_v44 = vld [vmem:[#allocation19 + $0x758] sm:$0xff]  ;;  %v4483_v16 = vmul.f32 1.442695, %v4481_v13 }
 0xe51   :  { %4475 = vmatprep.mubr.f32.mxu1 %v7544_v57  ;;  %v4506_v57 = vld [vmem:[#allocation19 + $0x750] sm:$0xff] }
 0xe52   :  { %v6498_v59 = vpack.c.bf16 %v4506_v57, %v4504_v36  ;;  %v4482_v7 = vsub.f32 0.0, %v7879_v58  ;;  %6658 = vpow2.f32 %v4483_v16 }
 0xe54   :  { %4476 = vmatmul.mubr.f32.gmra.mrb[74].mxu1 %v7542_v2  ;;  %v6496_v2 = vpack.c.bf16 %v4507_v44, %v4505_v34  ;;  %v4485_v26 = vmul.f32 1.442695, %v4482_v7 }
 0xe56   :  { %6497 = vmatprep.subr.bf16.mxu0 %v6496_v2  ;;  %6660 = vpow2.f32 %v4485_v26 }
 0xe57   :  { %6499 = vmatpush1.bf16.msra.mxu0 %v6498_v59 }
 0xe58   :  { %6501 = vmatprep.subr.bf16.mxu0 %v6500_v38 }
 0xe5b   :  { %6503 = vmatpush1.bf16.msra.mxu0 %v6502_v11 }
 0xe5c   :  { %6505 = vmatprep.subr.bf16.mxu0 %v6504_v29  ;;  %v6659_v63 = vpop.eup %6658 }
 0xe5d   :  { %v4487_v32 = vadd.f32 1.0, %v6659_v63 }
 0xe5f   :  { %6507 = vmatpush1.bf16.msra.mxu0 %v6506_v19  ;;  %6662 = vrcp.f32 %v4487_v32 }
 0xe60   :  { %6509 = vmatprep.subr.bf16.mxu0 %v6508_v3  ;;  %v6661_v34 = vpop.eup %6660 }
 0xe63   :  { %6511 = vmatpush1.bf16.msra.mxu0 %v6510_v45 }
 0xe64   :  { %6513 = vmatprep.subr.bf16.mxu0 %v6512_v28 }
 0xe67   :  { %6515 = vmatpush1.bf16.msra.mxu0 %v6514_v15 }
 0xe68   :  { %6517 = vmatprep.subr.bf16.mxu0 %v6516_v55 }
 0xe6b   :  { %6519 = vmatpush1.bf16.msra.mxu0 %v6518_v21 }
 0xf03   :  { %v4238_v37 = vpop.f32.mrb[68].mxu1 }
 0xf04   :  { %v4257_v8 = vmul.f32 %v7797_v50, %v4238_v37  ;;  %v4240_v20 = vpop.f32.mrb[69].mxu1 }
 0xf05   :  { %v4258_v9 = vmul.f32 %v7797_v50, %v4240_v20  ;;  %v4488_v50 = vadd.f32 1.0, %v6661_v34 }
 0xf06   :  { %v4261_v10 = vadd.f32 %v4257_v8, %v7862_v25  ;;  %v6663_v25 = vpop.eup %6662 }
 0xf07   :  { %v4262_v54 = vadd.f32 %v4258_v9, %v7865_v30  ;;  %v4244_v35 = vpop.f32.mrb[70].mxu1  ;;  %6664 = vrcp.f32 %v4488_v50  ;;  %v4491_v30 = vmul.f32 %v6663_v25, %v7877_v60 }
 0xf08   :  { %v4259_v18 = vmul.f32 %v4255_v27, %v4244_v35  ;;  %v4246_v14 = vpop.f32.mrb[71].mxu1 }
 0xf09   :  { %v4260_v33 = vmul.f32 %v4255_v27, %v4246_v14 }
 0xf0a   :  { %v4263_v42 = vadd.f32 %v4259_v18, %v7868_v5 }
 0xf0b   :  { %v4264_v24 = vadd.f32 %v4260_v33, %v7871_v49 }
 0xf11   :  { %v6665_v57 = vpop.eup %6664 }
 0xf12   :  { %v4492_v5 = vmul.f32 %v6665_v57, %v7879_v58 }
 0xf23   :  { %v5482_v22 = vpop.f32.mrb[72].mxu1 }
 0xf24   :  { %v5483_v44 = vpop.f32.mrb[73].mxu1 }
 0xf25   :  { %v5484_v36 = vadd.f32 %v5483_v44, %v5482_v22 }
 0xf27   :  { %v4493_v2 = vmul.f32 %v5484_v36, %v4491_v30  ;;  %v5485_v51 = vpop.f32.mrb[74].mxu1 }
 0xf28   :  { %v5486_v62 = vpop.f32.mrb[75].mxu1 }
 0xf29   :  { %v5487_v59 = vadd.f32 %v5486_v62, %v5485_v51  ;;  %4593 = vmatmul.mubr.f32.vlgmr.msra.gmra.mrb[56].mxu0 %v4493_v2 }
 0xf2a   :  { %4598 = vmatprep.mubr.f32.mxu0 %v6939_v56 }
 0xf2b   :  { %v4494_v49 = vmul.f32 %v5487_v59, %v4492_v5 }
 0xf2d   :  { %4599 = vmatmul.mubr.f32.gmra.mrb[58].mxu0 %v4494_v49 }
 0xf2e   :  { %6879 = shalt.err (!%p6876_p6)
}
 0xf2f   :  { %s6880_s22 = scalar_lea.hbm %s7939_s14, 512 }
 0xf30   :  { %p6881_p7 = scmp.ne.s32.totalorder %s7939_s14, %s6880_s22  ;;  %p6884_p8 = scmp.lt.u32.totalorder %s6880_s22, %s7939_s14 }
 0xf32   :  { %p6886_p9 = pnand %p6884_p8, %p6881_p7 }
 0xf34   :  { %6889 = shalt.err (!%p6886_p9)
}
 0xf35   :  { %4640 = dma.vmem_to_hbm [thread:$0]  %s4635_s5, 512, %s7939_s14, [#allocation7], %s6935_s4, %s6935_s4, %s6936_s23   ;;  %v4607_v56 = vpop.permute.xlu0 %4606  ;;  %v4611_v39 = vpop.permute.xlu1 %4610 }
 0xf36   :  { %s6951_s6 = smov [#allocation21]  }
 0xf37   :  { %s4646_s16 = sshll.u32 %s6951_s6, 4  ;;  %s4647_s16 = int_to_ptr.vmem [resolvable:$true] %s4646_s16 }
 0xf38   :  { %s6890_s14 = scalar_lea.vmem %s4647_s16, 512  ;;  %p6895_p11 = scmp.lt.s32.totalorder %s4647_s16, %s4647_s16 }
 0xf39   :  { %p6891_p10 = scmp.ne.s32.totalorder %s4647_s16, %s6890_s14  ;;  %p6896_p12 = scmp.lt.s32.totalorder %s6890_s14, %s6890_s14 }
 0xf3b   :  { %p6897_p13 = por %p6896_p12, %p6895_p11 }
 0xf3d   :  { %p6898_p0 = pnand %p6897_p13, %p6891_p10 }
 0xffc   :  { %v4594_v60 = vpop.f32.mrb[56].mxu0 }
 0xffd   :  { %v4613_v58 = vmul.f32 %v4607_v56, %v4594_v60  ;;  %v4596_v38 = vpop.f32.mrb[57].mxu0 }
 0xffe   :  { %v4614_v41 = vmul.f32 %v4607_v56, %v4596_v38 }
 0xfff   :  { %v4617_v61 = vadd.f32 %v4613_v58, %v4261_v10 }
0x1000   :  { %v4618_v43 = vadd.f32 %v4614_v41, %v4262_v54  ;;  %v4600_v11 = vpop.f32.mrb[58].mxu0 }
0x1001   :  { %4625 = vst [vmem:[#allocation21] sm:$0xff] %v4617_v61  ;;  %v4615_v29 = vmul.f32 %v4611_v39, %v4600_v11  ;;  %v4602_v31 = vpop.f32.mrb[59].mxu0 }
0x1002   :  { %4626 = vst [vmem:[#allocation21 + $0x8] sm:$0xff] %v4618_v43  ;;  %v4616_v40 = vmul.f32 %v4611_v39, %v4602_v31 }
0x1003   :  { %v4619_v46 = vadd.f32 %v4615_v29, %v4263_v42 }
0x1004   :  { %v4620_v47 = vadd.f32 %v4616_v40, %v4264_v24 }
0x1005   :  { %4627 = vst [vmem:[#allocation21 + $0x10] sm:$0xff] %v4619_v46 }
0x1006   :  { %4628 = vst [vmem:[#allocation21 + $0x18] sm:$0xff] %v4620_v47 }
0x1007   :  { %6901 = shalt.err (!%p6898_p0)
}
0x1008   :  { %s6902_s29 = scalar_lea.hbm %s7940_s15, 512 }
0x1009   :  { %p6903_p1 = scmp.ne.s32.totalorder %s7940_s15, %s6902_s29  ;;  %p6906_p2 = scmp.lt.u32.totalorder %s6902_s29, %s7940_s15 }
0x100b   :  { %p6908_p3 = pnand %p6906_p2, %p6903_p1 }
0x100d   :  { %6911 = shalt.err (!%p6908_p3)
}
0x100e   :  { %4652 = dma.vmem_to_hbm [thread:$0]  %s4647_s16, 512, %s7940_s15, [#allocation22], %s6935_s4, %s6935_s4, %s6936_s23  }
0x100f   :  { %6922 = dma.done.wait [#allocation7], 512  }
0x1010   :  { %6923 = vsyncadd [#allocation7], 4294966784 }
0x1011   :  { %6924 = dma.done.wait [#allocation22], 512  }
0x1012   :  { %6925 = vsyncadd [#allocation22], 4294966784 }
0x1013   :  { %4659 = vsyncpa [#allocation6], 1 }
0x1014   :  { %4660 = vsyncpa [#allocation9], 1 }
0x1015   :  { %4661 = vsyncpa [#allocation12], 1 }
0x1016   :  { %4662 = vsyncpa [#allocation15], 1 }
0x1017   :  { %4663 = vsyncpa [#allocation18], 1 }
0x1018   :  { %4664 = vsyncpa [#allocation7], 1 }
0x1019   :  { %4665 = vsyncpa [#allocation22], 1 }

</bundles_post_ra>
